<compile_context>
chip_gen: v7x
topology: tpu7x:2x2x1
jax: 0.10.0
libtpu: 0.0.40
codegen_flags: <defaults>
</compile_context>

<pallas_src>
import functools

import jax
import jax.numpy as jnp
from jax.experimental import pallas as pl
from jax.experimental.pallas import tpu as pltpu


def _round_up(n, m):
    return ((n + m - 1) // m) * m


def fused_net_kernel(x_ref, w_ref, p_ref, o_ref, *, cfgs, tpad, t0, B, eps):
    """x_ref : (B*tpad, 256) bf16   flattened, feature-padded activations
    w_ref : (n_taps, 256, 256) bf16 per-context-tap Linear blocks (stacked)
    p_ref : (n_layers, 3, 256) f32  [bias, gamma, beta] per layer
    o_ref : (B*tpad, 256) f32       final-layer output slab (sliced outside)
    """
    R = B * tpad
    n_layers = len(cfgs)

    # Row -> position-within-batch-item (for masking rows past the valid T).
    row = jax.lax.broadcasted_iota(jnp.int32, (R, 1), 0)
    if tpad & (tpad - 1) == 0:
        t_in = jnp.bitwise_and(row, tpad - 1)
    else:
        t_in = jax.lax.rem(row, tpad)

    a = x_ref[...]                                    # (R, 256) bf16
    cur_t = t0
    tap = 0
    y = None
    for i, (ctx, dil) in enumerate(cfgs):
        new_t = cur_t - dil * (ctx - 1)

        # ---- unfold + Linear: one full-tile matmul per context tap; combine
        #      taps with a row-roll (XLU) so shapes stay constant & aligned ----
        h = jnp.dot(a, w_ref[tap], preferred_element_type=jnp.float32)
        for j in range(1, ctx):
            hj = jnp.dot(a, w_ref[tap + j], preferred_element_type=jnp.float32)
            # want h[t] += hj[t + j*dil]  ==  jnp.roll(hj, -j*dil, axis=0);
            # use the positive modular shift for pltpu.roll.
            h = h + pltpu.roll(hj, R - j * dil, 0)
        tap += ctx

        par = p_ref[i]                                # (3, 256) f32
        bias, gamma, beta = par[0:1], par[1:2], par[2:3]

        h = jnp.maximum(h + bias, 0.0)                # TDNN-internal bias+ReLU

        # ---- BatchNorm1d (training-mode biased batch stats over the B*new_t
        #      valid rows), single-pass sum / sum-of-squares in f32 ----
        valid = (t_in < new_t).astype(jnp.float32)    # (R, 1)
        hm = h * valid
        inv_n = 1.0 / float(B * new_t)
        mean = jnp.sum(hm, axis=0, keepdims=True) * inv_n
        ex2 = jnp.sum(hm * hm, axis=0, keepdims=True) * inv_n
        var = jnp.maximum(ex2 - mean * mean, 0.0)
        scale = jax.lax.rsqrt(var + eps) * gamma      # (1, 256), broadcast once
        shift = beta - mean * scale
        y = h * scale + shift

        if i != n_layers - 1:
            y = jnp.maximum(y, 0.0)                   # inter-layer nn.ReLU()
            a = y.astype(jnp.bfloat16)                # carry activations in bf16
        cur_t = new_t

    o_ref[...] = y.astype(o_ref.dtype)                # full, aligned store


def init_params(key, in_size, num_classes, feat_pad=256):
    """Static (ctx, dilation) configs + packed, lane-padded parameters.

    Weight init is normal/sqrt(ctx*din) (not PyTorch's Kaiming-uniform) --
    fine for a perf kernel; padded rows/cols/lanes are exactly zero so padded
    lanes stay inert through BN.
    """
    layer_dims = (
        (3, 1, in_size, 256),
        (3, 1, 256, 256),
        (3, 1, 256, 256),
        (1, 1, 256, 256),
        (1, 1, 256, 256),
        (1, 1, 256, num_classes),
    )
    cfgs = tuple((c, d) for (c, d, _, _) in layer_dims)
    n_taps = sum(c for (c, _, _, _) in layer_dims)

    w_packed = jnp.zeros((n_taps, feat_pad, feat_pad), jnp.float32)
    p_packed = jnp.zeros((len(layer_dims), 3, feat_pad), jnp.float32)
    tap = 0
    for i, (ctx, _dil, din, dout) in enumerate(layer_dims):
        key, kw, kb, kg, kbe = jax.random.split(key, 5)
        w = jax.random.normal(kw, (ctx, din, dout), jnp.float32) / jnp.sqrt(
            float(ctx * din))
        w_packed = w_packed.at[tap:tap + ctx, :din, :dout].set(w)
        p_packed = p_packed.at[i, 0, :dout].set(
            0.01 * jax.random.normal(kb, (dout,), jnp.float32))
        p_packed = p_packed.at[i, 1, :dout].set(
            1.0 + 0.01 * jax.random.normal(kg, (dout,), jnp.float32))
        p_packed = p_packed.at[i, 2, :dout].set(
            0.01 * jax.random.normal(kbe, (dout,), jnp.float32))
        tap += ctx
    return cfgs, w_packed.astype(jnp.bfloat16), p_packed


@functools.partial(jax.jit, static_argnames=("cfgs", "num_classes"))
def net_forward(x, w_packed, p_packed, *, cfgs, num_classes):
    B, T, din = x.shape
    feat_pad = w_packed.shape[1]
    tpad = _round_up(T, 8)
    final_t = T - sum(d * (c - 1) for (c, d) in cfgs)

    # Pad features to the uniform 256-lane width, pad T to a sublane multiple,
    # flatten batch into the matmul M dimension, cast to the MXU input dtype.
    xp = jnp.zeros((B, tpad, feat_pad), jnp.bfloat16)
    xp = xp.at[:, :T, :din].set(x.astype(jnp.bfloat16))
    x_flat = xp.reshape(B * tpad, feat_pad)

    kernel = functools.partial(fused_net_kernel, cfgs=cfgs, tpad=tpad, t0=T,
                               B=B, eps=1e-5)
    out = pl.pallas_call(
        kernel,
        out_shape=jax.ShapeDtypeStruct((B * tpad, feat_pad), jnp.float32),
        in_specs=[pl.BlockSpec(memory_space=pltpu.MemorySpace.VMEM)] * 3,
        out_specs=pl.BlockSpec(memory_space=pltpu.MemorySpace.VMEM),
    )(x_flat, w_packed, p_packed)

    # Kernel writes a fully aligned slab; slice valid rows / real logit lanes
    # outside the kernel (cheap XLA op).
    out = out.reshape(B, tpad, feat_pad)
    return out[:, :final_t, :num_classes]
    # TODO(synk): for large B*T add an M-tiled grid (two-phase BN reduction,
    # "parallel" row axis for megacore), with row tiles sized ~half on v7x
    # (64 MiB VMEM) vs v6e (128 MiB) and vmem_limit_bytes raised accordingly.


def reference_forward(x, w_packed, p_packed, cfgs, num_classes, eps=1e-5):
    """Pure-JAX reference with the same dtype policy as the kernel."""
    B, T, din = x.shape
    feat_pad = w_packed.shape[1]
    a = jnp.zeros((B, T, feat_pad), jnp.float32).at[:, :, :din].set(x)
    tap = 0
    n_layers = len(cfgs)
    for i, (ctx, dil) in enumerate(cfgs):
        new_t = a.shape[1] - dil * (ctx - 1)
        ab = a.astype(jnp.bfloat16)
        h = jnp.zeros((B, new_t, feat_pad), jnp.float32)
        for j in range(ctx):
            h = h + jnp.einsum("btd,dn->btn",
                               ab[:, j * dil:j * dil + new_t, :],
                               w_packed[tap + j],
                               preferred_element_type=jnp.float32)
        tap += ctx
        bias, gamma, beta = p_packed[i, 0], p_packed[i, 1], p_packed[i, 2]
        h = jnp.maximum(h + bias, 0.0)
        mean = jnp.mean(h, axis=(0, 1))
        var = jnp.maximum(jnp.mean(h * h, axis=(0, 1)) - mean * mean, 0.0)
        scale = jax.lax.rsqrt(var + eps) * gamma
        shift = beta - mean * scale
        a = h * scale + shift
        if i != n_layers - 1:
            a = jnp.maximum(a, 0.0)
    return a[:, :, :num_classes]


if __name__ == "__main__":
    B, T, in_size, num_classes = 2, 16, 24, 10
    key = jax.random.PRNGKey(0)
    kx, kp = jax.random.split(key)
    x = jax.random.normal(kx, (B, T, in_size), jnp.float32)

    cfgs, w_packed, p_packed = init_params(kp, in_size, num_classes)

    out = net_forward(x, w_packed, p_packed, cfgs=cfgs, num_classes=num_classes)
    out = jax.block_until_ready(out)

    # Three context-3 layers shrink T by 2 each: 16 -> 14 -> 12 -> 10.
    assert out.shape == (B, T - 6, num_classes), out.shape
    assert bool(jnp.all(jnp.isfinite(out)))

    ref = reference_forward(x, w_packed, p_packed, cfgs, num_classes)
    max_err = float(jnp.max(jnp.abs(out - ref)))
    assert max_err < 5e-2, f"max |kernel - reference| = {max_err}"

    print("KERNEL_OK")
</pallas_src>

<mosaic_0001>
module attributes {stable_mosaic.version = 11 : i64} {
  func.func @fused_net_kernel(%arg0: memref<32x256xbf16, #tpu.memory_space<vmem>>, %arg1: memref<12x256x256xbf16, #tpu.memory_space<vmem>>, %arg2: memref<6x3x256xf32, #tpu.memory_space<vmem>>, %arg3: memref<32x256xf32, #tpu.memory_space<vmem>>) attributes {dimension_semantics = [], scalar_prefetch = 0 : i64, scratch_operands = 0 : i64, tpu.core_type = #tpu.core_type<tc>} {
    %0 = tpu.iota {dimensions = array<i32: 0>} : vector<32x1xi32>
    %c15_i32 = arith.constant 15 : i32
    %1 = vector.broadcast %c15_i32 : i32 to vector<32x1xi32>
    %2 = arith.andi %0, %1 : vector<32x1xi32>
    %c0 = arith.constant 0 : index
    %c0_0 = arith.constant 0 : index
    %3 = vector.load %arg0[%c0, %c0_0] : memref<32x256xbf16, #tpu.memory_space<vmem>>, vector<32x256xbf16>
    %c0_1 = arith.constant 0 : index
    %c0_2 = arith.constant 0 : index
    %c0_3 = arith.constant 0 : index
    %4 = vector.load %arg1[%c0_1, %c0_2, %c0_3] : memref<12x256x256xbf16, #tpu.memory_space<vmem>>, vector<1x256x256xbf16>
    %5 = vector.shape_cast %4 : vector<1x256x256xbf16> to vector<256x256xbf16>
    %cst = arith.constant dense<0.000000e+00> : vector<32x256xf32>
    %6 = tpu.matmul %3, %5, %cst {dimension_numbers = #tpu.dot_dimension_numbers<[1], [0], [0], [1], [0, 0, 1, 1], [], []>} : vector<32x256xbf16>, vector<256x256xbf16>, vector<32x256xf32> -> vector<32x256xf32>
    %c1 = arith.constant 1 : index
    %c0_4 = arith.constant 0 : index
    %c0_5 = arith.constant 0 : index
    %7 = vector.load %arg1[%c1, %c0_4, %c0_5] : memref<12x256x256xbf16, #tpu.memory_space<vmem>>, vector<1x256x256xbf16>
    %8 = vector.shape_cast %7 : vector<1x256x256xbf16> to vector<256x256xbf16>
    %cst_6 = arith.constant dense<0.000000e+00> : vector<32x256xf32>
    %9 = tpu.matmul %3, %8, %cst_6 {dimension_numbers = #tpu.dot_dimension_numbers<[1], [0], [0], [1], [0, 0, 1, 1], [], []>} : vector<32x256xbf16>, vector<256x256xbf16>, vector<32x256xf32> -> vector<32x256xf32>
    %c31_i32 = arith.constant 31 : i32
    %10 = tpu.dynamic_rotate %9 by %c31_i32 dim 0 : vector<32x256xf32>, i32 -> vector<32x256xf32>
    %11 = arith.addf %6, %10 : vector<32x256xf32>
    %c2 = arith.constant 2 : index
    %c0_7 = arith.constant 0 : index
    %c0_8 = arith.constant 0 : index
    %12 = vector.load %arg1[%c2, %c0_7, %c0_8] : memref<12x256x256xbf16, #tpu.memory_space<vmem>>, vector<1x256x256xbf16>
    %13 = vector.shape_cast %12 : vector<1x256x256xbf16> to vector<256x256xbf16>
    %cst_9 = arith.constant dense<0.000000e+00> : vector<32x256xf32>
    %14 = tpu.matmul %3, %13, %cst_9 {dimension_numbers = #tpu.dot_dimension_numbers<[1], [0], [0], [1], [0, 0, 1, 1], [], []>} : vector<32x256xbf16>, vector<256x256xbf16>, vector<32x256xf32> -> vector<32x256xf32>
    %c30_i32 = arith.constant 30 : i32
    %15 = tpu.dynamic_rotate %14 by %c30_i32 dim 0 : vector<32x256xf32>, i32 -> vector<32x256xf32>
    %16 = arith.addf %11, %15 : vector<32x256xf32>
    %c0_10 = arith.constant 0 : index
    %c0_11 = arith.constant 0 : index
    %c0_12 = arith.constant 0 : index
    %17 = vector.load %arg2[%c0_10, %c0_11, %c0_12] : memref<6x3x256xf32, #tpu.memory_space<vmem>>, vector<1x3x256xf32>
    %18 = vector.shape_cast %17 : vector<1x3x256xf32> to vector<3x256xf32>
    %19 = vector.extract_strided_slice %18 {offsets = [0, 0], sizes = [1, 256], strides = [1, 1]} : vector<3x256xf32> to vector<1x256xf32>
    %20 = vector.extract_strided_slice %18 {offsets = [1, 0], sizes = [1, 256], strides = [1, 1]} : vector<3x256xf32> to vector<1x256xf32>
    %21 = vector.extract_strided_slice %18 {offsets = [2, 0], sizes = [1, 256], strides = [1, 1]} : vector<3x256xf32> to vector<1x256xf32>
    %22 = vector.broadcast %19 : vector<1x256xf32> to vector<32x256xf32>
    %23 = arith.addf %16, %22 : vector<32x256xf32>
    %cst_13 = arith.constant 0.000000e+00 : f32
    %24 = vector.broadcast %cst_13 : f32 to vector<32x256xf32>
    %25 = arith.maximumf %23, %24 : vector<32x256xf32>
    %c14_i32 = arith.constant 14 : i32
    %26 = vector.broadcast %c14_i32 : i32 to vector<32x1xi32>
    %27 = arith.cmpi slt, %2, %26 : vector<32x1xi32>
    %28 = arith.extui %27 : vector<32x1xi1> to vector<32x1xi32>
    %29 = arith.sitofp %28 : vector<32x1xi32> to vector<32x1xf32>
    %30 = vector.broadcast %29 : vector<32x1xf32> to vector<32x256xf32>
    %31 = arith.mulf %25, %30 : vector<32x256xf32>
    %cst_14 = arith.constant dense<0.000000e+00> : vector<256xf32>
    %32 = vector.multi_reduction <add>, %31, %cst_14 [0] : vector<32x256xf32> to vector<256xf32>
    %33 = vector.shape_cast %32 : vector<256xf32> to vector<1x256xf32>
    %cst_15 = arith.constant 0.0357142873 : f32
    %34 = vector.broadcast %cst_15 : f32 to vector<1x256xf32>
    %35 = arith.mulf %33, %34 : vector<1x256xf32>
    %36 = arith.mulf %31, %31 : vector<32x256xf32>
    %cst_16 = arith.constant dense<0.000000e+00> : vector<256xf32>
    %37 = vector.multi_reduction <add>, %36, %cst_16 [0] : vector<32x256xf32> to vector<256xf32>
    %38 = vector.shape_cast %37 : vector<256xf32> to vector<1x256xf32>
    %cst_17 = arith.constant 0.0357142873 : f32
    %39 = vector.broadcast %cst_17 : f32 to vector<1x256xf32>
    %40 = arith.mulf %38, %39 : vector<1x256xf32>
    %41 = arith.mulf %35, %35 : vector<1x256xf32>
    %42 = arith.subf %40, %41 : vector<1x256xf32>
    %cst_18 = arith.constant 0.000000e+00 : f32
    %43 = vector.broadcast %cst_18 : f32 to vector<1x256xf32>
    %44 = arith.maximumf %42, %43 : vector<1x256xf32>
    %cst_19 = arith.constant 9.99999974E-6 : f32
    %45 = vector.broadcast %cst_19 : f32 to vector<1x256xf32>
    %46 = arith.addf %44, %45 : vector<1x256xf32>
    %47 = math.rsqrt %46 : vector<1x256xf32>
    %48 = arith.mulf %47, %20 : vector<1x256xf32>
    %49 = arith.mulf %35, %48 : vector<1x256xf32>
    %50 = arith.subf %21, %49 : vector<1x256xf32>
    %51 = vector.broadcast %48 : vector<1x256xf32> to vector<32x256xf32>
    %52 = arith.mulf %25, %51 : vector<32x256xf32>
    %53 = vector.broadcast %50 : vector<1x256xf32> to vector<32x256xf32>
    %54 = arith.addf %52, %53 : vector<32x256xf32>
    %cst_20 = arith.constant 0.000000e+00 : f32
    %55 = vector.broadcast %cst_20 : f32 to vector<32x256xf32>
    %56 = arith.maximumf %54, %55 : vector<32x256xf32>
    %57 = arith.truncf %56 : vector<32x256xf32> to vector<32x256xbf16>
    %c3 = arith.constant 3 : index
    %c0_21 = arith.constant 0 : index
    %c0_22 = arith.constant 0 : index
    %58 = vector.load %arg1[%c3, %c0_21, %c0_22] : memref<12x256x256xbf16, #tpu.memory_space<vmem>>, vector<1x256x256xbf16>
    %59 = vector.shape_cast %58 : vector<1x256x256xbf16> to vector<256x256xbf16>
    %cst_23 = arith.constant dense<0.000000e+00> : vector<32x256xf32>
    %60 = tpu.matmul %57, %59, %cst_23 {dimension_numbers = #tpu.dot_dimension_numbers<[1], [0], [0], [1], [0, 0, 1, 1], [], []>} : vector<32x256xbf16>, vector<256x256xbf16>, vector<32x256xf32> -> vector<32x256xf32>
    %c4 = arith.constant 4 : index
    %c0_24 = arith.constant 0 : index
    %c0_25 = arith.constant 0 : index
    %61 = vector.load %arg1[%c4, %c0_24, %c0_25] : memref<12x256x256xbf16, #tpu.memory_space<vmem>>, vector<1x256x256xbf16>
    %62 = vector.shape_cast %61 : vector<1x256x256xbf16> to vector<256x256xbf16>
    %cst_26 = arith.constant dense<0.000000e+00> : vector<32x256xf32>
    %63 = tpu.matmul %57, %62, %cst_26 {dimension_numbers = #tpu.dot_dimension_numbers<[1], [0], [0], [1], [0, 0, 1, 1], [], []>} : vector<32x256xbf16>, vector<256x256xbf16>, vector<32x256xf32> -> vector<32x256xf32>
    %c31_i32_27 = arith.constant 31 : i32
    %64 = tpu.dynamic_rotate %63 by %c31_i32_27 dim 0 : vector<32x256xf32>, i32 -> vector<32x256xf32>
    %65 = arith.addf %60, %64 : vector<32x256xf32>
    %c5 = arith.constant 5 : index
    %c0_28 = arith.constant 0 : index
    %c0_29 = arith.constant 0 : index
    %66 = vector.load %arg1[%c5, %c0_28, %c0_29] : memref<12x256x256xbf16, #tpu.memory_space<vmem>>, vector<1x256x256xbf16>
    %67 = vector.shape_cast %66 : vector<1x256x256xbf16> to vector<256x256xbf16>
    %cst_30 = arith.constant dense<0.000000e+00> : vector<32x256xf32>
    %68 = tpu.matmul %57, %67, %cst_30 {dimension_numbers = #tpu.dot_dimension_numbers<[1], [0], [0], [1], [0, 0, 1, 1], [], []>} : vector<32x256xbf16>, vector<256x256xbf16>, vector<32x256xf32> -> vector<32x256xf32>
    %c30_i32_31 = arith.constant 30 : i32
    %69 = tpu.dynamic_rotate %68 by %c30_i32_31 dim 0 : vector<32x256xf32>, i32 -> vector<32x256xf32>
    %70 = arith.addf %65, %69 : vector<32x256xf32>
    %c1_32 = arith.constant 1 : index
    %c0_33 = arith.constant 0 : index
    %c0_34 = arith.constant 0 : index
    %71 = vector.load %arg2[%c1_32, %c0_33, %c0_34] : memref<6x3x256xf32, #tpu.memory_space<vmem>>, vector<1x3x256xf32>
    %72 = vector.shape_cast %71 : vector<1x3x256xf32> to vector<3x256xf32>
    %73 = vector.extract_strided_slice %72 {offsets = [0, 0], sizes = [1, 256], strides = [1, 1]} : vector<3x256xf32> to vector<1x256xf32>
    %74 = vector.extract_strided_slice %72 {offsets = [1, 0], sizes = [1, 256], strides = [1, 1]} : vector<3x256xf32> to vector<1x256xf32>
    %75 = vector.extract_strided_slice %72 {offsets = [2, 0], sizes = [1, 256], strides = [1, 1]} : vector<3x256xf32> to vector<1x256xf32>
    %76 = vector.broadcast %73 : vector<1x256xf32> to vector<32x256xf32>
    %77 = arith.addf %70, %76 : vector<32x256xf32>
    %cst_35 = arith.constant 0.000000e+00 : f32
    %78 = vector.broadcast %cst_35 : f32 to vector<32x256xf32>
    %79 = arith.maximumf %77, %78 : vector<32x256xf32>
    %c12_i32 = arith.constant 12 : i32
    %80 = vector.broadcast %c12_i32 : i32 to vector<32x1xi32>
    %81 = arith.cmpi slt, %2, %80 : vector<32x1xi32>
    %82 = arith.extui %81 : vector<32x1xi1> to vector<32x1xi32>
    %83 = arith.sitofp %82 : vector<32x1xi32> to vector<32x1xf32>
    %84 = vector.broadcast %83 : vector<32x1xf32> to vector<32x256xf32>
    %85 = arith.mulf %79, %84 : vector<32x256xf32>
    %cst_36 = arith.constant dense<0.000000e+00> : vector<256xf32>
    %86 = vector.multi_reduction <add>, %85, %cst_36 [0] : vector<32x256xf32> to vector<256xf32>
    %87 = vector.shape_cast %86 : vector<256xf32> to vector<1x256xf32>
    %cst_37 = arith.constant 0.0416666679 : f32
    %88 = vector.broadcast %cst_37 : f32 to vector<1x256xf32>
    %89 = arith.mulf %87, %88 : vector<1x256xf32>
    %90 = arith.mulf %85, %85 : vector<32x256xf32>
    %cst_38 = arith.constant dense<0.000000e+00> : vector<256xf32>
    %91 = vector.multi_reduction <add>, %90, %cst_38 [0] : vector<32x256xf32> to vector<256xf32>
    %92 = vector.shape_cast %91 : vector<256xf32> to vector<1x256xf32>
    %cst_39 = arith.constant 0.0416666679 : f32
    %93 = vector.broadcast %cst_39 : f32 to vector<1x256xf32>
    %94 = arith.mulf %92, %93 : vector<1x256xf32>
    %95 = arith.mulf %89, %89 : vector<1x256xf32>
    %96 = arith.subf %94, %95 : vector<1x256xf32>
    %cst_40 = arith.constant 0.000000e+00 : f32
    %97 = vector.broadcast %cst_40 : f32 to vector<1x256xf32>
    %98 = arith.maximumf %96, %97 : vector<1x256xf32>
    %cst_41 = arith.constant 9.99999974E-6 : f32
    %99 = vector.broadcast %cst_41 : f32 to vector<1x256xf32>
    %100 = arith.addf %98, %99 : vector<1x256xf32>
    %101 = math.rsqrt %100 : vector<1x256xf32>
    %102 = arith.mulf %101, %74 : vector<1x256xf32>
    %103 = arith.mulf %89, %102 : vector<1x256xf32>
    %104 = arith.subf %75, %103 : vector<1x256xf32>
    %105 = vector.broadcast %102 : vector<1x256xf32> to vector<32x256xf32>
    %106 = arith.mulf %79, %105 : vector<32x256xf32>
    %107 = vector.broadcast %104 : vector<1x256xf32> to vector<32x256xf32>
    %108 = arith.addf %106, %107 : vector<32x256xf32>
    %cst_42 = arith.constant 0.000000e+00 : f32
    %109 = vector.broadcast %cst_42 : f32 to vector<32x256xf32>
    %110 = arith.maximumf %108, %109 : vector<32x256xf32>
    %111 = arith.truncf %110 : vector<32x256xf32> to vector<32x256xbf16>
    %c6 = arith.constant 6 : index
    %c0_43 = arith.constant 0 : index
    %c0_44 = arith.constant 0 : index
    %112 = vector.load %arg1[%c6, %c0_43, %c0_44] : memref<12x256x256xbf16, #tpu.memory_space<vmem>>, vector<1x256x256xbf16>
    %113 = vector.shape_cast %112 : vector<1x256x256xbf16> to vector<256x256xbf16>
    %cst_45 = arith.constant dense<0.000000e+00> : vector<32x256xf32>
    %114 = tpu.matmul %111, %113, %cst_45 {dimension_numbers = #tpu.dot_dimension_numbers<[1], [0], [0], [1], [0, 0, 1, 1], [], []>} : vector<32x256xbf16>, vector<256x256xbf16>, vector<32x256xf32> -> vector<32x256xf32>
    %c7 = arith.constant 7 : index
    %c0_46 = arith.constant 0 : index
    %c0_47 = arith.constant 0 : index
    %115 = vector.load %arg1[%c7, %c0_46, %c0_47] : memref<12x256x256xbf16, #tpu.memory_space<vmem>>, vector<1x256x256xbf16>
    %116 = vector.shape_cast %115 : vector<1x256x256xbf16> to vector<256x256xbf16>
    %cst_48 = arith.constant dense<0.000000e+00> : vector<32x256xf32>
    %117 = tpu.matmul %111, %116, %cst_48 {dimension_numbers = #tpu.dot_dimension_numbers<[1], [0], [0], [1], [0, 0, 1, 1], [], []>} : vector<32x256xbf16>, vector<256x256xbf16>, vector<32x256xf32> -> vector<32x256xf32>
    %c31_i32_49 = arith.constant 31 : i32
    %118 = tpu.dynamic_rotate %117 by %c31_i32_49 dim 0 : vector<32x256xf32>, i32 -> vector<32x256xf32>
    %119 = arith.addf %114, %118 : vector<32x256xf32>
    %c8 = arith.constant 8 : index
    %c0_50 = arith.constant 0 : index
    %c0_51 = arith.constant 0 : index
    %120 = vector.load %arg1[%c8, %c0_50, %c0_51] : memref<12x256x256xbf16, #tpu.memory_space<vmem>>, vector<1x256x256xbf16>
    %121 = vector.shape_cast %120 : vector<1x256x256xbf16> to vector<256x256xbf16>
    %cst_52 = arith.constant dense<0.000000e+00> : vector<32x256xf32>
    %122 = tpu.matmul %111, %121, %cst_52 {dimension_numbers = #tpu.dot_dimension_numbers<[1], [0], [0], [1], [0, 0, 1, 1], [], []>} : vector<32x256xbf16>, vector<256x256xbf16>, vector<32x256xf32> -> vector<32x256xf32>
    %c30_i32_53 = arith.constant 30 : i32
    %123 = tpu.dynamic_rotate %122 by %c30_i32_53 dim 0 : vector<32x256xf32>, i32 -> vector<32x256xf32>
    %124 = arith.addf %119, %123 : vector<32x256xf32>
    %c2_54 = arith.constant 2 : index
    %c0_55 = arith.constant 0 : index
    %c0_56 = arith.constant 0 : index
    %125 = vector.load %arg2[%c2_54, %c0_55, %c0_56] : memref<6x3x256xf32, #tpu.memory_space<vmem>>, vector<1x3x256xf32>
    %126 = vector.shape_cast %125 : vector<1x3x256xf32> to vector<3x256xf32>
    %127 = vector.extract_strided_slice %126 {offsets = [0, 0], sizes = [1, 256], strides = [1, 1]} : vector<3x256xf32> to vector<1x256xf32>
    %128 = vector.extract_strided_slice %126 {offsets = [1, 0], sizes = [1, 256], strides = [1, 1]} : vector<3x256xf32> to vector<1x256xf32>
    %129 = vector.extract_strided_slice %126 {offsets = [2, 0], sizes = [1, 256], strides = [1, 1]} : vector<3x256xf32> to vector<1x256xf32>
    %130 = vector.broadcast %127 : vector<1x256xf32> to vector<32x256xf32>
    %131 = arith.addf %124, %130 : vector<32x256xf32>
    %cst_57 = arith.constant 0.000000e+00 : f32
    %132 = vector.broadcast %cst_57 : f32 to vector<32x256xf32>
    %133 = arith.maximumf %131, %132 : vector<32x256xf32>
    %c10_i32 = arith.constant 10 : i32
    %134 = vector.broadcast %c10_i32 : i32 to vector<32x1xi32>
    %135 = arith.cmpi slt, %2, %134 : vector<32x1xi32>
    %136 = arith.extui %135 : vector<32x1xi1> to vector<32x1xi32>
    %137 = arith.sitofp %136 : vector<32x1xi32> to vector<32x1xf32>
    %138 = vector.broadcast %137 : vector<32x1xf32> to vector<32x256xf32>
    %139 = arith.mulf %133, %138 : vector<32x256xf32>
    %cst_58 = arith.constant dense<0.000000e+00> : vector<256xf32>
    %140 = vector.multi_reduction <add>, %139, %cst_58 [0] : vector<32x256xf32> to vector<256xf32>
    %141 = vector.shape_cast %140 : vector<256xf32> to vector<1x256xf32>
    %cst_59 = arith.constant 5.000000e-02 : f32
    %142 = vector.broadcast %cst_59 : f32 to vector<1x256xf32>
    %143 = arith.mulf %141, %142 : vector<1x256xf32>
    %144 = arith.mulf %139, %139 : vector<32x256xf32>
    %cst_60 = arith.constant dense<0.000000e+00> : vector<256xf32>
    %145 = vector.multi_reduction <add>, %144, %cst_60 [0] : vector<32x256xf32> to vector<256xf32>
    %146 = vector.shape_cast %145 : vector<256xf32> to vector<1x256xf32>
    %cst_61 = arith.constant 5.000000e-02 : f32
    %147 = vector.broadcast %cst_61 : f32 to vector<1x256xf32>
    %148 = arith.mulf %146, %147 : vector<1x256xf32>
    %149 = arith.mulf %143, %143 : vector<1x256xf32>
    %150 = arith.subf %148, %149 : vector<1x256xf32>
    %cst_62 = arith.constant 0.000000e+00 : f32
    %151 = vector.broadcast %cst_62 : f32 to vector<1x256xf32>
    %152 = arith.maximumf %150, %151 : vector<1x256xf32>
    %cst_63 = arith.constant 9.99999974E-6 : f32
    %153 = vector.broadcast %cst_63 : f32 to vector<1x256xf32>
    %154 = arith.addf %152, %153 : vector<1x256xf32>
    %155 = math.rsqrt %154 : vector<1x256xf32>
    %156 = arith.mulf %155, %128 : vector<1x256xf32>
    %157 = arith.mulf %143, %156 : vector<1x256xf32>
    %158 = arith.subf %129, %157 : vector<1x256xf32>
    %159 = vector.broadcast %156 : vector<1x256xf32> to vector<32x256xf32>
    %160 = arith.mulf %133, %159 : vector<32x256xf32>
    %161 = vector.broadcast %158 : vector<1x256xf32> to vector<32x256xf32>
    %162 = arith.addf %160, %161 : vector<32x256xf32>
    %cst_64 = arith.constant 0.000000e+00 : f32
    %163 = vector.broadcast %cst_64 : f32 to vector<32x256xf32>
    %164 = arith.maximumf %162, %163 : vector<32x256xf32>
    %165 = arith.truncf %164 : vector<32x256xf32> to vector<32x256xbf16>
    %c9 = arith.constant 9 : index
    %c0_65 = arith.constant 0 : index
    %c0_66 = arith.constant 0 : index
    %166 = vector.load %arg1[%c9, %c0_65, %c0_66] : memref<12x256x256xbf16, #tpu.memory_space<vmem>>, vector<1x256x256xbf16>
    %167 = vector.shape_cast %166 : vector<1x256x256xbf16> to vector<256x256xbf16>
    %cst_67 = arith.constant dense<0.000000e+00> : vector<32x256xf32>
    %168 = tpu.matmul %165, %167, %cst_67 {dimension_numbers = #tpu.dot_dimension_numbers<[1], [0], [0], [1], [0, 0, 1, 1], [], []>} : vector<32x256xbf16>, vector<256x256xbf16>, vector<32x256xf32> -> vector<32x256xf32>
    %c3_68 = arith.constant 3 : index
    %c0_69 = arith.constant 0 : index
    %c0_70 = arith.constant 0 : index
    %169 = vector.load %arg2[%c3_68, %c0_69, %c0_70] : memref<6x3x256xf32, #tpu.memory_space<vmem>>, vector<1x3x256xf32>
    %170 = vector.shape_cast %169 : vector<1x3x256xf32> to vector<3x256xf32>
    %171 = vector.extract_strided_slice %170 {offsets = [0, 0], sizes = [1, 256], strides = [1, 1]} : vector<3x256xf32> to vector<1x256xf32>
    %172 = vector.extract_strided_slice %170 {offsets = [1, 0], sizes = [1, 256], strides = [1, 1]} : vector<3x256xf32> to vector<1x256xf32>
    %173 = vector.extract_strided_slice %170 {offsets = [2, 0], sizes = [1, 256], strides = [1, 1]} : vector<3x256xf32> to vector<1x256xf32>
    %174 = vector.broadcast %171 : vector<1x256xf32> to vector<32x256xf32>
    %175 = arith.addf %168, %174 : vector<32x256xf32>
    %cst_71 = arith.constant 0.000000e+00 : f32
    %176 = vector.broadcast %cst_71 : f32 to vector<32x256xf32>
    %177 = arith.maximumf %175, %176 : vector<32x256xf32>
    %c10_i32_72 = arith.constant 10 : i32
    %178 = vector.broadcast %c10_i32_72 : i32 to vector<32x1xi32>
    %179 = arith.cmpi slt, %2, %178 : vector<32x1xi32>
    %180 = arith.extui %179 : vector<32x1xi1> to vector<32x1xi32>
    %181 = arith.sitofp %180 : vector<32x1xi32> to vector<32x1xf32>
    %182 = vector.broadcast %181 : vector<32x1xf32> to vector<32x256xf32>
    %183 = arith.mulf %177, %182 : vector<32x256xf32>
    %cst_73 = arith.constant dense<0.000000e+00> : vector<256xf32>
    %184 = vector.multi_reduction <add>, %183, %cst_73 [0] : vector<32x256xf32> to vector<256xf32>
    %185 = vector.shape_cast %184 : vector<256xf32> to vector<1x256xf32>
    %cst_74 = arith.constant 5.000000e-02 : f32
    %186 = vector.broadcast %cst_74 : f32 to vector<1x256xf32>
    %187 = arith.mulf %185, %186 : vector<1x256xf32>
    %188 = arith.mulf %183, %183 : vector<32x256xf32>
    %cst_75 = arith.constant dense<0.000000e+00> : vector<256xf32>
    %189 = vector.multi_reduction <add>, %188, %cst_75 [0] : vector<32x256xf32> to vector<256xf32>
    %190 = vector.shape_cast %189 : vector<256xf32> to vector<1x256xf32>
    %cst_76 = arith.constant 5.000000e-02 : f32
    %191 = vector.broadcast %cst_76 : f32 to vector<1x256xf32>
    %192 = arith.mulf %190, %191 : vector<1x256xf32>
    %193 = arith.mulf %187, %187 : vector<1x256xf32>
    %194 = arith.subf %192, %193 : vector<1x256xf32>
    %cst_77 = arith.constant 0.000000e+00 : f32
    %195 = vector.broadcast %cst_77 : f32 to vector<1x256xf32>
    %196 = arith.maximumf %194, %195 : vector<1x256xf32>
    %cst_78 = arith.constant 9.99999974E-6 : f32
    %197 = vector.broadcast %cst_78 : f32 to vector<1x256xf32>
    %198 = arith.addf %196, %197 : vector<1x256xf32>
    %199 = math.rsqrt %198 : vector<1x256xf32>
    %200 = arith.mulf %199, %172 : vector<1x256xf32>
    %201 = arith.mulf %187, %200 : vector<1x256xf32>
    %202 = arith.subf %173, %201 : vector<1x256xf32>
    %203 = vector.broadcast %200 : vector<1x256xf32> to vector<32x256xf32>
    %204 = arith.mulf %177, %203 : vector<32x256xf32>
    %205 = vector.broadcast %202 : vector<1x256xf32> to vector<32x256xf32>
    %206 = arith.addf %204, %205 : vector<32x256xf32>
    %cst_79 = arith.constant 0.000000e+00 : f32
    %207 = vector.broadcast %cst_79 : f32 to vector<32x256xf32>
    %208 = arith.maximumf %206, %207 : vector<32x256xf32>
    %209 = arith.truncf %208 : vector<32x256xf32> to vector<32x256xbf16>
    %c10 = arith.constant 10 : index
    %c0_80 = arith.constant 0 : index
    %c0_81 = arith.constant 0 : index
    %210 = vector.load %arg1[%c10, %c0_80, %c0_81] : memref<12x256x256xbf16, #tpu.memory_space<vmem>>, vector<1x256x256xbf16>
    %211 = vector.shape_cast %210 : vector<1x256x256xbf16> to vector<256x256xbf16>
    %cst_82 = arith.constant dense<0.000000e+00> : vector<32x256xf32>
    %212 = tpu.matmul %209, %211, %cst_82 {dimension_numbers = #tpu.dot_dimension_numbers<[1], [0], [0], [1], [0, 0, 1, 1], [], []>} : vector<32x256xbf16>, vector<256x256xbf16>, vector<32x256xf32> -> vector<32x256xf32>
    %c4_83 = arith.constant 4 : index
    %c0_84 = arith.constant 0 : index
    %c0_85 = arith.constant 0 : index
    %213 = vector.load %arg2[%c4_83, %c0_84, %c0_85] : memref<6x3x256xf32, #tpu.memory_space<vmem>>, vector<1x3x256xf32>
    %214 = vector.shape_cast %213 : vector<1x3x256xf32> to vector<3x256xf32>
    %215 = vector.extract_strided_slice %214 {offsets = [0, 0], sizes = [1, 256], strides = [1, 1]} : vector<3x256xf32> to vector<1x256xf32>
    %216 = vector.extract_strided_slice %214 {offsets = [1, 0], sizes = [1, 256], strides = [1, 1]} : vector<3x256xf32> to vector<1x256xf32>
    %217 = vector.extract_strided_slice %214 {offsets = [2, 0], sizes = [1, 256], strides = [1, 1]} : vector<3x256xf32> to vector<1x256xf32>
    %218 = vector.broadcast %215 : vector<1x256xf32> to vector<32x256xf32>
    %219 = arith.addf %212, %218 : vector<32x256xf32>
    %cst_86 = arith.constant 0.000000e+00 : f32
    %220 = vector.broadcast %cst_86 : f32 to vector<32x256xf32>
    %221 = arith.maximumf %219, %220 : vector<32x256xf32>
    %c10_i32_87 = arith.constant 10 : i32
    %222 = vector.broadcast %c10_i32_87 : i32 to vector<32x1xi32>
    %223 = arith.cmpi slt, %2, %222 : vector<32x1xi32>
    %224 = arith.extui %223 : vector<32x1xi1> to vector<32x1xi32>
    %225 = arith.sitofp %224 : vector<32x1xi32> to vector<32x1xf32>
    %226 = vector.broadcast %225 : vector<32x1xf32> to vector<32x256xf32>
    %227 = arith.mulf %221, %226 : vector<32x256xf32>
    %cst_88 = arith.constant dense<0.000000e+00> : vector<256xf32>
    %228 = vector.multi_reduction <add>, %227, %cst_88 [0] : vector<32x256xf32> to vector<256xf32>
    %229 = vector.shape_cast %228 : vector<256xf32> to vector<1x256xf32>
    %cst_89 = arith.constant 5.000000e-02 : f32
    %230 = vector.broadcast %cst_89 : f32 to vector<1x256xf32>
    %231 = arith.mulf %229, %230 : vector<1x256xf32>
    %232 = arith.mulf %227, %227 : vector<32x256xf32>
    %cst_90 = arith.constant dense<0.000000e+00> : vector<256xf32>
    %233 = vector.multi_reduction <add>, %232, %cst_90 [0] : vector<32x256xf32> to vector<256xf32>
    %234 = vector.shape_cast %233 : vector<256xf32> to vector<1x256xf32>
    %cst_91 = arith.constant 5.000000e-02 : f32
    %235 = vector.broadcast %cst_91 : f32 to vector<1x256xf32>
    %236 = arith.mulf %234, %235 : vector<1x256xf32>
    %237 = arith.mulf %231, %231 : vector<1x256xf32>
    %238 = arith.subf %236, %237 : vector<1x256xf32>
    %cst_92 = arith.constant 0.000000e+00 : f32
    %239 = vector.broadcast %cst_92 : f32 to vector<1x256xf32>
    %240 = arith.maximumf %238, %239 : vector<1x256xf32>
    %cst_93 = arith.constant 9.99999974E-6 : f32
    %241 = vector.broadcast %cst_93 : f32 to vector<1x256xf32>
    %242 = arith.addf %240, %241 : vector<1x256xf32>
    %243 = math.rsqrt %242 : vector<1x256xf32>
    %244 = arith.mulf %243, %216 : vector<1x256xf32>
    %245 = arith.mulf %231, %244 : vector<1x256xf32>
    %246 = arith.subf %217, %245 : vector<1x256xf32>
    %247 = vector.broadcast %244 : vector<1x256xf32> to vector<32x256xf32>
    %248 = arith.mulf %221, %247 : vector<32x256xf32>
    %249 = vector.broadcast %246 : vector<1x256xf32> to vector<32x256xf32>
    %250 = arith.addf %248, %249 : vector<32x256xf32>
    %cst_94 = arith.constant 0.000000e+00 : f32
    %251 = vector.broadcast %cst_94 : f32 to vector<32x256xf32>
    %252 = arith.maximumf %250, %251 : vector<32x256xf32>
    %253 = arith.truncf %252 : vector<32x256xf32> to vector<32x256xbf16>
    %c11 = arith.constant 11 : index
    %c0_95 = arith.constant 0 : index
    %c0_96 = arith.constant 0 : index
    %254 = vector.load %arg1[%c11, %c0_95, %c0_96] : memref<12x256x256xbf16, #tpu.memory_space<vmem>>, vector<1x256x256xbf16>
    %255 = vector.shape_cast %254 : vector<1x256x256xbf16> to vector<256x256xbf16>
    %cst_97 = arith.constant dense<0.000000e+00> : vector<32x256xf32>
    %256 = tpu.matmul %253, %255, %cst_97 {dimension_numbers = #tpu.dot_dimension_numbers<[1], [0], [0], [1], [0, 0, 1, 1], [], []>} : vector<32x256xbf16>, vector<256x256xbf16>, vector<32x256xf32> -> vector<32x256xf32>
    %c5_98 = arith.constant 5 : index
    %c0_99 = arith.constant 0 : index
    %c0_100 = arith.constant 0 : index
    %257 = vector.load %arg2[%c5_98, %c0_99, %c0_100] : memref<6x3x256xf32, #tpu.memory_space<vmem>>, vector<1x3x256xf32>
    %258 = vector.shape_cast %257 : vector<1x3x256xf32> to vector<3x256xf32>
    %259 = vector.extract_strided_slice %258 {offsets = [0, 0], sizes = [1, 256], strides = [1, 1]} : vector<3x256xf32> to vector<1x256xf32>
    %260 = vector.extract_strided_slice %258 {offsets = [1, 0], sizes = [1, 256], strides = [1, 1]} : vector<3x256xf32> to vector<1x256xf32>
    %261 = vector.extract_strided_slice %258 {offsets = [2, 0], sizes = [1, 256], strides = [1, 1]} : vector<3x256xf32> to vector<1x256xf32>
    %262 = vector.broadcast %259 : vector<1x256xf32> to vector<32x256xf32>
    %263 = arith.addf %256, %262 : vector<32x256xf32>
    %cst_101 = arith.constant 0.000000e+00 : f32
    %264 = vector.broadcast %cst_101 : f32 to vector<32x256xf32>
    %265 = arith.maximumf %263, %264 : vector<32x256xf32>
    %c10_i32_102 = arith.constant 10 : i32
    %266 = vector.broadcast %c10_i32_102 : i32 to vector<32x1xi32>
    %267 = arith.cmpi slt, %2, %266 : vector<32x1xi32>
    %268 = arith.extui %267 : vector<32x1xi1> to vector<32x1xi32>
    %269 = arith.sitofp %268 : vector<32x1xi32> to vector<32x1xf32>
    %270 = vector.broadcast %269 : vector<32x1xf32> to vector<32x256xf32>
    %271 = arith.mulf %265, %270 : vector<32x256xf32>
    %cst_103 = arith.constant dense<0.000000e+00> : vector<256xf32>
    %272 = vector.multi_reduction <add>, %271, %cst_103 [0] : vector<32x256xf32> to vector<256xf32>
    %273 = vector.shape_cast %272 : vector<256xf32> to vector<1x256xf32>
    %cst_104 = arith.constant 5.000000e-02 : f32
    %274 = vector.broadcast %cst_104 : f32 to vector<1x256xf32>
    %275 = arith.mulf %273, %274 : vector<1x256xf32>
    %276 = arith.mulf %271, %271 : vector<32x256xf32>
    %cst_105 = arith.constant dense<0.000000e+00> : vector<256xf32>
    %277 = vector.multi_reduction <add>, %276, %cst_105 [0] : vector<32x256xf32> to vector<256xf32>
    %278 = vector.shape_cast %277 : vector<256xf32> to vector<1x256xf32>
    %cst_106 = arith.constant 5.000000e-02 : f32
    %279 = vector.broadcast %cst_106 : f32 to vector<1x256xf32>
    %280 = arith.mulf %278, %279 : vector<1x256xf32>
    %281 = arith.mulf %275, %275 : vector<1x256xf32>
    %282 = arith.subf %280, %281 : vector<1x256xf32>
    %cst_107 = arith.constant 0.000000e+00 : f32
    %283 = vector.broadcast %cst_107 : f32 to vector<1x256xf32>
    %284 = arith.maximumf %282, %283 : vector<1x256xf32>
    %cst_108 = arith.constant 9.99999974E-6 : f32
    %285 = vector.broadcast %cst_108 : f32 to vector<1x256xf32>
    %286 = arith.addf %284, %285 : vector<1x256xf32>
    %287 = math.rsqrt %286 : vector<1x256xf32>
    %288 = arith.mulf %287, %260 : vector<1x256xf32>
    %289 = arith.mulf %275, %288 : vector<1x256xf32>
    %290 = arith.subf %261, %289 : vector<1x256xf32>
    %291 = vector.broadcast %288 : vector<1x256xf32> to vector<32x256xf32>
    %292 = arith.mulf %265, %291 : vector<32x256xf32>
    %293 = vector.broadcast %290 : vector<1x256xf32> to vector<32x256xf32>
    %294 = arith.addf %292, %293 : vector<32x256xf32>
    %c0_109 = arith.constant 0 : index
    %c0_110 = arith.constant 0 : index
    %295 = vector.load %arg3[%c0_109, %c0_110] : memref<32x256xf32, #tpu.memory_space<vmem>>, vector<32x256xf32>
    tpu.vector_store %arg3[%c0_109, %c0_110], %294 {strides = array<i32>} : memref<32x256xf32, #tpu.memory_space<vmem>>, vector<32x256xf32>,
    return
  }
}

</mosaic_0001>

<bundles_post_ra>
// kernel: net_forward.1
= control target key start
LH: loop header
LB: loop body
LE: loop exit
PB: predicated region body
PF: predicated region fallthrough
CT: control target
= control target key end

     0   :  { %8 = vsyncpa [#allocation3], 0  ;;  %s6001_s0 = inlined_call_operand.vmem [shape: bf16[32,256], index: 0, kind: input, shape index: {}]   ;;  %s6002_s1 = inlined_call_operand.hbm [shape: bf16[12,256,256], index: 1, kind: input, shape index: {}]   ;;  %s6003_s2 = inlined_call_operand.hbm [shape: f32[6,3,256], index: 2, kind: input, shape index: {}]   ;;  %s6004_s3 = inlined_call_operand.vmem [shape: f32[32,256], index: 3, kind: output, shape index: {}]  }
   0x1   :  { %9 = vsyncpa [#allocation5], 0  ;;  %s5282_s12 = smov [#allocation2]   ;;  %s5234_s16 = scalar_lea.hbm %s6002_s1, 49152 }
   0x2   :  { %s17_s13 = sshll.u32 %s5282_s12, 4  ;;  %p5235_p0 = scmp.ne.s32.totalorder %s6002_s1, %s5234_s16  ;;  %s18_s13 = int_to_ptr.vmem [resolvable:$true] %s17_s13 }
   0x3   :  { %p5238_p1 = scmp.lt.u32.totalorder %s5234_s16, %s6002_s1 }
   0x5   :  { %p5240_p2 = pnand %p5238_p1, %p5235_p0 }
   0x7   :  { %5243 = shalt.err (!%p5240_p2)
}
   0x8   :  { %s5244_s21 = scalar_lea.vmem %s18_s13, 49152  ;;  %p5249_p4 = scmp.lt.s32.totalorder %s18_s13, %s18_s13 }
   0x9   :  { %p5245_p3 = scmp.ne.s32.totalorder %s18_s13, %s5244_s21  ;;  %p5250_p5 = scmp.lt.s32.totalorder %s5244_s21, %s5244_s21 }
   0xb   :  { %p5251_p6 = por %p5250_p5, %p5249_p4 }
   0xd   :  { %p5252_p7 = pnand %p5251_p6, %p5245_p3 }
   0xf   :  { %5255 = shalt.err (!%p5252_p7)
}
  0x10   :  { %s5283_s22 = smov 128   ;;  %s5284_s23 = smov 8  }
  0x11   :  { %23 = dma.hbm_to_vmem [thread:$0]  %s6002_s1, 49152, %s18_s13, [#allocation3], %s5283_s22, %s5283_s22, %s5284_s23  }
  0x12   :  { %s5285_s26 = smov [#allocation4]   ;;  %s5256_s30 = scalar_lea.hbm %s6003_s2, 768 }
  0x13   :  { %s29_s27 = sshll.u32 %s5285_s26, 4  ;;  %p5257_p8 = scmp.ne.s32.totalorder %s6003_s2, %s5256_s30  ;;  %s30_s27 = int_to_ptr.vmem [resolvable:$true] %s29_s27 }
  0x14   :  { %p5260_p9 = scmp.lt.u32.totalorder %s5256_s30, %s6003_s2 }
  0x16   :  { %p5262_p10 = pnand %p5260_p9, %p5257_p8 }
  0x18   :  { %5265 = shalt.err (!%p5262_p10)
}
  0x19   :  { %s5266_s8 = scalar_lea.vmem %s30_s27, 768  ;;  %p5271_p12 = scmp.lt.s32.totalorder %s30_s27, %s30_s27 }
  0x1a   :  { %p5267_p11 = scmp.ne.s32.totalorder %s30_s27, %s5266_s8  ;;  %p5272_p13 = scmp.lt.s32.totalorder %s5266_s8, %s5266_s8 }
  0x1c   :  { %p5273_p0 = por %p5272_p13, %p5271_p12 }
  0x1e   :  { %p5274_p1 = pnand %p5273_p0, %p5267_p11 }
  0x20   :  { %5277 = shalt.err (!%p5274_p1)
}
  0x21   :  { %35 = dma.hbm_to_vmem [thread:$0]  %s6003_s2, 768, %s30_s27, [#allocation5], %s5283_s22, %s5283_s22, %s5284_s23  }
  0x22   :  { %5278 = dma.done.wait [#allocation3], 49152  }
  0x23   :  { %5279 = vsyncadd [#allocation3], 4294918144 }
  0x24   :  { %5280 = dma.done.wait [#allocation5], 768  }
  0x25   :  { %5281 = vsyncadd [#allocation5], 4294966528  ;;  %v4628_v0 = vld [vmem:[#allocation2 + $0x104] ss:$8 sps:$4 sm:$0xff]   ;;  %v4630_v1 = vld [vmem:[#allocation2 + $0x100] ss:$8 sps:$4 sm:$0xff]  }
  0x26   :  { %300 = vmatprep.subr.bf16.mxu0 %v4628_v0  ;;  %v4631_v2 = vld [vmem:[#allocation2 + $0x4] ss:$8 sps:$4 sm:$0xff]   ;;  %v4633_v3 = vld [vmem:[#allocation2 + $0x114] ss:$8 sps:$4 sm:$0xff]   ;;  %v4635_v4 = vld [vmem:[#allocation2] ss:$8 sps:$4 sm:$0xff]  }
  0x27   :  { %301 = vmatpush1.bf16.msra.mxu0 %v4630_v1  ;;  %v4636_v5 = vld [vmem:[#allocation2 + $0x110] ss:$8 sps:$4 sm:$0xff]   ;;  %530 = vmatprep.subr.bf16.mxu1 %v4631_v2  ;;  %v4637_v6 = vld [vmem:[#allocation2 + $0x14] ss:$8 sps:$4 sm:$0xff]   ;;  %v4639_v7 = vld [vmem:[#allocation2 + $0x124] ss:$8 sps:$4 sm:$0xff]  }
  0x28   :  { %302 = vmatprep.subr.bf16.mxu0 %v4633_v3  ;;  %531 = vmatpush1.bf16.msra.mxu1 %v4635_v4  ;;  %v4641_v8 = vld [vmem:[#allocation2 + $0x10] ss:$8 sps:$4 sm:$0xff]   ;;  %v4642_v9 = vld [vmem:[#allocation2 + $0x120] ss:$8 sps:$4 sm:$0xff]   ;;  %v4643_v10 = vld [vmem:[#allocation2 + $0x24] ss:$8 sps:$4 sm:$0xff]  }
  0x29   :  { %532 = vmatprep.subr.bf16.mxu1 %v4637_v6  ;;  %v4645_v11 = vld [vmem:[#allocation2 + $0x134] ss:$8 sps:$4 sm:$0xff]   ;;  %v4647_v12 = vld [vmem:[#allocation2 + $0x20] ss:$8 sps:$4 sm:$0xff]   ;;  %v4648_v14 = vld [vmem:[#allocation2 + $0x130] ss:$8 sps:$4 sm:$0xff]  }
  0x2a   :  { %v4649_v13 = vld [vmem:[#allocation2 + $0x34] ss:$8 sps:$4 sm:$0xff]   ;;  %v4651_v15 = vld [vmem:[#allocation2 + $0x144] ss:$8 sps:$4 sm:$0xff]   ;;  %v4653_v16 = vld [vmem:[#allocation2 + $0x30] ss:$8 sps:$4 sm:$0xff]  }
  0x2b   :  { %303 = vmatpush1.bf16.msra.mxu0 %v4636_v5  ;;  %v4655_v17 = vld [vmem:[#allocation2 + $0x44] ss:$8 sps:$4 sm:$0xff]   ;;  %v4654_v18 = vld [vmem:[#allocation2 + $0x140] ss:$8 sps:$4 sm:$0xff]   ;;  %v4657_v19 = vld [vmem:[#allocation2 + $0x154] ss:$8 sps:$4 sm:$0xff]  }
  0x2c   :  { %304 = vmatprep.subr.bf16.mxu0 %v4639_v7  ;;  %533 = vmatpush1.bf16.msra.mxu1 %v4641_v8  ;;  %v4659_v20 = vld [vmem:[#allocation2 + $0x40] ss:$8 sps:$4 sm:$0xff]   ;;  %v4661_v21 = vld [vmem:[#allocation2 + $0x54] ss:$8 sps:$4 sm:$0xff]   ;;  %v4660_v22 = vld [vmem:[#allocation2 + $0x150] ss:$8 sps:$4 sm:$0xff]  }
  0x2d   :  { %534 = vmatprep.subr.bf16.mxu1 %v4643_v10  ;;  %v4663_v23 = vld [vmem:[#allocation2 + $0x164] ss:$8 sps:$4 sm:$0xff]   ;;  %v4665_v24 = vld [vmem:[#allocation2 + $0x50] ss:$8 sps:$4 sm:$0xff]   ;;  %v4666_v26 = vld [vmem:[#allocation2 + $0x160] ss:$8 sps:$4 sm:$0xff]  }
  0x2e   :  { %v4667_v25 = vld [vmem:[#allocation2 + $0x64] ss:$8 sps:$4 sm:$0xff]   ;;  %v4669_v27 = vld [vmem:[#allocation2 + $0x174] ss:$8 sps:$4 sm:$0xff]   ;;  %v4671_v28 = vld [vmem:[#allocation2 + $0x60] ss:$8 sps:$4 sm:$0xff]  }
  0x2f   :  { %305 = vmatpush1.bf16.msra.mxu0 %v4642_v9  ;;  %v4673_v29 = vld [vmem:[#allocation2 + $0x74] ss:$8 sps:$4 sm:$0xff]   ;;  %v4672_v30 = vld [vmem:[#allocation2 + $0x170] ss:$8 sps:$4 sm:$0xff]   ;;  %v4675_v31 = vld [vmem:[#allocation2 + $0x184] ss:$8 sps:$4 sm:$0xff]  }
  0x30   :  { %306 = vmatprep.subr.bf16.mxu0 %v4645_v11  ;;  %535 = vmatpush1.bf16.msra.mxu1 %v4647_v12  ;;  %v4677_v32 = vld [vmem:[#allocation2 + $0x70] ss:$8 sps:$4 sm:$0xff]   ;;  %v4679_v33 = vld [vmem:[#allocation2 + $0x84] ss:$8 sps:$4 sm:$0xff]   ;;  %v4678_v34 = vld [vmem:[#allocation2 + $0x180] ss:$8 sps:$4 sm:$0xff]  }
  0x31   :  { %536 = vmatprep.subr.bf16.mxu1 %v4649_v13  ;;  %v4681_v35 = vld [vmem:[#allocation2 + $0x194] ss:$8 sps:$4 sm:$0xff]   ;;  %v4683_v36 = vld [vmem:[#allocation2 + $0x80] ss:$8 sps:$4 sm:$0xff]   ;;  %v4684_v38 = vld [vmem:[#allocation2 + $0x190] ss:$8 sps:$4 sm:$0xff]  }
  0x32   :  { %v4685_v37 = vld [vmem:[#allocation2 + $0x94] ss:$8 sps:$4 sm:$0xff]   ;;  %v4687_v39 = vld [vmem:[#allocation2 + $0x1a4] ss:$8 sps:$4 sm:$0xff]   ;;  %v4689_v40 = vld [vmem:[#allocation2 + $0x90] ss:$8 sps:$4 sm:$0xff]  }
  0x33   :  { %307 = vmatpush1.bf16.msra.mxu0 %v4648_v14  ;;  %v4691_v41 = vld [vmem:[#allocation2 + $0xa4] ss:$8 sps:$4 sm:$0xff]   ;;  %v4690_v42 = vld [vmem:[#allocation2 + $0x1a0] ss:$8 sps:$4 sm:$0xff]   ;;  %v4693_v43 = vld [vmem:[#allocation2 + $0x1b4] ss:$8 sps:$4 sm:$0xff]  }
  0x34   :  { %308 = vmatprep.subr.bf16.mxu0 %v4651_v15  ;;  %537 = vmatpush1.bf16.msra.mxu1 %v4653_v16  ;;  %v4695_v44 = vld [vmem:[#allocation2 + $0xa0] ss:$8 sps:$4 sm:$0xff]   ;;  %v4697_v45 = vld [vmem:[#allocation2 + $0xb4] ss:$8 sps:$4 sm:$0xff]   ;;  %v5334_v46 = vld [vmem:[%s6001_s0 + $0x4] ss:$8 sps:$4 sm:$0xff]  }
  0x35   :  { %538 = vmatprep.subr.bf16.mxu1 %v4655_v17  ;;  %v4696_v47 = vld [vmem:[#allocation2 + $0x1b0] ss:$8 sps:$4 sm:$0xff]   ;;  %v4699_v48 = vld [vmem:[#allocation2 + $0x1c4] ss:$8 sps:$4 sm:$0xff]   ;;  %332 = vmatprep.mubr.bf16.mxu0 %v5334_v46  ;;  %v4702_v51 = vld [vmem:[#allocation2 + $0x1c0] ss:$8 sps:$4 sm:$0xff]  }
  0x36   :  { %v4701_v49 = vld [vmem:[#allocation2 + $0xb0] ss:$8 sps:$4 sm:$0xff]   ;;  %562 = vmatprep.mubr.bf16.mxu1 %v5334_v46  ;;  %v4703_v50 = vld [vmem:[#allocation2 + $0xc4] ss:$8 sps:$4 sm:$0xff]   ;;  %v4705_v52 = vld [vmem:[#allocation2 + $0x1d4] ss:$8 sps:$4 sm:$0xff]  }
  0x37   :  { %309 = vmatpush1.bf16.msra.mxu0 %v4654_v18  ;;  %v4707_v53 = vld [vmem:[#allocation2 + $0xc0] ss:$8 sps:$4 sm:$0xff]   ;;  %v4709_v54 = vld [vmem:[#allocation2 + $0xd4] ss:$8 sps:$4 sm:$0xff]   ;;  %v4708_v55 = vld [vmem:[#allocation2 + $0x1d0] ss:$8 sps:$4 sm:$0xff]  }
  0x38   :  { %310 = vmatprep.subr.bf16.mxu0 %v4657_v19  ;;  %539 = vmatpush1.bf16.msra.mxu1 %v4659_v20  ;;  %v4711_v56 = vld [vmem:[#allocation2 + $0x1e4] ss:$8 sps:$4 sm:$0xff]   ;;  %v4713_v57 = vld [vmem:[#allocation2 + $0xd0] ss:$8 sps:$4 sm:$0xff]   ;;  %v4714_v59 = vld [vmem:[#allocation2 + $0x1e0] ss:$8 sps:$4 sm:$0xff]  }
  0x39   :  { %540 = vmatprep.subr.bf16.mxu1 %v4661_v21  ;;  %v4715_v58 = vld [vmem:[#allocation2 + $0xe4] ss:$8 sps:$4 sm:$0xff]   ;;  %v4717_v60 = vld [vmem:[#allocation2 + $0x1f4] ss:$8 sps:$4 sm:$0xff]   ;;  %v4719_v61 = vld [vmem:[#allocation2 + $0xe0] ss:$8 sps:$4 sm:$0xff]  }
  0x3a   :  { %v4723_v62 = vld [vmem:[#allocation2 + $0xf4] ss:$8 sps:$4 sm:$0xff]   ;;  %v4720_v63 = vld [vmem:[#allocation2 + $0x1f0] ss:$8 sps:$4 sm:$0xff]   ;;  %v4729_v0 = vld [vmem:[#allocation2 + $0x204] ss:$8 sps:$4 sm:$0xff]  }
  0x3b   :  { %311 = vmatpush1.bf16.msra.mxu0 %v4660_v22  ;;  %v4726_v1 = vld [vmem:[#allocation2 + $0xf0] ss:$8 sps:$4 sm:$0xff]   ;;  %v5341_v2 = vld [vmem:[%s6001_s0] ss:$8 sps:$4 sm:$0xff]   ;;  %v5346_v4 = vld [vmem:[%s6001_s0 + $0x14] ss:$8 sps:$4 sm:$0xff]  }
  0x3c   :  { %312 = vmatprep.subr.bf16.mxu0 %v4663_v23  ;;  %541 = vmatpush1.bf16.msra.mxu1 %v4665_v24  ;;  %v4727_v3 = vld [vmem:[#allocation2 + $0x200] ss:$8 sps:$4 sm:$0xff]   ;;  %v4732_v5 = vld [vmem:[#allocation2 + $0x214] ss:$8 sps:$4 sm:$0xff]   ;;  %v4730_v6 = vld [vmem:[#allocation2 + $0x210] ss:$8 sps:$4 sm:$0xff]  }
  0x3d   :  { %542 = vmatprep.subr.bf16.mxu1 %v4667_v25  ;;  %v4738_v7 = vld [vmem:[#allocation2 + $0x224] ss:$8 sps:$4 sm:$0xff]   ;;  %v4735_v8 = vld [vmem:[%s6001_s0 + $0x10] ss:$8 sps:$4 sm:$0xff]   ;;  %v4736_v9 = vld [vmem:[#allocation2 + $0x220] ss:$8 sps:$4 sm:$0xff]  }
  0x3e   :  { %v4741_v10 = vld [vmem:[#allocation2 + $0x234] ss:$8 sps:$4 sm:$0xff]   ;;  %v4739_v11 = vld [vmem:[#allocation2 + $0x230] ss:$8 sps:$4 sm:$0xff]   ;;  %v4744_v12 = vld [vmem:[#allocation2 + $0x244] ss:$8 sps:$4 sm:$0xff]  }
  0x3f   :  { %313 = vmatpush1.bf16.msra.mxu0 %v4666_v26  ;;  %v4742_v13 = vld [vmem:[#allocation2 + $0x240] ss:$8 sps:$4 sm:$0xff]   ;;  %v4747_v14 = vld [vmem:[#allocation2 + $0x254] ss:$8 sps:$4 sm:$0xff]   ;;  %v4745_v15 = vld [vmem:[#allocation2 + $0x250] ss:$8 sps:$4 sm:$0xff]  }
  0x40   :  { %314 = vmatprep.subr.bf16.mxu0 %v4669_v27  ;;  %543 = vmatpush1.bf16.msra.mxu1 %v4671_v28  ;;  %v4750_v16 = vld [vmem:[#allocation2 + $0x264] ss:$8 sps:$4 sm:$0xff]   ;;  %v4748_v17 = vld [vmem:[#allocation2 + $0x260] ss:$8 sps:$4 sm:$0xff]   ;;  %v4753_v18 = vld [vmem:[#allocation2 + $0x274] ss:$8 sps:$4 sm:$0xff]  }
  0x41   :  { %544 = vmatprep.subr.bf16.mxu1 %v4673_v29  ;;  %v4751_v19 = vld [vmem:[#allocation2 + $0x270] ss:$8 sps:$4 sm:$0xff]   ;;  %v4756_v20 = vld [vmem:[#allocation2 + $0x284] ss:$8 sps:$4 sm:$0xff]   ;;  %v4754_v21 = vld [vmem:[#allocation2 + $0x280] ss:$8 sps:$4 sm:$0xff]  }
  0x42   :  { %v4759_v22 = vld [vmem:[#allocation2 + $0x294] ss:$8 sps:$4 sm:$0xff]   ;;  %v4757_v23 = vld [vmem:[#allocation2 + $0x290] ss:$8 sps:$4 sm:$0xff]   ;;  %v4762_v24 = vld [vmem:[#allocation2 + $0x2a4] ss:$8 sps:$4 sm:$0xff]  }
  0x43   :  { %315 = vmatpush1.bf16.msra.mxu0 %v4672_v30  ;;  %v4760_v25 = vld [vmem:[#allocation2 + $0x2a0] ss:$8 sps:$4 sm:$0xff]   ;;  %v4765_v26 = vld [vmem:[#allocation2 + $0x2b4] ss:$8 sps:$4 sm:$0xff]   ;;  %v4763_v27 = vld [vmem:[#allocation2 + $0x2b0] ss:$8 sps:$4 sm:$0xff]  }
  0x44   :  { %316 = vmatprep.subr.bf16.mxu0 %v4675_v31  ;;  %545 = vmatpush1.bf16.msra.mxu1 %v4677_v32  ;;  %v4768_v28 = vld [vmem:[#allocation2 + $0x2c4] ss:$8 sps:$4 sm:$0xff]   ;;  %v4766_v29 = vld [vmem:[#allocation2 + $0x2c0] ss:$8 sps:$4 sm:$0xff]   ;;  %v4771_v30 = vld [vmem:[#allocation2 + $0x2d4] ss:$8 sps:$4 sm:$0xff]  }
  0x45   :  { %546 = vmatprep.subr.bf16.mxu1 %v4679_v33  ;;  %v4769_v31 = vld [vmem:[#allocation2 + $0x2d0] ss:$8 sps:$4 sm:$0xff]   ;;  %v4774_v32 = vld [vmem:[#allocation2 + $0x2e4] ss:$8 sps:$4 sm:$0xff]   ;;  %v4772_v33 = vld [vmem:[#allocation2 + $0x2e0] ss:$8 sps:$4 sm:$0xff]  }
  0x47   :  { %317 = vmatpush1.bf16.msra.mxu0 %v4678_v34  ;;  %v4777_v34 = vld [vmem:[#allocation2 + $0x2f4] ss:$8 sps:$4 sm:$0xff]  }
  0x48   :  { %318 = vmatprep.subr.bf16.mxu0 %v4681_v35  ;;  %547 = vmatpush1.bf16.msra.mxu1 %v4683_v36  ;;  %v4775_v35 = vld [vmem:[#allocation2 + $0x2f0] ss:$8 sps:$4 sm:$0xff]   ;;  %v4780_v36 = vld [vmem:[#allocation2 + $0x404] ss:$8 sps:$4 sm:$0xff]  }
  0x49   :  { %548 = vmatprep.subr.bf16.mxu1 %v4685_v37  ;;  %v4778_v37 = vld [vmem:[#allocation2 + $0x400] ss:$8 sps:$4 sm:$0xff]  }
  0x4b   :  { %319 = vmatpush1.bf16.msra.mxu0 %v4684_v38  ;;  %v4783_v38 = vld [vmem:[#allocation2 + $0x304] ss:$8 sps:$4 sm:$0xff]  }
  0x4c   :  { %320 = vmatprep.subr.bf16.mxu0 %v4687_v39  ;;  %549 = vmatpush1.bf16.msra.mxu1 %v4689_v40  ;;  %v4781_v39 = vld [vmem:[#allocation2 + $0x300] ss:$8 sps:$4 sm:$0xff]   ;;  %v4786_v40 = vld [vmem:[#allocation2 + $0x414] ss:$8 sps:$4 sm:$0xff]  }
  0x4d   :  { %550 = vmatprep.subr.bf16.mxu1 %v4691_v41  ;;  %v4784_v41 = vld [vmem:[#allocation2 + $0x410] ss:$8 sps:$4 sm:$0xff]  }
  0x4f   :  { %321 = vmatpush1.bf16.msra.mxu0 %v4690_v42  ;;  %v4789_v42 = vld [vmem:[#allocation2 + $0x314] ss:$8 sps:$4 sm:$0xff]  }
  0x50   :  { %322 = vmatprep.subr.bf16.mxu0 %v4693_v43  ;;  %551 = vmatpush1.bf16.msra.mxu1 %v4695_v44  ;;  %v4787_v43 = vld [vmem:[#allocation2 + $0x310] ss:$8 sps:$4 sm:$0xff]   ;;  %v4792_v44 = vld [vmem:[#allocation2 + $0x424] ss:$8 sps:$4 sm:$0xff]  }
  0x51   :  { %552 = vmatprep.subr.bf16.mxu1 %v4697_v45  ;;  %v4790_v45 = vld [vmem:[#allocation2 + $0x420] ss:$8 sps:$4 sm:$0xff]  }
  0x53   :  { %323 = vmatpush1.bf16.msra.mxu0 %v4696_v47  ;;  %v4793_v47 = vld [vmem:[#allocation2 + $0x320] ss:$8 sps:$4 sm:$0xff]  }
  0x54   :  { %324 = vmatprep.subr.bf16.mxu0 %v4699_v48  ;;  %553 = vmatpush1.bf16.msra.mxu1 %v4701_v49  ;;  %v4798_v48 = vld [vmem:[#allocation2 + $0x434] ss:$8 sps:$4 sm:$0xff]   ;;  %v4796_v49 = vld [vmem:[#allocation2 + $0x430] ss:$8 sps:$4 sm:$0xff]  }
  0x55   :  { %554 = vmatprep.subr.bf16.mxu1 %v4703_v50  ;;  %v4801_v50 = vld [vmem:[#allocation2 + $0x334] ss:$8 sps:$4 sm:$0xff]  }
  0x57   :  { %325 = vmatpush1.bf16.msra.mxu0 %v4702_v51  ;;  %v4799_v51 = vld [vmem:[#allocation2 + $0x330] ss:$8 sps:$4 sm:$0xff]  }
  0x58   :  { %326 = vmatprep.subr.bf16.mxu0 %v4705_v52  ;;  %555 = vmatpush1.bf16.msra.mxu1 %v4707_v53  ;;  %v4804_v52 = vld [vmem:[#allocation2 + $0x444] ss:$8 sps:$4 sm:$0xff]   ;;  %v4802_v53 = vld [vmem:[#allocation2 + $0x440] ss:$8 sps:$4 sm:$0xff]  }
  0x59   :  { %556 = vmatprep.subr.bf16.mxu1 %v4709_v54  ;;  %v4807_v54 = vld [vmem:[#allocation2 + $0x344] ss:$8 sps:$4 sm:$0xff]  }
  0x5b   :  { %327 = vmatpush1.bf16.msra.mxu0 %v4708_v55  ;;  %v4805_v55 = vld [vmem:[#allocation2 + $0x340] ss:$8 sps:$4 sm:$0xff]  }
  0x5c   :  { %328 = vmatprep.subr.bf16.mxu0 %v4711_v56  ;;  %557 = vmatpush1.bf16.msra.mxu1 %v4713_v57  ;;  %v4810_v56 = vld [vmem:[#allocation2 + $0x454] ss:$8 sps:$4 sm:$0xff]   ;;  %v4808_v57 = vld [vmem:[#allocation2 + $0x450] ss:$8 sps:$4 sm:$0xff]  }
  0x5d   :  { %558 = vmatprep.subr.bf16.mxu1 %v4715_v58  ;;  %v4813_v58 = vld [vmem:[#allocation2 + $0x354] ss:$8 sps:$4 sm:$0xff]  }
  0x5f   :  { %329 = vmatpush1.bf16.msra.mxu0 %v4714_v59  ;;  %v4811_v59 = vld [vmem:[#allocation2 + $0x350] ss:$8 sps:$4 sm:$0xff]  }
  0x60   :  { %330 = vmatprep.subr.bf16.mxu0 %v4717_v60  ;;  %559 = vmatpush1.bf16.msra.mxu1 %v4719_v61  ;;  %v4816_v60 = vld [vmem:[#allocation2 + $0x464] ss:$8 sps:$4 sm:$0xff]   ;;  %v4814_v61 = vld [vmem:[#allocation2 + $0x460] ss:$8 sps:$4 sm:$0xff]  }
  0x61   :  { %560 = vmatprep.subr.bf16.mxu1 %v4723_v62  ;;  %v4819_v62 = vld [vmem:[#allocation2 + $0x364] ss:$8 sps:$4 sm:$0xff]  }
  0x63   :  { %331 = vmatpush1.bf16.msra.mxu0 %v4720_v63  ;;  %v4817_v63 = vld [vmem:[#allocation2 + $0x360] ss:$8 sps:$4 sm:$0xff]  }
  0x64   :  { %776 = vmatprep.subr.bf16.mxu0 %v4729_v0  ;;  %561 = vmatpush1.bf16.msra.mxu1 %v4726_v1  ;;  %v4822_v0 = vld [vmem:[#allocation2 + $0x474] ss:$8 sps:$4 sm:$0xff]   ;;  %v4820_v1 = vld [vmem:[#allocation2 + $0x470] ss:$8 sps:$4 sm:$0xff]  }
  0x65   :  { %1269 = vmatprep.subr.bf16.mxu1 %v4780_v36  ;;  %v4856_v36 = vld [vmem:[#allocation2 + $0x4d0] ss:$8 sps:$4 sm:$0xff]  }
  0x66   :  { %333 = vmatmul.mubr.bf16.vlgmr.msra.gmra.mrb[0].mxu0 %v5341_v2 }
  0x67   :  { %777 = vmatpush1.bf16.msra.mxu0 %v4727_v3  ;;  %342 = vmatprep.mubr.bf16.mxu0 %v5346_v4  ;;  %v4823_v3 = vld [vmem:[#allocation2 + $0x370] ss:$8 sps:$4 sm:$0xff]  }
  0x68   :  { %563 = vmatmul.mubr.bf16.vlgmr.msra.gmra.mrb[0].mxu1 %v5341_v2  ;;  %778 = vmatprep.subr.bf16.mxu0 %v4732_v5  ;;  %v4826_v5 = vld [vmem:[#allocation2 + $0x480] ss:$8 sps:$4 sm:$0xff]  }
  0x69   :  { %572 = vmatprep.mubr.bf16.mxu1 %v5346_v4  ;;  %1270 = vmatpush1.bf16.msra.mxu1 %v4778_v37 }
  0x6a   :  { %1271 = vmatprep.subr.bf16.mxu1 %v4786_v40  ;;  %v4864_v40 = vld [vmem:[#allocation2 + $0x4e4] ss:$8 sps:$4 sm:$0xff]  }
  0x6b   :  { %779 = vmatpush1.bf16.msra.mxu0 %v4730_v6  ;;  %v4831_v6 = vld [vmem:[#allocation2 + $0x384] ss:$8 sps:$4 sm:$0xff]  }
  0x6c   :  { %780 = vmatprep.subr.bf16.mxu0 %v4738_v7  ;;  %v4829_v7 = vld [vmem:[#allocation2 + $0x380] ss:$8 sps:$4 sm:$0xff]  }
  0x6d   :  { %1272 = vmatpush1.bf16.msra.mxu1 %v4784_v41 }
  0x6e   :  { %343 = vmatmul.mubr.bf16.gmra.mrb[4].mxu0 %v4735_v8  ;;  %1273 = vmatprep.subr.bf16.mxu1 %v4792_v44 }
  0x6f   :  { %781 = vmatpush1.bf16.msra.mxu0 %v4736_v9  ;;  %808 = vmatprep.mubr.bf16.mxu0 %v5334_v46  ;;  %v4795_v46 = vld [vmem:[#allocation2 + $0x324] ss:$8 sps:$4 sm:$0xff]   ;;  %v4832_v9 = vld [vmem:[#allocation2 + $0x490] ss:$8 sps:$4 sm:$0xff]  }
  0x70   :  { %573 = vmatmul.mubr.bf16.gmra.mrb[4].mxu1 %v4735_v8  ;;  %782 = vmatprep.subr.bf16.mxu0 %v4741_v10  ;;  %v4837_v10 = vld [vmem:[#allocation2 + $0x394] ss:$8 sps:$4 sm:$0xff]  }
  0x71   :  { %1274 = vmatpush1.bf16.msra.mxu1 %v4790_v45 }
  0x72   :  { %1275 = vmatprep.subr.bf16.mxu1 %v4798_v48  ;;  %v4862_v48 = vld [vmem:[#allocation2 + $0x4e0] ss:$8 sps:$4 sm:$0xff]  }
  0x73   :  { %783 = vmatpush1.bf16.msra.mxu0 %v4739_v11  ;;  %v4835_v11 = vld [vmem:[#allocation2 + $0x390] ss:$8 sps:$4 sm:$0xff]  }
  0x74   :  { %784 = vmatprep.subr.bf16.mxu0 %v4744_v12  ;;  %v4840_v12 = vld [vmem:[#allocation2 + $0x4a4] ss:$8 sps:$4 sm:$0xff]  }
  0x75   :  { %1276 = vmatpush1.bf16.msra.mxu1 %v4796_v49 }
  0x76   :  { %1277 = vmatprep.subr.bf16.mxu1 %v4804_v52 }
  0x77   :  { %785 = vmatpush1.bf16.msra.mxu0 %v4742_v13  ;;  %v4838_v13 = vld [vmem:[#allocation2 + $0x4a0] ss:$8 sps:$4 sm:$0xff]  }
  0x78   :  { %786 = vmatprep.subr.bf16.mxu0 %v4747_v14  ;;  %v4843_v14 = vld [vmem:[#allocation2 + $0x3a4] ss:$8 sps:$4 sm:$0xff]  }
  0x79   :  { %1278 = vmatpush1.bf16.msra.mxu1 %v4802_v53  ;;  %v4865_v53 = vld [vmem:[#allocation2 + $0x3e0] ss:$8 sps:$4 sm:$0xff]  }
  0x7a   :  { %1279 = vmatprep.subr.bf16.mxu1 %v4810_v56 }
  0x7b   :  { %787 = vmatpush1.bf16.msra.mxu0 %v4745_v15  ;;  %v42_v15 = vlaneseq }
  0x7c   :  { %788 = vmatprep.subr.bf16.mxu0 %v4750_v16  ;;  %v4841_v16 = vld [vmem:[#allocation2 + $0x3a0] ss:$8 sps:$4 sm:$0xff]  }
  0x7d   :  { %1280 = vmatpush1.bf16.msra.mxu1 %v4808_v57  ;;  %v4873_v57 = vld [vmem:[#allocation2 + $0x3f4] ss:$8 sps:$4 sm:$0xff]  }
  0x7e   :  { %1281 = vmatprep.subr.bf16.mxu1 %v4816_v60 }
  0x7f   :  { %789 = vmatpush1.bf16.msra.mxu0 %v4748_v17  ;;  %v4846_v17 = vld [vmem:[#allocation2 + $0x4b4] ss:$8 sps:$4 sm:$0xff]  }
  0x80   :  { %790 = vmatprep.subr.bf16.mxu0 %v4753_v18  ;;  %v4844_v18 = vld [vmem:[#allocation2 + $0x4b0] ss:$8 sps:$4 sm:$0xff]  }
  0x81   :  { %1282 = vmatpush1.bf16.msra.mxu1 %v4814_v61 }
  0x82   :  { %1283 = vmatprep.subr.bf16.mxu1 %v4822_v0 }
  0x83   :  { %791 = vmatpush1.bf16.msra.mxu0 %v4751_v19  ;;  %v4847_v19 = vld [vmem:[#allocation2 + $0x3b0] ss:$8 sps:$4 sm:$0xff]  }
  0x84   :  { %792 = vmatprep.subr.bf16.mxu0 %v4756_v20  ;;  %v5358_v20 = vshrl.u32 %v42_v15, 7 }
  0x85   :  { %1284 = vmatpush1.bf16.msra.mxu1 %v4820_v1 }
  0x86   :  { %vm361_vm0 = vcmp.lt.s32.totalorder %v5358_v20, 7  ;;  %v5385_v15 = vsub.s32 0, %v5358_v20  ;;  %vm837_vm1 = vcmp.lt.s32.totalorder %v5358_v20, 6 }
  0x87   :  { %793 = vmatpush1.bf16.msra.mxu0 %v4754_v21  ;;  %v4849_v21 = vld [vmem:[#allocation2 + $0x3b4] ss:$8 sps:$4 sm:$0xff]  }
  0x88   :  { %794 = vmatprep.subr.bf16.mxu0 %v4759_v22  ;;  %v4850_v22 = vld [vmem:[#allocation2 + $0x4c0] ss:$8 sps:$4 sm:$0xff]  }
  0x8b   :  { %795 = vmatpush1.bf16.msra.mxu0 %v4757_v23  ;;  %v4852_v23 = vld [vmem:[#allocation2 + $0x4c4] ss:$8 sps:$4 sm:$0xff]  }
  0x8c   :  { %796 = vmatprep.subr.bf16.mxu0 %v4762_v24  ;;  %v4855_v24 = vld [vmem:[#allocation2 + $0x3c4] ss:$8 sps:$4 sm:$0xff]  }
  0x8f   :  { %797 = vmatpush1.bf16.msra.mxu0 %v4760_v25 }
  0x90   :  { %798 = vmatprep.subr.bf16.mxu0 %v4765_v26  ;;  %v4858_v26 = vld [vmem:[#allocation2 + $0x4d4] ss:$8 sps:$4 sm:$0xff]  }
  0x93   :  { %799 = vmatpush1.bf16.msra.mxu0 %v4763_v27 }
  0x94   :  { %800 = vmatprep.subr.bf16.mxu0 %v4768_v28 }
  0x97   :  { %801 = vmatpush1.bf16.msra.mxu0 %v4766_v29  ;;  %v4853_v29 = vld [vmem:[#allocation2 + $0x3c0] ss:$8 sps:$4 sm:$0xff]  }
  0x98   :  { %802 = vmatprep.subr.bf16.mxu0 %v4771_v30 }
  0x9b   :  { %803 = vmatpush1.bf16.msra.mxu0 %v4769_v31 }
  0x9c   :  { %804 = vmatprep.subr.bf16.mxu0 %v4774_v32  ;;  %v4861_v32 = vld [vmem:[#allocation2 + $0x3d4] ss:$8 sps:$4 sm:$0xff]  }
  0x9f   :  { %805 = vmatpush1.bf16.msra.mxu0 %v4772_v33 }
  0xa0   :  { %806 = vmatprep.subr.bf16.mxu0 %v4777_v34 }
  0xa3   :  { %807 = vmatpush1.bf16.msra.mxu0 %v4775_v35 }
  0xa4   :  { %1498 = vmatprep.subr.bf16.mxu0 %v4783_v38 }
  0xa6   :  { %809 = vmatmul.mubr.bf16.vlgmr.msra.gmra.mrb[8].mxu0 %v5341_v2  ;;  %v4825_v2 = vld [vmem:[#allocation2 + $0x374] ss:$8 sps:$4 sm:$0xff]  }
  0xa7   :  { %818 = vmatprep.mubr.bf16.mxu0 %v5346_v4  ;;  %1499 = vmatpush1.bf16.msra.mxu0 %v4781_v39  ;;  %v4828_v4 = vld [vmem:[#allocation2 + $0x484] ss:$8 sps:$4 sm:$0xff]  }
  0xa8   :  { %1500 = vmatprep.subr.bf16.mxu0 %v4789_v42  ;;  %1285 = vmatprep.subr.bf16.mxu1 %v4828_v4 }
  0xa9   :  { %1286 = vmatpush1.bf16.msra.mxu1 %v4826_v5 }
  0xab   :  { %1501 = vmatpush1.bf16.msra.mxu0 %v4787_v43  ;;  %v4859_v43 = vld [vmem:[#allocation2 + $0x3d0] ss:$8 sps:$4 sm:$0xff]  }
  0xac   :  { %1502 = vmatprep.subr.bf16.mxu0 %v4795_v46  ;;  %v4867_v46 = vld [vmem:[#allocation2 + $0x3e4] ss:$8 sps:$4 sm:$0xff]  }
  0xae   :  { %819 = vmatmul.mubr.bf16.gmra.mrb[12].mxu0 %v4735_v8  ;;  %v4834_v8 = vld [vmem:[#allocation2 + $0x494] ss:$8 sps:$4 sm:$0xff]  }
  0xaf   :  { %1503 = vmatpush1.bf16.msra.mxu0 %v4793_v47  ;;  %1287 = vmatprep.subr.bf16.mxu1 %v4834_v8 }
  0xb0   :  { %1504 = vmatprep.subr.bf16.mxu0 %v4801_v50  ;;  %1288 = vmatpush1.bf16.msra.mxu1 %v4832_v9  ;;  %v4870_v50 = vld [vmem:[#allocation2 + $0x4f4] ss:$8 sps:$4 sm:$0xff]  }
  0xb1   :  { %1289 = vmatprep.subr.bf16.mxu1 %v4840_v12 }
  0xb3   :  { %1505 = vmatpush1.bf16.msra.mxu0 %v4799_v51 }
  0xb4   :  { %1506 = vmatprep.subr.bf16.mxu0 %v4807_v54  ;;  %1290 = vmatpush1.bf16.msra.mxu1 %v4838_v13 }
  0xb5   :  { %1291 = vmatprep.subr.bf16.mxu1 %v4846_v17  ;;  %v5387_v17 = vld [vmem:[#allocation4] sm:$0x77] }
  0xb7   :  { %1507 = vmatpush1.bf16.msra.mxu0 %v4805_v55 }
  0xb8   :  { %1508 = vmatprep.subr.bf16.mxu0 %v4813_v58  ;;  %1292 = vmatpush1.bf16.msra.mxu1 %v4844_v18  ;;  %v44_v18 = vadd.s32 8, %v5358_v20 }
  0xb9   :  { %1293 = vmatprep.subr.bf16.mxu1 %v4852_v23 }
  0xbb   :  { %1509 = vmatpush1.bf16.msra.mxu0 %v4811_v59 }
  0xbc   :  { %1510 = vmatprep.subr.bf16.mxu0 %v4819_v62  ;;  %1294 = vmatpush1.bf16.msra.mxu1 %v4850_v22  ;;  %v4868_v62 = vld [vmem:[#allocation2 + $0x4f0] ss:$8 sps:$4 sm:$0xff]  }
  0xbd   :  { %1295 = vmatprep.subr.bf16.mxu1 %v4858_v26 }
  0xbf   :  { %1511 = vmatpush1.bf16.msra.mxu0 %v4817_v63 }
  0xc0   :  { %1512 = vmatprep.subr.bf16.mxu0 %v4825_v2  ;;  %1296 = vmatpush1.bf16.msra.mxu1 %v4856_v36 }
  0xc1   :  { %1297 = vmatprep.subr.bf16.mxu1 %v4864_v40 }
  0xc3   :  { %1513 = vmatpush1.bf16.msra.mxu0 %v4823_v3 }
  0xc4   :  { %1514 = vmatprep.subr.bf16.mxu0 %v4831_v6  ;;  %1298 = vmatpush1.bf16.msra.mxu1 %v4862_v48 }
  0xc5   :  { %1299 = vmatprep.subr.bf16.mxu1 %v4870_v50 }
  0xc7   :  { %1515 = vmatpush1.bf16.msra.mxu0 %v4829_v7  ;;  %v4871_v7 = vld [vmem:[#allocation2 + $0x3f0] ss:$8 sps:$4 sm:$0xff]  }
  0xc8   :  { %1516 = vmatprep.subr.bf16.mxu0 %v4837_v10  ;;  %1300 = vmatpush1.bf16.msra.mxu1 %v4868_v62 }
  0xcb   :  { %1517 = vmatpush1.bf16.msra.mxu0 %v4835_v11 }
  0xcc   :  { %1518 = vmatprep.subr.bf16.mxu0 %v4843_v14  ;;  %v4876_v14 = vld [vmem:[#allocation2 + $0x504] ss:$8 sps:$4 sm:$0xff]  }
  0xcd   :  { %1744 = vmatprep.subr.bf16.mxu1 %v4876_v14 }
  0xcf   :  { %1519 = vmatpush1.bf16.msra.mxu0 %v4841_v16 }
  0xd0   :  { %1520 = vmatprep.subr.bf16.mxu0 %v4849_v21  ;;  %v5391_v21 = vsub.s32 4, %v5358_v20 }
  0xd3   :  { %1521 = vmatpush1.bf16.msra.mxu0 %v4847_v19 }
  0xd4   :  { %1522 = vmatprep.subr.bf16.mxu0 %v4855_v24 }
  0xd7   :  { %1523 = vmatpush1.bf16.msra.mxu0 %v4853_v29  ;;  %v5396_v29 = vand.u32 15, %v44_v18 }
  0xd8   :  { %1524 = vmatprep.subr.bf16.mxu0 %v4861_v32  ;;  %v863_v32 = vrot.slane %v5387_v17, %v5391_v21 }
  0xd9   :  { %vm891_vm2 = vcmp.lt.s32.totalorder %v5396_v29, 14  ;;  %vm1859_vm4 = vcmp.lt.s32.totalorder %v5396_v29, 12  ;;  %vm2827_vm6 = vcmp.lt.s32.totalorder %v5396_v29, 10 }
  0xdb   :  { %1525 = vmatpush1.bf16.msra.mxu0 %v4859_v43 }
  0xdc   :  { %1526 = vmatprep.subr.bf16.mxu0 %v4867_v46  ;;  %v5286_v46 = vmov 0.0  }
  0xdd   :  { %v4329_v48 = vsel %vm891_vm2, 1.0, %v5286_v46 }
  0xdf   :  { %1527 = vmatpush1.bf16.msra.mxu0 %v4865_v53 }
  0xe0   :  { %1528 = vmatprep.subr.bf16.mxu0 %v4873_v57 }
  0xe3   :  { %1529 = vmatpush1.bf16.msra.mxu0 %v4871_v7 }
 0x139   :  { %v334_v25 = vpop.f32.mrb[0].mxu0 }
 0x13a   :  { %v353_v27 = vrot.slane %v334_v25, 1  ;;  %v5360_v28 = vpop.f32.mrb[1].mxu0  ;;  %v859_v25 = vrot.slane %v5387_v17, %v5385_v15 }
 0x13b   :  { %v338_v30 = vpop.f32.mrb[2].mxu0  ;;  %v564_v31 = vpop.f32.mrb[0].mxu1  ;;  %v354_v37 = vrot.slane %v5360_v28, 1 }
 0x13c   :  { %v355_v33 = vrot.slane %v338_v30, 1  ;;  %v340_v34 = vpop.f32.mrb[3].mxu0  ;;  %v566_v35 = vpop.f32.mrb[1].mxu1  ;;  %v46_v30 = vadd.s32 24, %v5358_v20 }
 0x13d   :  { %v356_v38 = vrot.slane %v340_v34, 1  ;;  %v568_v39 = vpop.f32.mrb[2].mxu1 }
 0x13e   :  { %v366_v41 = vsel %vm361_vm0, %v353_v27, %v355_v33  ;;  %v570_v42 = vpop.f32.mrb[3].mxu1 }
 0x13f   :  { %v5366_v44 = vadd.f32 %v564_v31, %v366_v41  ;;  %v367_v45 = vsel %vm361_vm0, %v354_v37, %v356_v38 }
 0x140   :  { %v5370_v47 = vadd.f32 %v566_v35, %v367_v45  ;;  %v869_v35 = vrot.slane %v859_v25, %v5385_v15 }
 0x141   :  { %v344_v49 = vpop.f32.mrb[4].mxu0 }
 0x142   :  { %v357_v51 = vrot.slane %v344_v49, 1  ;;  %v346_v52 = vpop.f32.mrb[5].mxu0 }
 0x143   :  { %v358_v54 = vrot.slane %v346_v52, 1  ;;  %v348_v55 = vpop.f32.mrb[6].mxu0  ;;  %v574_v56 = vpop.f32.mrb[4].mxu1 }
 0x144   :  { %v364_v58 = vsel %vm361_vm0, %v355_v33, %v357_v51  ;;  %v359_v59 = vrot.slane %v348_v55, 1  ;;  %v350_v60 = vpop.f32.mrb[7].mxu0  ;;  %v576_v61 = vpop.f32.mrb[5].mxu1 }
 0x145   :  { %v569_v63 = vadd.f32 %v568_v39, %v364_v58  ;;  %v365_v0 = vsel %vm361_vm0, %v356_v38, %v358_v54  ;;  %v360_v1 = vrot.slane %v350_v60, 1  ;;  %v578_v2 = vpop.f32.mrb[6].mxu1  ;;  %v5409_v38 = vand.u32 15, %v46_v30 }
 0x146   :  { %v571_v3 = vadd.f32 %v570_v42, %v365_v0  ;;  %v362_v4 = vsel %vm361_vm0, %v357_v51, %v359_v59  ;;  %v368_v5 = vsel %vm361_vm0, %v359_v59, %v353_v27  ;;  %v580_v6 = vpop.f32.mrb[7].mxu1  ;;  %v873_v39 = vrot.slane %v863_v32, %v5385_v15 }
 0x147   :  { %v575_v8 = vadd.f32 %v574_v56, %v362_v4  ;;  %v363_v9 = vsel %vm361_vm0, %v358_v54, %v360_v1  ;;  %v579_v10 = vadd.f32 %v578_v2, %v368_v5  ;;  %v369_v11 = vsel %vm361_vm0, %v360_v1, %v354_v37 }
 0x148   :  { %v577_v12 = vadd.f32 %v576_v61, %v363_v9  ;;  %v581_v13 = vadd.f32 %v580_v6, %v369_v11  ;;  %vm893_vm3 = vcmp.lt.s32.totalorder %v5409_v38, 14  ;;  %vm1861_vm5 = vcmp.lt.s32.totalorder %v5409_v38, 12 }
 0x149   :  { %v4330_v7 = vsel %vm893_vm3, 1.0, %v5286_v46  ;;  %vm2829_vm7 = vcmp.lt.s32.totalorder %v5409_v38, 10 }
 0x179   :  { %v810_v16 = vpop.f32.mrb[8].mxu0 }
 0x17a   :  { %v812_v19 = vpop.f32.mrb[9].mxu0  ;;  %v829_v23 = vrot.slane %v810_v16, 2 }
 0x17b   :  { %v814_v22 = vpop.f32.mrb[10].mxu0  ;;  %v830_v27 = vrot.slane %v812_v19, 2 }
 0x17c   :  { %v831_v24 = vrot.slane %v814_v22, 2  ;;  %v816_v26 = vpop.f32.mrb[11].mxu0 }
 0x17d   :  { %v832_v28 = vrot.slane %v816_v26, 2 }
 0x17e   :  { %v842_v31 = vsel %vm837_vm1, %v829_v23, %v831_v24 }
 0x17f   :  { %v846_v33 = vadd.f32 %v842_v31, %v5366_v44  ;;  %v843_v34 = vsel %vm837_vm1, %v830_v27, %v832_v28 }
 0x180   :  { %v847_v36 = vadd.f32 %v843_v34, %v5370_v47 }
 0x181   :  { %v820_v37 = vpop.f32.mrb[12].mxu0  ;;  %v874_v45 = vadd.f32 %v869_v35, %v846_v33 }
 0x182   :  { %v833_v40 = vrot.slane %v820_v37, 2  ;;  %v822_v41 = vpop.f32.mrb[13].mxu0  ;;  %v875_v53 = vadd.f32 %v873_v39, %v847_v36 }
 0x183   :  { %v834_v42 = vrot.slane %v822_v41, 2  ;;  %v824_v43 = vpop.f32.mrb[14].mxu0  ;;  %v5426_v61 = vmax.f32 %v874_v45, 0.0 }
 0x184   :  { %v840_v44 = vsel %vm837_vm1, %v831_v24, %v833_v40  ;;  %v835_v49 = vrot.slane %v824_v43, 2  ;;  %v826_v47 = vpop.f32.mrb[15].mxu0  ;;  %v5435_v5 = vmax.f32 %v875_v53, 0.0 }
 0x185   :  { %v848_v50 = vadd.f32 %v840_v44, %v569_v63  ;;  %v841_v51 = vsel %vm837_vm1, %v832_v28, %v834_v42  ;;  %v836_v52 = vrot.slane %v826_v47, 2  ;;  %v930_v16 = vmul.f32 %v5426_v61, %v5426_v61 }
 0x186   :  { %v849_v54 = vadd.f32 %v841_v51, %v571_v3  ;;  %v838_v55 = vsel %vm837_vm1, %v833_v40, %v835_v49  ;;  %v844_v56 = vsel %vm837_vm1, %v835_v49, %v829_v23  ;;  %v931_v23 = vmul.f32 %v5435_v5, %v5435_v5 }
 0x187   :  { %v5422_v57 = vadd.f32 %v869_v35, %v848_v50  ;;  %v850_v58 = vadd.f32 %v838_v55, %v575_v8  ;;  %v852_v59 = vadd.f32 %v844_v56, %v579_v10  ;;  %v839_v60 = vsel %vm837_vm1, %v834_v42, %v836_v52 }
 0x188   :  { %v5428_v62 = vadd.f32 %v873_v39, %v849_v54  ;;  %v845_v63 = vsel %vm837_vm1, %v836_v52, %v830_v27  ;;  %v851_v0 = vadd.f32 %v839_v60, %v577_v12 }
 0x189   :  { %v884_v1 = vmax.f32 %v5422_v57, 0.0  ;;  %v878_v2 = vadd.f32 %v869_v35, %v850_v58  ;;  %v5433_v3 = vadd.f32 %v869_v35, %v852_v59  ;;  %v853_v4 = vadd.f32 %v845_v63, %v581_v13 }
 0x18a   :  { %v885_v6 = vmax.f32 %v5428_v62, 0.0  ;;  %v879_v8 = vadd.f32 %v873_v39, %v851_v0  ;;  %v5494_v57 = vsub.s32 2, %v5358_v20 }
 0x18b   :  { %v904_v9 = vmul.f32 %v4329_v48, %v884_v1  ;;  %v5443_v10 = vmax.f32 %v878_v2, 0.0  ;;  %v888_v11 = vmax.f32 %v5433_v3, 0.0  ;;  %v5446_v12 = vadd.f32 %v873_v39, %v853_v4 }
 0x18c   :  { %v905_v13 = vmul.f32 %v4329_v48, %v885_v6  ;;  %v5450_v14 = vmax.f32 %v879_v8, 0.0 }
 0x18d   :  { %v910_v18 = vadd.f32 %v904_v9, %v5426_v61  ;;  %v932_v19 = vmul.f32 %v904_v9, %v904_v9  ;;  %v908_v22 = vmul.f32 %v4330_v7, %v888_v11  ;;  %v889_v26 = vmax.f32 %v5446_v12, 0.0 }
 0x18e   :  { %v919_v24 = vadd.f32 %v905_v13, %v5435_v5  ;;  %v933_v25 = vmul.f32 %v905_v13, %v905_v13  ;;  %v934_v30 = vmul.f32 %v5443_v10, %v5443_v10  ;;  %v935_v34 = vmul.f32 %v5450_v14, %v5450_v14 }
 0x18f   :  { %v938_v27 = vadd.f32 %v932_v19, %v930_v16  ;;  %v911_v28 = vadd.f32 %v910_v18, %v5443_v10  ;;  %v909_v32 = vmul.f32 %v4330_v7, %v889_v26  ;;  %v936_v36 = vmul.f32 %v908_v22, %v908_v22 }
 0x190   :  { %v947_v31 = vadd.f32 %v933_v25, %v931_v23  ;;  %v920_v33 = vadd.f32 %v919_v24, %v5450_v14 }
 0x191   :  { %v912_v35 = vadd.f32 %v911_v28, %v908_v22  ;;  %v939_v37 = vadd.f32 %v938_v27, %v934_v30  ;;  %v937_v40 = vmul.f32 %v909_v32, %v909_v32 }
 0x192   :  { %v921_v39 = vadd.f32 %v920_v33, %v909_v32  ;;  %v948_v41 = vadd.f32 %v947_v31, %v935_v34  ;;  %v5470_v34 = vsub.s32 1, %v5358_v20 }
 0x193   :  { %v913_v42 = vrot.slane %v912_v35, 4  ;;  %v940_v43 = vadd.f32 %v939_v37, %v936_v36 }
 0x194   :  { %v922_v45 = vrot.slane %v921_v39, 4  ;;  %v949_v44 = vadd.f32 %v948_v41, %v937_v40  ;;  %v971_v36 = vrot.slane %v5387_v17, %v5470_v34 }
 0x195   :  { %v914_v48 = vadd.f32 %v913_v42, %v912_v35  ;;  %v941_v49 = vrot.slane %v940_v43, 4  ;;  %v5473_v35 = vsub.s32 5, %v5358_v20 }
 0x196   :  { %v923_v47 = vadd.f32 %v922_v45, %v921_v39  ;;  %v950_v50 = vrot.slane %v949_v44, 4 }
 0x197   :  { %v915_v51 = vrot.slane %v914_v48, 2  ;;  %v942_v52 = vadd.f32 %v941_v49, %v940_v43  ;;  %v975_v37 = vrot.slane %v5387_v17, %v5473_v35 }
 0x198   :  { %v924_v53 = vrot.slane %v923_v47, 2  ;;  %v951_v54 = vadd.f32 %v950_v50, %v949_v44 }
 0x199   :  { %v916_v55 = vadd.f32 %v915_v51, %v914_v48  ;;  %v943_v56 = vrot.slane %v942_v52, 2 }
 0x19a   :  { %v925_v58 = vadd.f32 %v924_v53, %v923_v47  ;;  %v952_v59 = vrot.slane %v951_v54, 2 }
 0x19b   :  { %v917_v60 = vrot.slane %v916_v55, 1  ;;  %v944_v63 = vadd.f32 %v943_v56, %v942_v52 }
 0x19c   :  { %v926_v0 = vrot.slane %v925_v58, 1  ;;  %v953_v2 = vadd.f32 %v952_v59, %v951_v54 }
 0x19d   :  { %v918_v4 = vadd.f32 %v917_v60, %v916_v55  ;;  %v945_v7 = vrot.slane %v944_v63, 1 }
 0x19e   :  { %v927_v8 = vadd.f32 %v926_v0, %v925_v58  ;;  %v954_v9 = vrot.slane %v953_v2, 1 }
 0x19f   :  { %v928_v13 = vmul.f32 0.035714287, %v918_v4  ;;  %v946_v16 = vadd.f32 %v945_v7, %v944_v63 }
 0x1a0   :  { %v929_v18 = vmul.f32 0.035714287, %v927_v8  ;;  %v955_v19 = vadd.f32 %v954_v9, %v953_v2 }
 0x1a1   :  { %v956_v22 = vmul.f32 0.035714287, %v946_v16  ;;  %v958_v23 = vmul.f32 %v928_v13, %v928_v13 }
 0x1a2   :  { %v957_v24 = vmul.f32 0.035714287, %v955_v19  ;;  %v959_v25 = vmul.f32 %v929_v18, %v929_v18 }
 0x1a3   :  { %v960_v27 = vsub.f32 %v956_v22, %v958_v23  ;;  %v4879_v23 = vld [vmem:[#allocation2 + $0x514] ss:$8 sps:$4 sm:$0xff]  }
 0x1a4   :  { %v961_v28 = vsub.f32 %v957_v24, %v959_v25  ;;  %v4877_v25 = vld [vmem:[#allocation2 + $0x510] ss:$8 sps:$4 sm:$0xff]  }
 0x1a5   :  { %v962_v30 = vmax.f32 %v960_v27, 0.0  ;;  %v4882_v27 = vld [vmem:[#allocation2 + $0x524] ss:$8 sps:$4 sm:$0xff]  }
 0x1a6   :  { %v963_v31 = vmax.f32 %v961_v28, 0.0  ;;  %v4880_v28 = vld [vmem:[#allocation2 + $0x520] ss:$8 sps:$4 sm:$0xff]  }
 0x1a7   :  { %v964_v32 = vadd.f32 1e-05, %v962_v30  ;;  %v4885_v30 = vld [vmem:[#allocation2 + $0x534] ss:$8 sps:$4 sm:$0xff]  }
 0x1a8   :  { %v965_v33 = vadd.f32 1e-05, %v963_v31  ;;  %v4883_v31 = vld [vmem:[#allocation2 + $0x530] ss:$8 sps:$4 sm:$0xff]  }
 0x1a9   :  { %5210 = vrsqrt.f32 %v964_v32  ;;  %v4888_v32 = vld [vmem:[#allocation2 + $0x544] ss:$8 sps:$4 sm:$0xff]  }
 0x1aa   :  { %5212 = vrsqrt.f32 %v965_v33  ;;  %v4886_v33 = vld [vmem:[#allocation2 + $0x540] ss:$8 sps:$4 sm:$0xff]  }
 0x1b3   :  { %v5211_v39 = vpop.eup %5210 }
 0x1b4   :  { %v5213_v40 = vpop.eup %5212  ;;  %v978_v41 = vmul.f32 %v5211_v39, %v971_v36  ;;  %v4891_v36 = vld [vmem:[#allocation2 + $0x554] ss:$8 sps:$4 sm:$0xff]   ;;  %v4894_v39 = vld [vmem:[#allocation2 + $0x564] ss:$8 sps:$4 sm:$0xff]  }
 0x1b5   :  { %v979_v42 = vmul.f32 %v5213_v40, %v975_v37  ;;  %v4889_v37 = vld [vmem:[#allocation2 + $0x550] ss:$8 sps:$4 sm:$0xff]   ;;  %v4892_v40 = vld [vmem:[#allocation2 + $0x560] ss:$8 sps:$4 sm:$0xff]  }
 0x1b6   :  { %v980_v43 = vmul.f32 %v978_v41, %v928_v13  ;;  %v991_v45 = vrot.slane %v978_v41, %v5385_v15  ;;  %v4897_v41 = vld [vmem:[#allocation2 + $0x574] ss:$8 sps:$4 sm:$0xff]  }
 0x1b7   :  { %v981_v44 = vmul.f32 %v979_v42, %v929_v18  ;;  %v995_v48 = vrot.slane %v979_v42, %v5385_v15  ;;  %v4874_v18 = vld [vmem:[#allocation2 + $0x500] ss:$8 sps:$4 sm:$0xff]   ;;  %v4895_v42 = vld [vmem:[#allocation2 + $0x570] ss:$8 sps:$4 sm:$0xff]  }
 0x1b8   :  { %v996_v49 = vmul.f32 %v991_v45, %v5426_v61  ;;  %v998_v47 = vmul.f32 %v991_v45, %v884_v1  ;;  %v1000_v50 = vmul.f32 %v991_v45, %v5443_v10  ;;  %v1002_v51 = vmul.f32 %v991_v45, %v888_v11  ;;  %v4898_v45 = vld [vmem:[#allocation2 + $0x580] ss:$8 sps:$4 sm:$0xff]  }
 0x1b9   :  { %v984_v52 = vcombine.low %v980_v43, %v981_v44  ;;  %v997_v53 = vmul.f32 %v995_v48, %v5435_v5  ;;  %v999_v54 = vmul.f32 %v995_v48, %v885_v6  ;;  %v1001_v55 = vmul.f32 %v995_v48, %v5450_v14  ;;  %v4900_v43 = vld [vmem:[#allocation2 + $0x584] ss:$8 sps:$4 sm:$0xff]   ;;  %v4903_v44 = vld [vmem:[#allocation2 + $0x594] ss:$8 sps:$4 sm:$0xff]  }
 0x1ba   :  { %v1003_v56 = vmul.f32 %v995_v48, %v889_v26  ;;  %v5497_v1 = vsub.s32 6, %v5358_v20  ;;  %v4901_v48 = vld [vmem:[#allocation2 + $0x590] ss:$8 sps:$4 sm:$0xff]  }
 0x1bb   :  { %v985_v61 = vrot.slane %v984_v52, 6  ;;  %v4912_v52 = vld [vmem:[#allocation2 + $0x5c4] ss:$8 sps:$4 sm:$0xff]  }
 0x1bd   :  { %v987_v3 = vsub.f32 %v5387_v17, %v985_v61  ;;  %v4916_v61 = vld [vmem:[#allocation2 + $0x5e0] ss:$8 sps:$4 sm:$0xff]  }
 0x1bf   :  { %v1008_v10 = vrot.slane %v987_v3, %v5494_v57  ;;  %v1012_v5 = vrot.slane %v987_v3, %v5497_v1  ;;  %v4921_v3 = vld [vmem:[#allocation2 + $0x5f4] ss:$8 sps:$4 sm:$0xff]  }
 0x1c1   :  { %v1022_v62 = vrot.slane %v1012_v5, %v5494_v57  ;;  %v1018_v6 = vrot.slane %v1008_v10, %v5494_v57  ;;  %v4919_v10 = vld [vmem:[#allocation2 + $0x5f0] ss:$8 sps:$4 sm:$0xff]   ;;  %v4924_v5 = vld [vmem:[#allocation2 + $0x704] ss:$8 sps:$4 sm:$0xff]  }
 0x1c2   :  { %2237 = vmatprep.subr.bf16.mxu0 %v4924_v5  ;;  %v5002_v5 = vld [vmem:[#allocation2 + $0x7d4] ss:$8 sps:$4 sm:$0xff]  }
 0x1c3   :  { %v1024_v11 = vadd.f32 %v1022_v62, %v997_v53  ;;  %v1026_v12 = vadd.f32 %v1022_v62, %v999_v54  ;;  %v1023_v14 = vadd.f32 %v1018_v6, %v996_v49  ;;  %v1025_v26 = vadd.f32 %v1018_v6, %v998_v47  ;;  %v4906_v49 = vld [vmem:[#allocation2 + $0x5a4] ss:$8 sps:$4 sm:$0xff]   ;;  %v4904_v47 = vld [vmem:[#allocation2 + $0x5a0] ss:$8 sps:$4 sm:$0xff]   ;;  %v4915_v54 = vld [vmem:[#allocation2 + $0x5d4] ss:$8 sps:$4 sm:$0xff]  }
 0x1c4   :  { %v1028_v58 = vadd.f32 %v1022_v62, %v1001_v55  ;;  %v1030_v59 = vadd.f32 %v1022_v62, %v1003_v56  ;;  %v1027_v60 = vadd.f32 %v1018_v6, %v1000_v50  ;;  %v1029_v63 = vadd.f32 %v1018_v6, %v1002_v51  ;;  %v4909_v50 = vld [vmem:[#allocation2 + $0x5b4] ss:$8 sps:$4 sm:$0xff]   ;;  %v4907_v51 = vld [vmem:[#allocation2 + $0x5b0] ss:$8 sps:$4 sm:$0xff]   ;;  %v4910_v53 = vld [vmem:[#allocation2 + $0x5c0] ss:$8 sps:$4 sm:$0xff]  }
 0x1c5   :  { %v1032_v0 = vmax.f32 %v1024_v11, 0.0  ;;  %v1034_v2 = vmax.f32 %v1026_v12, 0.0  ;;  %v1031_v4 = vmax.f32 %v1023_v14, 0.0  ;;  %v1033_v17 = vmax.f32 %v1025_v26, 0.0  ;;  %v4913_v55 = vld [vmem:[#allocation2 + $0x5d0] ss:$8 sps:$4 sm:$0xff]  }
 0x1c6   :  { %v1036_v7 = vmax.f32 %v1028_v58, 0.0  ;;  %v1038_v8 = vmax.f32 %v1030_v59, 0.0  ;;  %v1035_v9 = vmax.f32 %v1027_v60, 0.0  ;;  %v1037_v13 = vmax.f32 %v1029_v63, 0.0  ;;  %v4918_v56 = vld [vmem:[#allocation2 + $0x5e4] ss:$8 sps:$4 sm:$0xff]  }
 0x1c7   :  { %v1040_v16 = vpack.c.bf16 %v1034_v2, %v1032_v0  ;;  %v5504_v19 = vpack.c.bf16 %v1033_v17, %v1031_v4  ;;  %v4922_v62 = vld [vmem:[#allocation2 + $0x700] ss:$8 sps:$4 sm:$0xff]   ;;  %v4927_v6 = vld [vmem:[#allocation2 + $0x604] ss:$8 sps:$4 sm:$0xff]   ;;  %v4930_v12 = vld [vmem:[#allocation2 + $0x714] ss:$8 sps:$4 sm:$0xff]  }
 0x1c8   :  { %v5506_v22 = vpack.c.bf16 %v1038_v8, %v1036_v7  ;;  %v5508_v24 = vpack.c.bf16 %v1037_v13, %v1035_v9  ;;  %v4925_v11 = vld [vmem:[#allocation2 + $0x600] ss:$8 sps:$4 sm:$0xff]   ;;  %v4928_v14 = vld [vmem:[#allocation2 + $0x710] ss:$8 sps:$4 sm:$0xff]   ;;  %v4933_v26 = vld [vmem:[#allocation2 + $0x614] ss:$8 sps:$4 sm:$0xff]  }
 0x1c9   :  { %1301 = vmatprep.mubr.bf16.mxu1 %v1040_v16  ;;  %1530 = vmatprep.mubr.bf16.mxu0 %v1040_v16  ;;  %v4931_v58 = vld [vmem:[#allocation2 + $0x610] ss:$8 sps:$4 sm:$0xff]   ;;  %v4936_v59 = vld [vmem:[#allocation2 + $0x724] ss:$8 sps:$4 sm:$0xff]   ;;  %v4934_v60 = vld [vmem:[#allocation2 + $0x720] ss:$8 sps:$4 sm:$0xff]  }
 0x1ca   :  { %1302 = vmatmul.mubr.bf16.vlgmr.msra.gmra.mrb[8].mxu1 %v5504_v19  ;;  %1531 = vmatmul.mubr.bf16.vlgmr.msra.gmra.mrb[16].mxu0 %v5504_v19  ;;  %v4939_v63 = vld [vmem:[#allocation2 + $0x624] ss:$8 sps:$4 sm:$0xff]   ;;  %v4937_v0 = vld [vmem:[#allocation2 + $0x620] ss:$8 sps:$4 sm:$0xff]   ;;  %v4942_v2 = vld [vmem:[#allocation2 + $0x734] ss:$8 sps:$4 sm:$0xff]  }
 0x1cb   :  { %1745 = vmatpush1.bf16.msra.mxu1 %v4874_v18  ;;  %1311 = vmatprep.mubr.bf16.mxu1 %v5506_v22  ;;  %v4940_v4 = vld [vmem:[#allocation2 + $0x730] ss:$8 sps:$4 sm:$0xff]   ;;  %v4945_v17 = vld [vmem:[#allocation2 + $0x634] ss:$8 sps:$4 sm:$0xff]   ;;  %v4948_v8 = vld [vmem:[#allocation2 + $0x744] ss:$8 sps:$4 sm:$0xff]  }
 0x1cc   :  { %1540 = vmatprep.mubr.bf16.mxu0 %v5506_v22  ;;  %1746 = vmatprep.subr.bf16.mxu1 %v4879_v23  ;;  %v4943_v7 = vld [vmem:[#allocation2 + $0x630] ss:$8 sps:$4 sm:$0xff]   ;;  %v4946_v9 = vld [vmem:[#allocation2 + $0x740] ss:$8 sps:$4 sm:$0xff]   ;;  %v4951_v13 = vld [vmem:[#allocation2 + $0x644] ss:$8 sps:$4 sm:$0xff]  }
 0x1cd   :  { %2238 = vmatpush1.bf16.msra.mxu0 %v4922_v62  ;;  %v4954_v18 = vld [vmem:[#allocation2 + $0x754] ss:$8 sps:$4 sm:$0xff]   ;;  %v4955_v23 = vld [vmem:[#allocation2 + $0x650] ss:$8 sps:$4 sm:$0xff]  }
 0x1ce   :  { %2239 = vmatprep.subr.bf16.mxu0 %v4930_v12 }
 0x1cf   :  { %1747 = vmatpush1.bf16.msra.mxu1 %v4877_v25  ;;  %v4958_v25 = vld [vmem:[#allocation2 + $0x760] ss:$8 sps:$4 sm:$0xff]  }
 0x1d0   :  { %1748 = vmatprep.subr.bf16.mxu1 %v4882_v27  ;;  %v4963_v27 = vld [vmem:[#allocation2 + $0x664] ss:$8 sps:$4 sm:$0xff]  }
 0x1d1   :  { %2240 = vmatpush1.bf16.msra.mxu0 %v4928_v14 }
 0x1d2   :  { %1312 = vmatmul.mubr.bf16.gmra.mrb[12].mxu1 %v5508_v24  ;;  %1541 = vmatmul.mubr.bf16.gmra.mrb[20].mxu0 %v5508_v24 }
 0x1d3   :  { %1749 = vmatpush1.bf16.msra.mxu1 %v4880_v28  ;;  %1776 = vmatprep.mubr.bf16.mxu1 %v1040_v16  ;;  %v4949_v16 = vld [vmem:[#allocation2 + $0x640] ss:$8 sps:$4 sm:$0xff]  }
 0x1d4   :  { %1750 = vmatprep.subr.bf16.mxu1 %v4885_v30  ;;  %2241 = vmatprep.subr.bf16.mxu0 %v4936_v59  ;;  %v4961_v28 = vld [vmem:[#allocation2 + $0x660] ss:$8 sps:$4 sm:$0xff]   ;;  %v4966_v30 = vld [vmem:[#allocation2 + $0x774] ss:$8 sps:$4 sm:$0xff]  }
 0x1d5   :  { %2242 = vmatpush1.bf16.msra.mxu0 %v4934_v60 }
 0x1d6   :  { %2243 = vmatprep.subr.bf16.mxu0 %v4942_v2 }
 0x1d7   :  { %1751 = vmatpush1.bf16.msra.mxu1 %v4883_v31  ;;  %v4964_v31 = vld [vmem:[#allocation2 + $0x770] ss:$8 sps:$4 sm:$0xff]  }
 0x1d8   :  { %1752 = vmatprep.subr.bf16.mxu1 %v4888_v32  ;;  %v4969_v32 = vld [vmem:[#allocation2 + $0x674] ss:$8 sps:$4 sm:$0xff]  }
 0x1d9   :  { %2244 = vmatpush1.bf16.msra.mxu0 %v4940_v4  ;;  %v5003_v4 = vld [vmem:[#allocation2 + $0x6d0] ss:$8 sps:$4 sm:$0xff]  }
 0x1da   :  { %2245 = vmatprep.subr.bf16.mxu0 %v4948_v8  ;;  %v5011_v8 = vld [vmem:[#allocation2 + $0x6e4] ss:$8 sps:$4 sm:$0xff]  }
 0x1db   :  { %1753 = vmatpush1.bf16.msra.mxu1 %v4886_v33  ;;  %v4967_v33 = vld [vmem:[#allocation2 + $0x670] ss:$8 sps:$4 sm:$0xff]  }
 0x1dc   :  { %1754 = vmatprep.subr.bf16.mxu1 %v4891_v36  ;;  %v4972_v36 = vld [vmem:[#allocation2 + $0x784] ss:$8 sps:$4 sm:$0xff]  }
 0x1dd   :  { %2246 = vmatpush1.bf16.msra.mxu0 %v4946_v9 }
 0x1de   :  { %2247 = vmatprep.subr.bf16.mxu0 %v4954_v18  ;;  %v5006_v18 = vld [vmem:[#allocation2 + $0x7e0] ss:$8 sps:$4 sm:$0xff]  }
 0x1df   :  { %1755 = vmatpush1.bf16.msra.mxu1 %v4889_v37  ;;  %v4970_v37 = vld [vmem:[#allocation2 + $0x780] ss:$8 sps:$4 sm:$0xff]  }
 0x1e0   :  { %1756 = vmatprep.subr.bf16.mxu1 %v4894_v39  ;;  %v4975_v39 = vld [vmem:[#allocation2 + $0x684] ss:$8 sps:$4 sm:$0xff]  }
 0x1e3   :  { %1757 = vmatpush1.bf16.msra.mxu1 %v4892_v40  ;;  %v4973_v40 = vld [vmem:[#allocation2 + $0x680] ss:$8 sps:$4 sm:$0xff]  }
 0x1e4   :  { %1758 = vmatprep.subr.bf16.mxu1 %v4897_v41  ;;  %v4978_v41 = vld [vmem:[#allocation2 + $0x794] ss:$8 sps:$4 sm:$0xff]  }
 0x1e7   :  { %1759 = vmatpush1.bf16.msra.mxu1 %v4895_v42  ;;  %v4976_v42 = vld [vmem:[#allocation2 + $0x790] ss:$8 sps:$4 sm:$0xff]  }
 0x1e8   :  { %1760 = vmatprep.subr.bf16.mxu1 %v4900_v43  ;;  %v4981_v43 = vld [vmem:[#allocation2 + $0x694] ss:$8 sps:$4 sm:$0xff]  }
 0x1eb   :  { %1761 = vmatpush1.bf16.msra.mxu1 %v4898_v45  ;;  %v4979_v45 = vld [vmem:[#allocation2 + $0x690] ss:$8 sps:$4 sm:$0xff]  }
 0x1ec   :  { %1762 = vmatprep.subr.bf16.mxu1 %v4903_v44  ;;  %v4984_v44 = vld [vmem:[#allocation2 + $0x7a4] ss:$8 sps:$4 sm:$0xff]  }
 0x1ef   :  { %1763 = vmatpush1.bf16.msra.mxu1 %v4901_v48  ;;  %v4982_v48 = vld [vmem:[#allocation2 + $0x7a0] ss:$8 sps:$4 sm:$0xff]  }
 0x1f0   :  { %1764 = vmatprep.subr.bf16.mxu1 %v4906_v49  ;;  %v4987_v49 = vld [vmem:[#allocation2 + $0x6a4] ss:$8 sps:$4 sm:$0xff]  }
 0x1f3   :  { %1765 = vmatpush1.bf16.msra.mxu1 %v4904_v47  ;;  %v4985_v47 = vld [vmem:[#allocation2 + $0x6a0] ss:$8 sps:$4 sm:$0xff]  }
 0x1f4   :  { %1766 = vmatprep.subr.bf16.mxu1 %v4909_v50  ;;  %v4990_v50 = vld [vmem:[#allocation2 + $0x7b4] ss:$8 sps:$4 sm:$0xff]  }
 0x1f7   :  { %1767 = vmatpush1.bf16.msra.mxu1 %v4907_v51  ;;  %v4988_v51 = vld [vmem:[#allocation2 + $0x7b0] ss:$8 sps:$4 sm:$0xff]  }
 0x1f8   :  { %1768 = vmatprep.subr.bf16.mxu1 %v4912_v52  ;;  %v4991_v52 = vld [vmem:[#allocation2 + $0x6b0] ss:$8 sps:$4 sm:$0xff]  }
 0x1fb   :  { %1769 = vmatpush1.bf16.msra.mxu1 %v4910_v53  ;;  %v4993_v53 = vld [vmem:[#allocation2 + $0x6b4] ss:$8 sps:$4 sm:$0xff]  }
 0x1fc   :  { %1770 = vmatprep.subr.bf16.mxu1 %v4915_v54  ;;  %v4996_v54 = vld [vmem:[#allocation2 + $0x7c4] ss:$8 sps:$4 sm:$0xff]  }
 0x1ff   :  { %1771 = vmatpush1.bf16.msra.mxu1 %v4913_v55  ;;  %v4994_v55 = vld [vmem:[#allocation2 + $0x7c0] ss:$8 sps:$4 sm:$0xff]  }
 0x200   :  { %1772 = vmatprep.subr.bf16.mxu1 %v4918_v56  ;;  %v4999_v56 = vld [vmem:[#allocation2 + $0x6c4] ss:$8 sps:$4 sm:$0xff]  }
 0x203   :  { %1773 = vmatpush1.bf16.msra.mxu1 %v4916_v61 }
 0x204   :  { %1774 = vmatprep.subr.bf16.mxu1 %v4921_v3 }
 0x207   :  { %1775 = vmatpush1.bf16.msra.mxu1 %v4919_v10  ;;  %v4997_v10 = vld [vmem:[#allocation2 + $0x6c0] ss:$8 sps:$4 sm:$0xff]  }
 0x208   :  { %2466 = vmatprep.subr.bf16.mxu1 %v4927_v6 }
 0x20a   :  { %1777 = vmatmul.mubr.bf16.vlgmr.msra.gmra.mrb[16].mxu1 %v5504_v19  ;;  %v4952_v19 = vld [vmem:[#allocation2 + $0x750] ss:$8 sps:$4 sm:$0xff]  }
 0x20b   :  { %1786 = vmatprep.mubr.bf16.mxu1 %v5506_v22  ;;  %2467 = vmatpush1.bf16.msra.mxu1 %v4925_v11  ;;  %v4957_v22 = vld [vmem:[#allocation2 + $0x654] ss:$8 sps:$4 sm:$0xff]  }
 0x20c   :  { %2468 = vmatprep.subr.bf16.mxu1 %v4933_v26  ;;  %2248 = vmatpush1.bf16.msra.mxu0 %v4952_v19  ;;  %v5005_v11 = vld [vmem:[#allocation2 + $0x6d4] ss:$8 sps:$4 sm:$0xff]  }
 0x20f   :  { %2469 = vmatpush1.bf16.msra.mxu1 %v4931_v58 }
 0x210   :  { %2470 = vmatprep.subr.bf16.mxu1 %v4939_v63  ;;  %v5000_v63 = vld [vmem:[#allocation2 + $0x7d0] ss:$8 sps:$4 sm:$0xff]  }
 0x212   :  { %1787 = vmatmul.mubr.bf16.gmra.mrb[20].mxu1 %v5508_v24  ;;  %v4960_v24 = vld [vmem:[#allocation2 + $0x764] ss:$8 sps:$4 sm:$0xff]  }
 0x213   :  { %2471 = vmatpush1.bf16.msra.mxu1 %v4937_v0  ;;  %2249 = vmatprep.subr.bf16.mxu0 %v4960_v24  ;;  %v5014_v24 = vld [vmem:[#allocation2 + $0x7f4] ss:$8 sps:$4 sm:$0xff]  }
 0x214   :  { %2472 = vmatprep.subr.bf16.mxu1 %v4945_v17  ;;  %2250 = vmatpush1.bf16.msra.mxu0 %v4958_v25  ;;  %v5008_v17 = vld [vmem:[#allocation2 + $0x7e4] ss:$8 sps:$4 sm:$0xff]  }
 0x215   :  { %2251 = vmatprep.subr.bf16.mxu0 %v4966_v30  ;;  %v5017_v30 = vld [vmem:[#allocation2 + $0x6f4] ss:$8 sps:$4 sm:$0xff]  }
 0x217   :  { %2473 = vmatpush1.bf16.msra.mxu1 %v4943_v7 }
 0x218   :  { %2474 = vmatprep.subr.bf16.mxu1 %v4951_v13  ;;  %2252 = vmatpush1.bf16.msra.mxu0 %v4964_v31 }
 0x219   :  { %2253 = vmatprep.subr.bf16.mxu0 %v4972_v36 }
 0x21b   :  { %2475 = vmatpush1.bf16.msra.mxu1 %v4949_v16 }
 0x21c   :  { %2476 = vmatprep.subr.bf16.mxu1 %v4957_v22  ;;  %2254 = vmatpush1.bf16.msra.mxu0 %v4970_v37 }
 0x21d   :  { %2255 = vmatprep.subr.bf16.mxu0 %v4978_v41  ;;  %v5012_v41 = vld [vmem:[#allocation2 + $0x7f0] ss:$8 sps:$4 sm:$0xff]  }
 0x21f   :  { %2477 = vmatpush1.bf16.msra.mxu1 %v4955_v23  ;;  %v5009_v23 = vld [vmem:[#allocation2 + $0x6e0] ss:$8 sps:$4 sm:$0xff]  }
 0x220   :  { %2478 = vmatprep.subr.bf16.mxu1 %v4963_v27  ;;  %2256 = vmatpush1.bf16.msra.mxu0 %v4976_v42 }
 0x221   :  { %2257 = vmatprep.subr.bf16.mxu0 %v4984_v44  ;;  %v5015_v44 = vld [vmem:[#allocation2 + $0x6f0] ss:$8 sps:$4 sm:$0xff]  }
 0x223   :  { %2479 = vmatpush1.bf16.msra.mxu1 %v4961_v28 }
 0x224   :  { %2480 = vmatprep.subr.bf16.mxu1 %v4969_v32  ;;  %2258 = vmatpush1.bf16.msra.mxu0 %v4982_v48 }
 0x225   :  { %2259 = vmatprep.subr.bf16.mxu0 %v4990_v50 }
 0x227   :  { %2481 = vmatpush1.bf16.msra.mxu1 %v4967_v33 }
 0x228   :  { %2482 = vmatprep.subr.bf16.mxu1 %v4975_v39  ;;  %2260 = vmatpush1.bf16.msra.mxu0 %v4988_v51 }
 0x229   :  { %2261 = vmatprep.subr.bf16.mxu0 %v4996_v54 }
 0x22b   :  { %2483 = vmatpush1.bf16.msra.mxu1 %v4973_v40 }
 0x22c   :  { %2484 = vmatprep.subr.bf16.mxu1 %v4981_v43  ;;  %2262 = vmatpush1.bf16.msra.mxu0 %v4994_v55 }
 0x22d   :  { %2263 = vmatprep.subr.bf16.mxu0 %v5002_v5 }
 0x22f   :  { %2485 = vmatpush1.bf16.msra.mxu1 %v4979_v45 }
 0x230   :  { %2486 = vmatprep.subr.bf16.mxu1 %v4987_v49  ;;  %2264 = vmatpush1.bf16.msra.mxu0 %v5000_v63 }
 0x231   :  { %2265 = vmatprep.subr.bf16.mxu0 %v5008_v17 }
 0x233   :  { %2487 = vmatpush1.bf16.msra.mxu1 %v4985_v47 }
 0x234   :  { %2488 = vmatprep.subr.bf16.mxu1 %v4993_v53  ;;  %2266 = vmatpush1.bf16.msra.mxu0 %v5006_v18 }
 0x235   :  { %2267 = vmatprep.subr.bf16.mxu0 %v5014_v24 }
 0x237   :  { %2489 = vmatpush1.bf16.msra.mxu1 %v4991_v52 }
 0x238   :  { %2490 = vmatprep.subr.bf16.mxu1 %v4999_v56  ;;  %2268 = vmatpush1.bf16.msra.mxu0 %v5012_v41  ;;  %v5020_v56 = vld [vmem:[#allocation2 + $0x804] ss:$8 sps:$4 sm:$0xff]  }
 0x239   :  { %2712 = vmatprep.subr.bf16.mxu0 %v5020_v56 }
 0x23b   :  { %2491 = vmatpush1.bf16.msra.mxu1 %v4997_v10 }
 0x23c   :  { %2492 = vmatprep.subr.bf16.mxu1 %v5005_v11 }
 0x23f   :  { %2493 = vmatpush1.bf16.msra.mxu1 %v5003_v4 }
 0x240   :  { %2494 = vmatprep.subr.bf16.mxu1 %v5011_v8 }
 0x243   :  { %2495 = vmatpush1.bf16.msra.mxu1 %v5009_v23 }
 0x244   :  { %2496 = vmatprep.subr.bf16.mxu1 %v5017_v30 }
 0x247   :  { %2497 = vmatpush1.bf16.msra.mxu1 %v5015_v44 }
 0x29d   :  { %v1303_v61 = vpop.f32.mrb[8].mxu1  ;;  %v1532_v3 = vpop.f32.mrb[16].mxu0 }
 0x29e   :  { %v1305_v62 = vpop.f32.mrb[9].mxu1  ;;  %v1534_v6 = vpop.f32.mrb[17].mxu0  ;;  %v1322_v26 = vrot.slane %v1303_v61, 1 }
 0x29f   :  { %v1307_v12 = vpop.f32.mrb[10].mxu1  ;;  %v1536_v14 = vpop.f32.mrb[18].mxu0  ;;  %v1323_v0 = vrot.slane %v1305_v62, 1 }
 0x2a0   :  { %v1324_v58 = vrot.slane %v1307_v12, 1  ;;  %v1309_v59 = vpop.f32.mrb[11].mxu1  ;;  %v1538_v60 = vpop.f32.mrb[19].mxu0 }
 0x2a1   :  { %v1325_v2 = vrot.slane %v1309_v59, 1 }
 0x2a2   :  { %v1334_v7 = vsel %vm361_vm0, %v1322_v26, %v1324_v58 }
 0x2a3   :  { %v1533_v9 = vadd.f32 %v1532_v3, %v1334_v7  ;;  %v1335_v13 = vsel %vm361_vm0, %v1323_v0, %v1325_v2  ;;  %v5535_v3 = vld [vmem:[#allocation4 + $0x8] sm:$0x77] }
 0x2a4   :  { %v1535_v16 = vadd.f32 %v1534_v6, %v1335_v13  ;;  %v1827_v11 = vrot.slane %v5535_v3, %v5385_v15  ;;  %v1831_v59 = vrot.slane %v5535_v3, %v5391_v21 }
 0x2a5   :  { %v1313_v19 = vpop.f32.mrb[12].mxu1  ;;  %v1542_v22 = vpop.f32.mrb[20].mxu0 }
 0x2a6   :  { %v1326_v25 = vrot.slane %v1313_v19, 1  ;;  %v1315_v27 = vpop.f32.mrb[13].mxu1  ;;  %v1544_v28 = vpop.f32.mrb[21].mxu0  ;;  %v1841_v17 = vrot.slane %v1831_v59, %v5385_v15 }
 0x2a7   :  { %v1327_v31 = vrot.slane %v1315_v27, 1  ;;  %v1317_v32 = vpop.f32.mrb[14].mxu1  ;;  %v1546_v33 = vpop.f32.mrb[22].mxu0 }
 0x2a8   :  { %v1332_v36 = vsel %vm361_vm0, %v1324_v58, %v1326_v25  ;;  %v1328_v37 = vrot.slane %v1317_v32, 1  ;;  %v1319_v39 = vpop.f32.mrb[15].mxu1  ;;  %v1548_v40 = vpop.f32.mrb[23].mxu0 }
 0x2a9   :  { %v1537_v42 = vadd.f32 %v1536_v14, %v1332_v36  ;;  %v1333_v43 = vsel %vm361_vm0, %v1325_v2, %v1327_v31  ;;  %v1329_v45 = vrot.slane %v1319_v39, 1 }
 0x2aa   :  { %v1539_v48 = vadd.f32 %v1538_v60, %v1333_v43  ;;  %v1330_v49 = vsel %vm361_vm0, %v1326_v25, %v1328_v37  ;;  %v1336_v47 = vsel %vm361_vm0, %v1328_v37, %v1322_v26 }
 0x2ab   :  { %v1543_v50 = vadd.f32 %v1542_v22, %v1330_v49  ;;  %v1547_v51 = vadd.f32 %v1546_v33, %v1336_v47  ;;  %v1331_v52 = vsel %vm361_vm0, %v1327_v31, %v1329_v45  ;;  %v1337_v53 = vsel %vm361_vm0, %v1329_v45, %v1323_v0 }
 0x2ac   :  { %v1545_v54 = vadd.f32 %v1544_v28, %v1331_v52  ;;  %v1549_v55 = vadd.f32 %v1548_v40, %v1337_v53  ;;  %v1837_v0 = vrot.slane %v1827_v11, %v5385_v15 }
 0x2dd   :  { %v1778_v61 = vpop.f32.mrb[16].mxu1 }
 0x2de   :  { %v1780_v10 = vpop.f32.mrb[17].mxu1  ;;  %v1797_v62 = vrot.slane %v1778_v61, 2 }
 0x2df   :  { %v1782_v5 = vpop.f32.mrb[18].mxu1  ;;  %v1798_v14 = vrot.slane %v1780_v10, 2 }
 0x2e0   :  { %v1799_v6 = vrot.slane %v1782_v5, 2  ;;  %v1784_v12 = vpop.f32.mrb[19].mxu1 }
 0x2e1   :  { %v1800_v26 = vrot.slane %v1784_v12, 2 }
 0x2e2   :  { %v1809_v58 = vsel %vm837_vm1, %v1797_v62, %v1799_v6 }
 0x2e3   :  { %v1813_v60 = vadd.f32 %v1809_v58, %v1533_v9  ;;  %v1810_v63 = vsel %vm837_vm1, %v1798_v14, %v1800_v26  ;;  %v4427_v9 = vsel %vm1859_vm4, 1.0, %v5286_v46 }
 0x2e4   :  { %v1814_v2 = vadd.f32 %v1810_v63, %v1535_v16 }
 0x2e5   :  { %v1788_v4 = vpop.f32.mrb[20].mxu1  ;;  %v1842_v19 = vadd.f32 %v1837_v0, %v1813_v60 }
 0x2e6   :  { %v1801_v7 = vrot.slane %v1788_v4, 2  ;;  %v1790_v8 = vpop.f32.mrb[21].mxu1  ;;  %v1843_v28 = vadd.f32 %v1841_v17, %v1814_v2 }
 0x2e7   :  { %v1802_v13 = vrot.slane %v1790_v8, 2  ;;  %v1792_v18 = vpop.f32.mrb[22].mxu1  ;;  %v5562_v40 = vmax.f32 %v1842_v19, 0.0 }
 0x2e8   :  { %v1807_v22 = vsel %vm837_vm1, %v1799_v6, %v1801_v7  ;;  %v1803_v23 = vrot.slane %v1792_v18, 2  ;;  %v1794_v24 = vpop.f32.mrb[23].mxu1  ;;  %v5571_v47 = vmax.f32 %v1843_v28, 0.0 }
 0x2e9   :  { %v1815_v25 = vadd.f32 %v1807_v22, %v1537_v42  ;;  %v1808_v16 = vsel %vm837_vm1, %v1800_v26, %v1802_v13  ;;  %v1804_v27 = vrot.slane %v1794_v24, 2  ;;  %v1898_v5 = vmul.f32 %v5562_v40, %v5562_v40 }
 0x2ea   :  { %v1816_v30 = vadd.f32 %v1808_v16, %v1539_v48  ;;  %v1805_v31 = vsel %vm837_vm1, %v1801_v7, %v1803_v23  ;;  %v1811_v32 = vsel %vm837_vm1, %v1803_v23, %v1797_v62  ;;  %v1899_v12 = vmul.f32 %v5571_v47, %v5571_v47 }
 0x2eb   :  { %v5558_v33 = vadd.f32 %v1837_v0, %v1815_v25  ;;  %v1817_v36 = vadd.f32 %v1805_v31, %v1543_v50  ;;  %v1819_v37 = vadd.f32 %v1811_v32, %v1547_v51  ;;  %v1806_v39 = vsel %vm837_vm1, %v1802_v13, %v1804_v27 }
 0x2ec   :  { %v5564_v41 = vadd.f32 %v1841_v17, %v1816_v30  ;;  %v1812_v42 = vsel %vm837_vm1, %v1804_v27, %v1798_v14  ;;  %v1818_v43 = vadd.f32 %v1806_v39, %v1545_v54  ;;  %v4428_v51 = vsel %vm1861_vm5, 1.0, %v5286_v46 }
 0x2ed   :  { %v1852_v45 = vmax.f32 %v5558_v33, 0.0  ;;  %v1846_v44 = vadd.f32 %v1837_v0, %v1817_v36  ;;  %v5569_v48 = vadd.f32 %v1837_v0, %v1819_v37  ;;  %v1820_v49 = vadd.f32 %v1812_v42, %v1549_v55 }
 0x2ee   :  { %v1853_v50 = vmax.f32 %v5564_v41, 0.0  ;;  %v1847_v52 = vadd.f32 %v1841_v17, %v1818_v43 }
 0x2ef   :  { %v1872_v53 = vmul.f32 %v4427_v9, %v1852_v45  ;;  %v5579_v56 = vmax.f32 %v1846_v44, 0.0  ;;  %v1856_v54 = vmax.f32 %v5569_v48, 0.0  ;;  %v5582_v61 = vadd.f32 %v1841_v17, %v1820_v49 }
 0x2f0   :  { %v1873_v55 = vmul.f32 %v4427_v9, %v1853_v50  ;;  %v5586_v10 = vmax.f32 %v1847_v52, 0.0 }
 0x2f1   :  { %v1878_v62 = vadd.f32 %v1872_v53, %v5562_v40  ;;  %v1900_v6 = vmul.f32 %v1872_v53, %v1872_v53  ;;  %v1876_v11 = vmul.f32 %v4428_v51, %v1856_v54  ;;  %v1857_v58 = vmax.f32 %v5582_v61, 0.0 }
 0x2f2   :  { %v1887_v14 = vadd.f32 %v1873_v55, %v5571_v47  ;;  %v1901_v26 = vmul.f32 %v1873_v55, %v1873_v55  ;;  %v1902_v63 = vmul.f32 %v5579_v56, %v5579_v56  ;;  %v1903_v17 = vmul.f32 %v5586_v10, %v5586_v10 }
 0x2f3   :  { %v1906_v59 = vadd.f32 %v1900_v6, %v1898_v5  ;;  %v1879_v60 = vadd.f32 %v1878_v62, %v5579_v56  ;;  %v1877_v2 = vmul.f32 %v4428_v51, %v1857_v58  ;;  %v1904_v8 = vmul.f32 %v1876_v11, %v1876_v11 }
 0x2f4   :  { %v1915_v0 = vadd.f32 %v1901_v26, %v1899_v12  ;;  %v1888_v4 = vadd.f32 %v1887_v14, %v5586_v10 }
 0x2f5   :  { %v1880_v7 = vadd.f32 %v1879_v60, %v1876_v11  ;;  %v1907_v13 = vadd.f32 %v1906_v59, %v1902_v63  ;;  %v1905_v19 = vmul.f32 %v1877_v2, %v1877_v2 }
 0x2f6   :  { %v1889_v18 = vadd.f32 %v1888_v4, %v1877_v2  ;;  %v1916_v22 = vadd.f32 %v1915_v0, %v1903_v17 }
 0x2f7   :  { %v1881_v9 = vrot.slane %v1880_v7, 4  ;;  %v1908_v23 = vadd.f32 %v1907_v13, %v1904_v8 }
 0x2f8   :  { %v1890_v24 = vrot.slane %v1889_v18, 4  ;;  %v1917_v25 = vadd.f32 %v1916_v22, %v1905_v19  ;;  %v1943_v19 = vrot.slane %v5535_v3, %v5473_v35 }
 0x2f9   :  { %v1882_v16 = vadd.f32 %v1881_v9, %v1880_v7  ;;  %v1909_v27 = vrot.slane %v1908_v23, 4 }
 0x2fa   :  { %v1891_v28 = vadd.f32 %v1890_v24, %v1889_v18  ;;  %v1918_v30 = vrot.slane %v1917_v25, 4  ;;  %v1939_v18 = vrot.slane %v5535_v3, %v5470_v34 }
 0x2fb   :  { %v1883_v31 = vrot.slane %v1882_v16, 2  ;;  %v1910_v32 = vadd.f32 %v1909_v27, %v1908_v23 }
 0x2fc   :  { %v1892_v36 = vrot.slane %v1891_v28, 2  ;;  %v1919_v37 = vadd.f32 %v1918_v30, %v1917_v25 }
 0x2fd   :  { %v1884_v39 = vadd.f32 %v1883_v31, %v1882_v16  ;;  %v1911_v42 = vrot.slane %v1910_v32, 2 }
 0x2fe   :  { %v1893_v43 = vadd.f32 %v1892_v36, %v1891_v28  ;;  %v1920_v44 = vrot.slane %v1919_v37, 2 }
 0x2ff   :  { %v1885_v49 = vrot.slane %v1884_v39, 1  ;;  %v1912_v51 = vadd.f32 %v1911_v42, %v1910_v32 }
 0x300   :  { %v1894_v52 = vrot.slane %v1893_v43, 1  ;;  %v1921_v53 = vadd.f32 %v1920_v44, %v1919_v37 }
 0x301   :  { %v1886_v55 = vadd.f32 %v1885_v49, %v1884_v39  ;;  %v1913_v5 = vrot.slane %v1912_v51, 1 }
 0x302   :  { %v1895_v62 = vadd.f32 %v1894_v52, %v1893_v43  ;;  %v1922_v6 = vrot.slane %v1921_v53, 1 }
 0x303   :  { %v1896_v11 = vmul.f32 0.041666668, %v1886_v55  ;;  %v1914_v12 = vadd.f32 %v1913_v5, %v1912_v51 }
 0x304   :  { %v1897_v14 = vmul.f32 0.041666668, %v1895_v62  ;;  %v1923_v26 = vadd.f32 %v1922_v6, %v1921_v53 }
 0x305   :  { %v1924_v59 = vmul.f32 0.041666668, %v1914_v12  ;;  %v1926_v60 = vmul.f32 %v1896_v11, %v1896_v11 }
 0x306   :  { %v1925_v63 = vmul.f32 0.041666668, %v1923_v26  ;;  %v1927_v0 = vmul.f32 %v1897_v14, %v1897_v14 }
 0x307   :  { %v1928_v2 = vsub.f32 %v1924_v59, %v1926_v60  ;;  %v5023_v60 = vld [vmem:[#allocation2 + $0x814] ss:$8 sps:$4 sm:$0xff]  }
 0x308   :  { %v1929_v4 = vsub.f32 %v1925_v63, %v1927_v0  ;;  %v5021_v0 = vld [vmem:[#allocation2 + $0x810] ss:$8 sps:$4 sm:$0xff]  }
 0x309   :  { %v1930_v17 = vmax.f32 %v1928_v2, 0.0  ;;  %v5026_v2 = vld [vmem:[#allocation2 + $0x824] ss:$8 sps:$4 sm:$0xff]  }
 0x30a   :  { %v1931_v7 = vmax.f32 %v1929_v4, 0.0  ;;  %v5024_v4 = vld [vmem:[#allocation2 + $0x820] ss:$8 sps:$4 sm:$0xff]  }
 0x30b   :  { %v1932_v8 = vadd.f32 1e-05, %v1930_v17  ;;  %v5029_v17 = vld [vmem:[#allocation2 + $0x834] ss:$8 sps:$4 sm:$0xff]  }
 0x30c   :  { %v1933_v13 = vadd.f32 1e-05, %v1931_v7  ;;  %v5027_v7 = vld [vmem:[#allocation2 + $0x830] ss:$8 sps:$4 sm:$0xff]  }
 0x30d   :  { %5214 = vrsqrt.f32 %v1932_v8  ;;  %v5032_v8 = vld [vmem:[#allocation2 + $0x844] ss:$8 sps:$4 sm:$0xff]  }
 0x30e   :  { %5216 = vrsqrt.f32 %v1933_v13  ;;  %v5030_v13 = vld [vmem:[#allocation2 + $0x840] ss:$8 sps:$4 sm:$0xff]  }
 0x317   :  { %v5215_v22 = vpop.eup %5214 }
 0x318   :  { %v5217_v9 = vpop.eup %5216  ;;  %v1946_v23 = vmul.f32 %v5215_v22, %v1939_v18  ;;  %v5035_v18 = vld [vmem:[#allocation2 + $0x854] ss:$8 sps:$4 sm:$0xff]   ;;  %v5038_v22 = vld [vmem:[#allocation2 + $0x864] ss:$8 sps:$4 sm:$0xff]  }
 0x319   :  { %v1947_v24 = vmul.f32 %v5217_v9, %v1943_v19  ;;  %v5033_v19 = vld [vmem:[#allocation2 + $0x850] ss:$8 sps:$4 sm:$0xff]   ;;  %v5036_v9 = vld [vmem:[#allocation2 + $0x860] ss:$8 sps:$4 sm:$0xff]  }
 0x31a   :  { %v1948_v25 = vmul.f32 %v1946_v23, %v1896_v11  ;;  %v1959_v16 = vrot.slane %v1946_v23, %v5385_v15  ;;  %v5041_v23 = vld [vmem:[#allocation2 + $0x874] ss:$8 sps:$4 sm:$0xff]  }
 0x31b   :  { %v1949_v27 = vmul.f32 %v1947_v24, %v1897_v14  ;;  %v1963_v28 = vrot.slane %v1947_v24, %v5385_v15  ;;  %v5018_v14 = vld [vmem:[#allocation2 + $0x800] ss:$8 sps:$4 sm:$0xff]   ;;  %v5039_v24 = vld [vmem:[#allocation2 + $0x870] ss:$8 sps:$4 sm:$0xff]  }
 0x31c   :  { %v1964_v30 = vmul.f32 %v1959_v16, %v5562_v40  ;;  %v1966_v31 = vmul.f32 %v1959_v16, %v1852_v45  ;;  %v1968_v32 = vmul.f32 %v1959_v16, %v5579_v56  ;;  %v1970_v36 = vmul.f32 %v1959_v16, %v1856_v54  ;;  %v5042_v16 = vld [vmem:[#allocation2 + $0x880] ss:$8 sps:$4 sm:$0xff]  }
 0x31d   :  { %v1952_v37 = vcombine.low %v1948_v25, %v1949_v27  ;;  %v1965_v39 = vmul.f32 %v1963_v28, %v5571_v47  ;;  %v1967_v42 = vmul.f32 %v1963_v28, %v1853_v50  ;;  %v1969_v43 = vmul.f32 %v1963_v28, %v5586_v10  ;;  %v5044_v25 = vld [vmem:[#allocation2 + $0x884] ss:$8 sps:$4 sm:$0xff]   ;;  %v5047_v27 = vld [vmem:[#allocation2 + $0x894] ss:$8 sps:$4 sm:$0xff]  }
 0x31e   :  { %v1971_v44 = vmul.f32 %v1963_v28, %v1857_v58  ;;  %v5045_v28 = vld [vmem:[#allocation2 + $0x890] ss:$8 sps:$4 sm:$0xff]  }
 0x31f   :  { %v1953_v40 = vrot.slane %v1952_v37, 6  ;;  %v5056_v37 = vld [vmem:[#allocation2 + $0x8c4] ss:$8 sps:$4 sm:$0xff]  }
 0x321   :  { %v1955_v33 = vsub.f32 %v5535_v3, %v1953_v40  ;;  %v5060_v40 = vld [vmem:[#allocation2 + $0x8e0] ss:$8 sps:$4 sm:$0xff]  }
 0x323   :  { %v1976_v45 = vrot.slane %v1955_v33, %v5494_v57  ;;  %v1980_v56 = vrot.slane %v1955_v33, %v5497_v1  ;;  %v5065_v33 = vld [vmem:[#allocation2 + $0x8f4] ss:$8 sps:$4 sm:$0xff]  }
 0x325   :  { %v1990_v48 = vrot.slane %v1980_v56, %v5494_v57  ;;  %v1986_v54 = vrot.slane %v1976_v45, %v5494_v57  ;;  %v5063_v45 = vld [vmem:[#allocation2 + $0x8f0] ss:$8 sps:$4 sm:$0xff]   ;;  %v5068_v56 = vld [vmem:[#allocation2 + $0x904] ss:$8 sps:$4 sm:$0xff]  }
 0x326   :  { %3193 = vmatprep.subr.bf16.mxu1 %v5068_v56 }
 0x327   :  { %v1992_v47 = vadd.f32 %v1990_v48, %v1965_v39  ;;  %v1994_v49 = vadd.f32 %v1990_v48, %v1967_v42  ;;  %v1991_v41 = vadd.f32 %v1986_v54, %v1964_v30  ;;  %v1993_v50 = vadd.f32 %v1986_v54, %v1966_v31  ;;  %v5050_v30 = vld [vmem:[#allocation2 + $0x8a4] ss:$8 sps:$4 sm:$0xff]   ;;  %v5048_v31 = vld [vmem:[#allocation2 + $0x8a0] ss:$8 sps:$4 sm:$0xff]   ;;  %v5059_v42 = vld [vmem:[#allocation2 + $0x8d4] ss:$8 sps:$4 sm:$0xff]  }
 0x328   :  { %v1996_v51 = vadd.f32 %v1990_v48, %v1969_v43  ;;  %v1998_v10 = vadd.f32 %v1990_v48, %v1971_v44  ;;  %v1995_v52 = vadd.f32 %v1986_v54, %v1968_v32  ;;  %v1997_v61 = vadd.f32 %v1986_v54, %v1970_v36  ;;  %v5053_v32 = vld [vmem:[#allocation2 + $0x8b4] ss:$8 sps:$4 sm:$0xff]   ;;  %v5051_v36 = vld [vmem:[#allocation2 + $0x8b0] ss:$8 sps:$4 sm:$0xff]   ;;  %v5054_v39 = vld [vmem:[#allocation2 + $0x8c0] ss:$8 sps:$4 sm:$0xff]  }
 0x329   :  { %v2000_v58 = vmax.f32 %v1992_v47, 0.0  ;;  %v2002_v53 = vmax.f32 %v1994_v49, 0.0  ;;  %v1999_v55 = vmax.f32 %v1991_v41, 0.0  ;;  %v2001_v3 = vmax.f32 %v1993_v50, 0.0  ;;  %v5057_v43 = vld [vmem:[#allocation2 + $0x8d0] ss:$8 sps:$4 sm:$0xff]  }
 0x32a   :  { %v2004_v5 = vmax.f32 %v1996_v51, 0.0  ;;  %v2006_v62 = vmax.f32 %v1998_v10, 0.0  ;;  %v2003_v6 = vmax.f32 %v1995_v52, 0.0  ;;  %v2005_v11 = vmax.f32 %v1997_v61, 0.0  ;;  %v5062_v44 = vld [vmem:[#allocation2 + $0x8e4] ss:$8 sps:$4 sm:$0xff]  }
 0x32b   :  { %v2008_v12 = vpack.c.bf16 %v2002_v53, %v2000_v58  ;;  %v5628_v26 = vpack.c.bf16 %v2001_v3, %v1999_v55  ;;  %v5066_v48 = vld [vmem:[#allocation2 + $0x900] ss:$8 sps:$4 sm:$0xff]   ;;  %v5071_v54 = vld [vmem:[#allocation2 + $0x914] ss:$8 sps:$4 sm:$0xff]   ;;  %v5069_v47 = vld [vmem:[#allocation2 + $0x910] ss:$8 sps:$4 sm:$0xff]  }
 0x32c   :  { %v5630_v59 = vpack.c.bf16 %v2006_v62, %v2004_v5  ;;  %v5632_v63 = vpack.c.bf16 %v2005_v11, %v2003_v6  ;;  %v5074_v49 = vld [vmem:[#allocation2 + $0x924] ss:$8 sps:$4 sm:$0xff]   ;;  %v5072_v41 = vld [vmem:[#allocation2 + $0x920] ss:$8 sps:$4 sm:$0xff]   ;;  %v5077_v50 = vld [vmem:[#allocation2 + $0x934] ss:$8 sps:$4 sm:$0xff]  }
 0x32d   :  { %2269 = vmatprep.mubr.bf16.mxu0 %v2008_v12  ;;  %2498 = vmatprep.mubr.bf16.mxu1 %v2008_v12  ;;  %v5075_v51 = vld [vmem:[#allocation2 + $0x930] ss:$8 sps:$4 sm:$0xff]   ;;  %v5080_v10 = vld [vmem:[#allocation2 + $0x944] ss:$8 sps:$4 sm:$0xff]   ;;  %v5078_v52 = vld [vmem:[#allocation2 + $0x940] ss:$8 sps:$4 sm:$0xff]  }
 0x32e   :  { %2270 = vmatmul.mubr.bf16.vlgmr.msra.gmra.mrb[24].mxu0 %v5628_v26  ;;  %2499 = vmatmul.mubr.bf16.vlgmr.msra.gmra.mrb[24].mxu1 %v5628_v26  ;;  %v5083_v61 = vld [vmem:[#allocation2 + $0x954] ss:$8 sps:$4 sm:$0xff]   ;;  %v5081_v58 = vld [vmem:[#allocation2 + $0x950] ss:$8 sps:$4 sm:$0xff]   ;;  %v5086_v53 = vld [vmem:[#allocation2 + $0x964] ss:$8 sps:$4 sm:$0xff]  }
 0x32f   :  { %2713 = vmatpush1.bf16.msra.mxu0 %v5018_v14  ;;  %2279 = vmatprep.mubr.bf16.mxu0 %v5630_v59  ;;  %v5084_v55 = vld [vmem:[#allocation2 + $0x960] ss:$8 sps:$4 sm:$0xff]   ;;  %v5089_v3 = vld [vmem:[#allocation2 + $0x974] ss:$8 sps:$4 sm:$0xff]   ;;  %v5087_v5 = vld [vmem:[#allocation2 + $0x970] ss:$8 sps:$4 sm:$0xff]  }
 0x330   :  { %2508 = vmatprep.mubr.bf16.mxu1 %v5630_v59  ;;  %2714 = vmatprep.subr.bf16.mxu0 %v5023_v60  ;;  %v5092_v62 = vld [vmem:[#allocation2 + $0x984] ss:$8 sps:$4 sm:$0xff]   ;;  %v5090_v6 = vld [vmem:[#allocation2 + $0x980] ss:$8 sps:$4 sm:$0xff]   ;;  %v5095_v11 = vld [vmem:[#allocation2 + $0x994] ss:$8 sps:$4 sm:$0xff]  }
 0x331   :  { %3194 = vmatpush1.bf16.msra.mxu1 %v5066_v48  ;;  %v5098_v14 = vld [vmem:[#allocation2 + $0x9a4] ss:$8 sps:$4 sm:$0xff]   ;;  %v5101_v60 = vld [vmem:[#allocation2 + $0x9b4] ss:$8 sps:$4 sm:$0xff]  }
 0x332   :  { %3195 = vmatprep.subr.bf16.mxu1 %v5071_v54 }
 0x333   :  { %2715 = vmatpush1.bf16.msra.mxu0 %v5021_v0 }
 0x334   :  { %2716 = vmatprep.subr.bf16.mxu0 %v5026_v2 }
 0x335   :  { %3196 = vmatpush1.bf16.msra.mxu1 %v5069_v47 }
 0x336   :  { %2280 = vmatmul.mubr.bf16.gmra.mrb[28].mxu0 %v5632_v63  ;;  %2509 = vmatmul.mubr.bf16.gmra.mrb[28].mxu1 %v5632_v63 }
 0x337   :  { %2717 = vmatpush1.bf16.msra.mxu0 %v5024_v4  ;;  %2744 = vmatprep.mubr.bf16.mxu0 %v2008_v12  ;;  %v5093_v12 = vld [vmem:[#allocation2 + $0x990] ss:$8 sps:$4 sm:$0xff]   ;;  %v5102_v4 = vld [vmem:[#allocation2 + $0x9c0] ss:$8 sps:$4 sm:$0xff]  }
 0x338   :  { %2718 = vmatprep.subr.bf16.mxu0 %v5029_v17  ;;  %3197 = vmatprep.subr.bf16.mxu1 %v5074_v49 }
 0x339   :  { %3198 = vmatpush1.bf16.msra.mxu1 %v5072_v41 }
 0x33a   :  { %3199 = vmatprep.subr.bf16.mxu1 %v5077_v50 }
 0x33b   :  { %2719 = vmatpush1.bf16.msra.mxu0 %v5027_v7 }
 0x33c   :  { %2720 = vmatprep.subr.bf16.mxu0 %v5032_v8  ;;  %v5107_v8 = vld [vmem:[#allocation2 + $0x9d4] ss:$8 sps:$4 sm:$0xff]  }
 0x33d   :  { %3200 = vmatpush1.bf16.msra.mxu1 %v5075_v51 }
 0x33e   :  { %3201 = vmatprep.subr.bf16.mxu1 %v5080_v10  ;;  %v5111_v10 = vld [vmem:[#allocation2 + $0x9f0] ss:$8 sps:$4 sm:$0xff]  }
 0x33f   :  { %2721 = vmatpush1.bf16.msra.mxu0 %v5030_v13 }
 0x340   :  { %2722 = vmatprep.subr.bf16.mxu0 %v5035_v18 }
 0x341   :  { %3202 = vmatpush1.bf16.msra.mxu1 %v5078_v52 }
 0x342   :  { %3203 = vmatprep.subr.bf16.mxu1 %v5083_v61 }
 0x343   :  { %2723 = vmatpush1.bf16.msra.mxu0 %v5033_v19 }
 0x344   :  { %2724 = vmatprep.subr.bf16.mxu0 %v5038_v22 }
 0x345   :  { %3204 = vmatpush1.bf16.msra.mxu1 %v5081_v58 }
 0x346   :  { %3205 = vmatprep.subr.bf16.mxu1 %v5086_v53 }
 0x347   :  { %2725 = vmatpush1.bf16.msra.mxu0 %v5036_v9 }
 0x348   :  { %2726 = vmatprep.subr.bf16.mxu0 %v5041_v23 }
 0x349   :  { %3206 = vmatpush1.bf16.msra.mxu1 %v5084_v55 }
 0x34a   :  { %3207 = vmatprep.subr.bf16.mxu1 %v5089_v3 }
 0x34b   :  { %2727 = vmatpush1.bf16.msra.mxu0 %v5039_v24 }
 0x34c   :  { %2728 = vmatprep.subr.bf16.mxu0 %v5044_v25 }
 0x34d   :  { %3208 = vmatpush1.bf16.msra.mxu1 %v5087_v5 }
 0x34e   :  { %3209 = vmatprep.subr.bf16.mxu1 %v5092_v62 }
 0x34f   :  { %2729 = vmatpush1.bf16.msra.mxu0 %v5042_v16  ;;  %v5105_v16 = vld [vmem:[#allocation2 + $0x9d0] ss:$8 sps:$4 sm:$0xff]  }
 0x350   :  { %2730 = vmatprep.subr.bf16.mxu0 %v5047_v27 }
 0x351   :  { %3210 = vmatpush1.bf16.msra.mxu1 %v5090_v6 }
 0x352   :  { %3211 = vmatprep.subr.bf16.mxu1 %v5095_v11 }
 0x353   :  { %2731 = vmatpush1.bf16.msra.mxu0 %v5045_v28  ;;  %v5110_v28 = vld [vmem:[#allocation2 + $0x9e4] ss:$8 sps:$4 sm:$0xff]  }
 0x354   :  { %2732 = vmatprep.subr.bf16.mxu0 %v5050_v30 }
 0x355   :  { %3212 = vmatpush1.bf16.msra.mxu1 %v5093_v12  ;;  %v5659_v12 = vld [vmem:[#allocation4 + $0x10] sm:$0x77] }
 0x356   :  { %3213 = vmatprep.subr.bf16.mxu1 %v5098_v14 }
 0x357   :  { %2733 = vmatpush1.bf16.msra.mxu0 %v5048_v31 }
 0x358   :  { %2734 = vmatprep.subr.bf16.mxu0 %v5053_v32 }
 0x35b   :  { %2735 = vmatpush1.bf16.msra.mxu0 %v5051_v36 }
 0x35c   :  { %2736 = vmatprep.subr.bf16.mxu0 %v5056_v37 }
 0x35f   :  { %2737 = vmatpush1.bf16.msra.mxu0 %v5054_v39  ;;  %v5108_v39 = vld [vmem:[#allocation2 + $0x9e0] ss:$8 sps:$4 sm:$0xff]  }
 0x360   :  { %2738 = vmatprep.subr.bf16.mxu0 %v5059_v42 }
 0x363   :  { %2739 = vmatpush1.bf16.msra.mxu0 %v5057_v43 }
 0x364   :  { %2740 = vmatprep.subr.bf16.mxu0 %v5062_v44 }
 0x367   :  { %2741 = vmatpush1.bf16.msra.mxu0 %v5060_v40  ;;  %v5113_v40 = vld [vmem:[#allocation2 + $0x9f4] ss:$8 sps:$4 sm:$0xff]  }
 0x368   :  { %2742 = vmatprep.subr.bf16.mxu0 %v5065_v33 }
 0x36b   :  { %2743 = vmatpush1.bf16.msra.mxu0 %v5063_v45 }
 0x36e   :  { %2745 = vmatmul.mubr.bf16.vlgmr.msra.gmra.mrb[32].mxu0 %v5628_v26  ;;  %v5096_v26 = vld [vmem:[#allocation2 + $0x9a0] ss:$8 sps:$4 sm:$0xff]  }
 0x36f   :  { %2754 = vmatprep.mubr.bf16.mxu0 %v5630_v59  ;;  %3214 = vmatpush1.bf16.msra.mxu1 %v5096_v26  ;;  %v5099_v59 = vld [vmem:[#allocation2 + $0x9b0] ss:$8 sps:$4 sm:$0xff]  }
 0x370   :  { %3215 = vmatprep.subr.bf16.mxu1 %v5101_v60 }
 0x373   :  { %3216 = vmatpush1.bf16.msra.mxu1 %v5099_v59 }
 0x376   :  { %2755 = vmatmul.mubr.bf16.gmra.mrb[36].mxu0 %v5632_v63  ;;  %v5104_v63 = vld [vmem:[#allocation2 + $0x9c4] ss:$8 sps:$4 sm:$0xff]  }
 0x377   :  { %3217 = vmatprep.subr.bf16.mxu1 %v5104_v63  ;;  %v2795_v63 = vrot.slane %v5659_v12, %v5385_v15 }
 0x378   :  { %3218 = vmatpush1.bf16.msra.mxu1 %v5102_v4 }
 0x379   :  { %3219 = vmatprep.subr.bf16.mxu1 %v5107_v8 }
 0x37c   :  { %3220 = vmatpush1.bf16.msra.mxu1 %v5105_v16 }
 0x37d   :  { %3221 = vmatprep.subr.bf16.mxu1 %v5110_v28 }
 0x380   :  { %3222 = vmatpush1.bf16.msra.mxu1 %v5108_v39 }
 0x381   :  { %3223 = vmatprep.subr.bf16.mxu1 %v5113_v40 }
 0x384   :  { %3224 = vmatpush1.bf16.msra.mxu1 %v5111_v10 }
 0x401   :  { %v2271_v0 = vpop.f32.mrb[24].mxu0  ;;  %v2500_v2 = vpop.f32.mrb[24].mxu1 }
 0x402   :  { %v2273_v17 = vpop.f32.mrb[25].mxu0  ;;  %v2502_v7 = vpop.f32.mrb[25].mxu1  ;;  %v2290_v19 = vrot.slane %v2271_v0, 1 }
 0x403   :  { %v2275_v13 = vpop.f32.mrb[26].mxu0  ;;  %v2504_v18 = vpop.f32.mrb[26].mxu1  ;;  %v2291_v24 = vrot.slane %v2273_v17, 1 }
 0x404   :  { %v2292_v22 = vrot.slane %v2275_v13, 1  ;;  %v2277_v9 = vpop.f32.mrb[27].mxu0  ;;  %v2506_v23 = vpop.f32.mrb[27].mxu1 }
 0x405   :  { %v2293_v25 = vrot.slane %v2277_v9, 1 }
 0x406   :  { %v2302_v27 = vsel %vm361_vm0, %v2290_v19, %v2292_v22 }
 0x407   :  { %v2501_v30 = vadd.f32 %v2500_v2, %v2302_v27  ;;  %v2303_v31 = vsel %vm361_vm0, %v2291_v24, %v2293_v25  ;;  %v5673_v27 = vsel %vm2827_vm6, 1.0, %v5286_v46 }
 0x408   :  { %v2503_v32 = vadd.f32 %v2502_v7, %v2303_v31  ;;  %v2799_v7 = vrot.slane %v5659_v12, %v5391_v21 }
 0x409   :  { %v2281_v36 = vpop.f32.mrb[28].mxu0  ;;  %v2510_v37 = vpop.f32.mrb[28].mxu1 }
 0x40a   :  { %v2294_v42 = vrot.slane %v2281_v36, 1  ;;  %v2283_v43 = vpop.f32.mrb[29].mxu0  ;;  %v2512_v44 = vpop.f32.mrb[29].mxu1  ;;  %v2809_v9 = vrot.slane %v2799_v7, %v5385_v15 }
 0x40b   :  { %v2295_v33 = vrot.slane %v2283_v43, 1  ;;  %v2285_v45 = vpop.f32.mrb[30].mxu0  ;;  %v2514_v56 = vpop.f32.mrb[30].mxu1 }
 0x40c   :  { %v2300_v48 = vsel %vm361_vm0, %v2292_v22, %v2294_v42  ;;  %v2296_v54 = vrot.slane %v2285_v45, 1  ;;  %v2287_v47 = vpop.f32.mrb[31].mxu0  ;;  %v2516_v49 = vpop.f32.mrb[31].mxu1 }
 0x40d   :  { %v2505_v41 = vadd.f32 %v2504_v18, %v2300_v48  ;;  %v2301_v50 = vsel %vm361_vm0, %v2293_v25, %v2295_v33  ;;  %v2297_v51 = vrot.slane %v2287_v47, 1  ;;  %v2805_v18 = vrot.slane %v2795_v63, %v5385_v15 }
 0x40e   :  { %v2507_v52 = vadd.f32 %v2506_v23, %v2301_v50  ;;  %v2298_v61 = vsel %vm361_vm0, %v2294_v42, %v2296_v54  ;;  %v2304_v58 = vsel %vm361_vm0, %v2296_v54, %v2290_v19 }
 0x40f   :  { %v2511_v53 = vadd.f32 %v2510_v37, %v2298_v61  ;;  %v2515_v55 = vadd.f32 %v2514_v56, %v2304_v58  ;;  %v2299_v3 = vsel %vm361_vm0, %v2295_v33, %v2297_v51  ;;  %v2305_v5 = vsel %vm361_vm0, %v2297_v51, %v2291_v24 }
 0x410   :  { %v2513_v62 = vadd.f32 %v2512_v44, %v2299_v3  ;;  %v2517_v6 = vadd.f32 %v2516_v49, %v2305_v5 }
 0x441   :  { %v2746_v11 = vpop.f32.mrb[32].mxu0 }
 0x442   :  { %v2748_v14 = vpop.f32.mrb[33].mxu0  ;;  %v2765_v59 = vrot.slane %v2746_v11, 2 }
 0x443   :  { %v2750_v26 = vpop.f32.mrb[34].mxu0  ;;  %v2766_v2 = vrot.slane %v2748_v14, 2 }
 0x444   :  { %v2767_v60 = vrot.slane %v2750_v26, 2  ;;  %v2752_v0 = vpop.f32.mrb[35].mxu0 }
 0x445   :  { %v2768_v4 = vrot.slane %v2752_v0, 2 }
 0x446   :  { %v2777_v17 = vsel %vm837_vm1, %v2765_v59, %v2767_v60 }
 0x447   :  { %v2781_v8 = vadd.f32 %v2777_v17, %v2501_v30  ;;  %v2778_v13 = vsel %vm837_vm1, %v2766_v2, %v2768_v4 }
 0x448   :  { %v2782_v19 = vadd.f32 %v2778_v13, %v2503_v32 }
 0x449   :  { %v2756_v22 = vpop.f32.mrb[36].mxu0  ;;  %v2810_v28 = vadd.f32 %v2805_v18, %v2781_v8 }
 0x44a   :  { %v2769_v23 = vrot.slane %v2756_v22, 2  ;;  %v2758_v24 = vpop.f32.mrb[37].mxu0  ;;  %v2811_v39 = vadd.f32 %v2809_v9, %v2782_v19 }
 0x44b   :  { %v2770_v25 = vrot.slane %v2758_v24, 2  ;;  %v2760_v16 = vpop.f32.mrb[38].mxu0  ;;  %v5688_v48 = vmax.f32 %v2810_v28, 0.0 }
 0x44c   :  { %v2775_v30 = vsel %vm837_vm1, %v2767_v60, %v2769_v23  ;;  %v2771_v31 = vrot.slane %v2760_v16, 2  ;;  %v2762_v36 = vpop.f32.mrb[39].mxu0  ;;  %v5702_v61 = vmax.f32 %v2811_v39, 0.0 }
 0x44d   :  { %v2783_v32 = vadd.f32 %v2775_v30, %v2505_v41  ;;  %v2776_v29 = vsel %vm837_vm1, %v2768_v4, %v2770_v25  ;;  %v2772_v37 = vrot.slane %v2762_v36, 2 }
 0x44e   :  { %v2784_v42 = vadd.f32 %v2776_v29, %v2507_v52  ;;  %v2773_v43 = vsel %vm837_vm1, %v2769_v23, %v2771_v31  ;;  %v2779_v44 = vsel %vm837_vm1, %v2771_v31, %v2765_v59  ;;  %v5700_v52 = vsel %vm2829_vm7, 1.0, %v5286_v46 }
 0x44f   :  { %v5684_v40 = vadd.f32 %v2805_v18, %v2783_v32  ;;  %v2785_v33 = vadd.f32 %v2773_v43, %v2511_v53  ;;  %v2787_v45 = vadd.f32 %v2779_v44, %v2515_v55  ;;  %v2774_v56 = vsel %vm837_vm1, %v2770_v25, %v2772_v37 }
 0x450   :  { %v5690_v54 = vadd.f32 %v2809_v9, %v2784_v42  ;;  %v2780_v47 = vsel %vm837_vm1, %v2772_v37, %v2766_v2  ;;  %v2786_v49 = vadd.f32 %v2774_v56, %v2513_v62  ;;  %v2866_v62 = vmul.f32 %v5688_v48, %v5688_v48 }
 0x451   :  { %v2820_v41 = vmax.f32 %v5684_v40, 0.0  ;;  %v2814_v50 = vadd.f32 %v2805_v18, %v2785_v33  ;;  %v5695_v51 = vadd.f32 %v2805_v18, %v2787_v45  ;;  %v2788_v10 = vadd.f32 %v2780_v47, %v2517_v6 }
 0x452   :  { %v2821_v58 = vmax.f32 %v5690_v54, 0.0  ;;  %v2815_v53 = vadd.f32 %v2809_v9, %v2786_v49  ;;  %v2867_v26 = vmul.f32 %v5702_v61, %v5702_v61 }
 0x453   :  { %v2840_v20 = vmul.f32 %v5673_v27, %v2820_v41  ;;  %v5708_v55 = vmax.f32 %v2814_v50, 0.0  ;;  %v2824_v3 = vmax.f32 %v5695_v51, 0.0  ;;  %v5711_v5 = vadd.f32 %v2809_v9, %v2788_v10 }
 0x454   :  { %v2841_v38 = vmul.f32 %v5673_v27, %v2821_v58  ;;  %v5716_v46 = vmax.f32 %v2815_v53, 0.0 }
 0x455   :  { %v2846_v6 = vadd.f32 %v2840_v20, %v5688_v48  ;;  %v2868_v11 = vmul.f32 %v2840_v20, %v2840_v20  ;;  %v2844_v14 = vmul.f32 %v5700_v52, %v2824_v3  ;;  %v2825_v63 = vmax.f32 %v5711_v5, 0.0 }
 0x456   :  { %v2855_v59 = vadd.f32 %v2841_v38, %v5702_v61  ;;  %v2869_v60 = vmul.f32 %v2841_v38, %v2841_v38  ;;  %v2870_v4 = vmul.f32 %v5708_v55, %v5708_v55  ;;  %v2871_v13 = vmul.f32 %v5716_v46, %v5716_v46 }
 0x457   :  { %v2874_v0 = vadd.f32 %v2868_v11, %v2866_v62  ;;  %v2847_v2 = vadd.f32 %v2846_v6, %v5708_v55  ;;  %v2845_v7 = vmul.f32 %v5700_v52, %v2825_v63  ;;  %v2872_v19 = vmul.f32 %v2844_v14, %v2844_v14 }
 0x458   :  { %v2883_v17 = vadd.f32 %v2869_v60, %v2867_v26  ;;  %v2856_v8 = vadd.f32 %v2855_v59, %v5716_v46 }
 0x459   :  { %v2848_v18 = vadd.f32 %v2847_v2, %v2844_v14  ;;  %v2875_v22 = vadd.f32 %v2874_v0, %v2870_v4  ;;  %v2873_v23 = vmul.f32 %v2845_v7, %v2845_v7 }
 0x45a   :  { %v2857_v9 = vadd.f32 %v2856_v8, %v2845_v7  ;;  %v2884_v24 = vadd.f32 %v2883_v17, %v2871_v13 }
 0x45b   :  { %v2849_v25 = vrot.slane %v2848_v18, 4  ;;  %v2876_v16 = vadd.f32 %v2875_v22, %v2872_v19  ;;  %v2907_v19 = vrot.slane %v5659_v12, %v5470_v34  ;;  %v2911_v22 = vrot.slane %v5659_v12, %v5473_v35 }
 0x45c   :  { %v2858_v28 = vrot.slane %v2857_v9, 4  ;;  %v2885_v30 = vadd.f32 %v2884_v24, %v2873_v23 }
 0x45d   :  { %v2850_v31 = vadd.f32 %v2849_v25, %v2848_v18  ;;  %v2877_v36 = vrot.slane %v2876_v16, 4 }
 0x45e   :  { %v2859_v32 = vadd.f32 %v2858_v28, %v2857_v9  ;;  %v2886_v29 = vrot.slane %v2885_v30, 4 }
 0x45f   :  { %v2851_v37 = vrot.slane %v2850_v31, 2  ;;  %v2878_v39 = vadd.f32 %v2877_v36, %v2876_v16 }
 0x460   :  { %v2860_v42 = vrot.slane %v2859_v32, 2  ;;  %v2887_v43 = vadd.f32 %v2886_v29, %v2885_v30 }
 0x461   :  { %v2852_v44 = vadd.f32 %v2851_v37, %v2850_v31  ;;  %v2879_v33 = vrot.slane %v2878_v39, 2 }
 0x462   :  { %v2861_v45 = vadd.f32 %v2860_v42, %v2859_v32  ;;  %v2888_v56 = vrot.slane %v2887_v43, 2 }
 0x463   :  { %v2853_v47 = vrot.slane %v2852_v44, 1  ;;  %v2880_v49 = vadd.f32 %v2879_v33, %v2878_v39 }
 0x464   :  { %v2862_v50 = vrot.slane %v2861_v45, 1  ;;  %v2889_v10 = vadd.f32 %v2888_v56, %v2887_v43 }
 0x465   :  { %v2854_v53 = vadd.f32 %v2853_v47, %v2852_v44  ;;  %v2881_v20 = vrot.slane %v2880_v49, 1 }
 0x466   :  { %v2863_v38 = vadd.f32 %v2862_v50, %v2861_v45  ;;  %v2890_v62 = vrot.slane %v2889_v10, 1 }
 0x467   :  { %v2864_v6 = vmul.f32 0.05, %v2854_v53  ;;  %v2882_v11 = vadd.f32 %v2881_v20, %v2880_v49 }
 0x468   :  { %v2865_v14 = vmul.f32 0.05, %v2863_v38  ;;  %v2891_v26 = vadd.f32 %v2890_v62, %v2889_v10 }
 0x469   :  { %v2892_v59 = vmul.f32 0.05, %v2882_v11  ;;  %v2894_v60 = vmul.f32 %v2864_v6, %v2864_v6 }
 0x46a   :  { %v2893_v0 = vmul.f32 0.05, %v2891_v26  ;;  %v2895_v2 = vmul.f32 %v2865_v14, %v2865_v14  ;;  %v5116_v26 = vld [vmem:[#allocation2 + $0xa04] ss:$8 sps:$4 sm:$0xff]  }
 0x46b   :  { %v2896_v4 = vsub.f32 %v2892_v59, %v2894_v60  ;;  %v5114_v59 = vld [vmem:[#allocation2 + $0xa00] ss:$8 sps:$4 sm:$0xff]   ;;  %3609 = vmatprep.subr.bf16.mxu0 %v5116_v26  ;;  %v5119_v60 = vld [vmem:[#allocation2 + $0xa14] ss:$8 sps:$4 sm:$0xff]  }
 0x46c   :  { %v2897_v17 = vsub.f32 %v2893_v0, %v2895_v2  ;;  %3610 = vmatpush1.bf16.msra.mxu0 %v5114_v59  ;;  %v5117_v0 = vld [vmem:[#allocation2 + $0xa10] ss:$8 sps:$4 sm:$0xff]   ;;  %v5122_v2 = vld [vmem:[#allocation2 + $0xa24] ss:$8 sps:$4 sm:$0xff]  }
 0x46d   :  { %v2898_v7 = vmax.f32 %v2896_v4, 0.0  ;;  %3611 = vmatprep.subr.bf16.mxu0 %v5119_v60  ;;  %v5120_v4 = vld [vmem:[#allocation2 + $0xa20] ss:$8 sps:$4 sm:$0xff]  }
 0x46e   :  { %v2899_v8 = vmax.f32 %v2897_v17, 0.0  ;;  %v5125_v17 = vld [vmem:[#allocation2 + $0xa34] ss:$8 sps:$4 sm:$0xff]  }
 0x46f   :  { %v2900_v13 = vadd.f32 1e-05, %v2898_v7  ;;  %v5123_v7 = vld [vmem:[#allocation2 + $0xa30] ss:$8 sps:$4 sm:$0xff]  }
 0x470   :  { %v2901_v18 = vadd.f32 1e-05, %v2899_v8  ;;  %3612 = vmatpush1.bf16.msra.mxu0 %v5117_v0  ;;  %v5128_v8 = vld [vmem:[#allocation2 + $0xa44] ss:$8 sps:$4 sm:$0xff]  }
 0x471   :  { %5218 = vrsqrt.f32 %v2900_v13  ;;  %3613 = vmatprep.subr.bf16.mxu0 %v5122_v2  ;;  %v5126_v13 = vld [vmem:[#allocation2 + $0xa40] ss:$8 sps:$4 sm:$0xff]  }
 0x472   :  { %5220 = vrsqrt.f32 %v2901_v18  ;;  %v5131_v18 = vld [vmem:[#allocation2 + $0xa54] ss:$8 sps:$4 sm:$0xff]  }
 0x474   :  { %3614 = vmatpush1.bf16.msra.mxu0 %v5120_v4 }
 0x475   :  { %3615 = vmatprep.subr.bf16.mxu0 %v5125_v17 }
 0x478   :  { %3616 = vmatpush1.bf16.msra.mxu0 %v5123_v7 }
 0x479   :  { %3617 = vmatprep.subr.bf16.mxu0 %v5128_v8 }
 0x47b   :  { %v5219_v9 = vpop.eup %5218 }
 0x47c   :  { %v5221_v23 = vpop.eup %5220  ;;  %v2914_v24 = vmul.f32 %v5219_v9, %v2907_v19  ;;  %3618 = vmatpush1.bf16.msra.mxu0 %v5126_v13  ;;  %v5129_v19 = vld [vmem:[#allocation2 + $0xa50] ss:$8 sps:$4 sm:$0xff]   ;;  %v5132_v9 = vld [vmem:[#allocation2 + $0xa60] ss:$8 sps:$4 sm:$0xff]  }
 0x47d   :  { %v2915_v25 = vmul.f32 %v5221_v23, %v2911_v22  ;;  %3619 = vmatprep.subr.bf16.mxu0 %v5131_v18  ;;  %v5134_v22 = vld [vmem:[#allocation2 + $0xa64] ss:$8 sps:$4 sm:$0xff]   ;;  %v5137_v23 = vld [vmem:[#allocation2 + $0xa74] ss:$8 sps:$4 sm:$0xff]  }
 0x47e   :  { %v2916_v16 = vmul.f32 %v2914_v24, %v2864_v6  ;;  %v2927_v28 = vrot.slane %v2914_v24, %v5385_v15  ;;  %v5135_v24 = vld [vmem:[#allocation2 + $0xa70] ss:$8 sps:$4 sm:$0xff]  }
 0x47f   :  { %v2917_v30 = vmul.f32 %v2915_v25, %v2865_v14  ;;  %v2931_v31 = vrot.slane %v2915_v25, %v5385_v15  ;;  %v5140_v25 = vld [vmem:[#allocation2 + $0xa84] ss:$8 sps:$4 sm:$0xff]  }
 0x480   :  { %v2932_v36 = vmul.f32 %v2927_v28, %v5688_v48  ;;  %v2934_v32 = vmul.f32 %v2927_v28, %v2820_v41  ;;  %v2936_v29 = vmul.f32 %v2927_v28, %v5708_v55  ;;  %v2938_v37 = vmul.f32 %v2927_v28, %v2824_v3  ;;  %3620 = vmatpush1.bf16.msra.mxu0 %v5129_v19  ;;  %v5143_v28 = vld [vmem:[#allocation2 + $0xa94] ss:$8 sps:$4 sm:$0xff]  }
 0x481   :  { %v2920_v39 = vcombine.low %v2916_v16, %v2917_v30  ;;  %v2933_v42 = vmul.f32 %v2931_v31, %v5702_v61  ;;  %v2935_v43 = vmul.f32 %v2931_v31, %v2821_v58  ;;  %v2937_v44 = vmul.f32 %v2931_v31, %v5716_v46  ;;  %3621 = vmatprep.subr.bf16.mxu0 %v5134_v22  ;;  %v5138_v16 = vld [vmem:[#allocation2 + $0xa80] ss:$8 sps:$4 sm:$0xff]   ;;  %v5141_v30 = vld [vmem:[#allocation2 + $0xa90] ss:$8 sps:$4 sm:$0xff]  }
 0x482   :  { %v2939_v33 = vmul.f32 %v2931_v31, %v2825_v63  ;;  %v5146_v31 = vld [vmem:[#allocation2 + $0xaa4] ss:$8 sps:$4 sm:$0xff]  }
 0x483   :  { %v2921_v48 = vrot.slane %v2920_v39, 6  ;;  %v5150_v39 = vld [vmem:[#allocation2 + $0xac0] ss:$8 sps:$4 sm:$0xff]  }
 0x484   :  { %3622 = vmatpush1.bf16.msra.mxu0 %v5132_v9 }
 0x485   :  { %v2923_v40 = vsub.f32 %v5659_v12, %v2921_v48  ;;  %3623 = vmatprep.subr.bf16.mxu0 %v5137_v23  ;;  %v5159_v48 = vld [vmem:[#allocation2 + $0xaf0] ss:$8 sps:$4 sm:$0xff]  }
 0x487   :  { %v2944_v41 = vrot.slane %v2923_v40, %v5494_v57  ;;  %v2948_v55 = vrot.slane %v2923_v40, %v5497_v1  ;;  %v5161_v40 = vld [vmem:[#allocation2 + $0xaf4] ss:$8 sps:$4 sm:$0xff]  }
 0x488   :  { %3624 = vmatpush1.bf16.msra.mxu0 %v5135_v24 }
 0x489   :  { %v2958_v51 = vrot.slane %v2948_v55, %v5494_v57  ;;  %v2954_v3 = vrot.slane %v2944_v41, %v5494_v57  ;;  %3625 = vmatprep.subr.bf16.mxu0 %v5140_v25  ;;  %v5760_v41 = vld [vmem:[#allocation4 + $0x18] sm:$0x77] }
 0x48a   :  { %v3018_v55 = vrot.slane %v5760_v41, %v5385_v15 }
 0x48b   :  { %v2960_v61 = vadd.f32 %v2958_v51, %v2933_v42  ;;  %v2962_v45 = vadd.f32 %v2958_v51, %v2935_v43  ;;  %v2959_v54 = vadd.f32 %v2954_v3, %v2932_v36  ;;  %v2961_v58 = vadd.f32 %v2954_v3, %v2934_v32  ;;  %v5144_v36 = vld [vmem:[#allocation2 + $0xaa0] ss:$8 sps:$4 sm:$0xff]   ;;  %v5149_v32 = vld [vmem:[#allocation2 + $0xab4] ss:$8 sps:$4 sm:$0xff]   ;;  %v5153_v43 = vld [vmem:[#allocation2 + $0xad0] ss:$8 sps:$4 sm:$0xff]  }
 0x48c   :  { %v2964_v56 = vadd.f32 %v2958_v51, %v2937_v44  ;;  %v2966_v46 = vadd.f32 %v2958_v51, %v2939_v33  ;;  %v2963_v47 = vadd.f32 %v2954_v3, %v2936_v29  ;;  %v2965_v5 = vadd.f32 %v2954_v3, %v2938_v37  ;;  %3626 = vmatpush1.bf16.msra.mxu0 %v5138_v16  ;;  %v5147_v29 = vld [vmem:[#allocation2 + $0xab0] ss:$8 sps:$4 sm:$0xff]   ;;  %v5152_v37 = vld [vmem:[#allocation2 + $0xac4] ss:$8 sps:$4 sm:$0xff]   ;;  %v5155_v42 = vld [vmem:[#allocation2 + $0xad4] ss:$8 sps:$4 sm:$0xff]  }
 0x48d   :  { %v2968_v63 = vmax.f32 %v2960_v61, 0.0  ;;  %v2970_v49 = vmax.f32 %v2962_v45, 0.0  ;;  %v2967_v50 = vmax.f32 %v2959_v54, 0.0  ;;  %v2969_v12 = vmax.f32 %v2961_v58, 0.0  ;;  %3627 = vmatprep.subr.bf16.mxu0 %v5143_v28  ;;  %v5158_v44 = vld [vmem:[#allocation2 + $0xae4] ss:$8 sps:$4 sm:$0xff]  }
 0x48e   :  { %v2972_v10 = vmax.f32 %v2964_v56, 0.0  ;;  %v2974_v53 = vmax.f32 %v2966_v46, 0.0  ;;  %v2971_v20 = vmax.f32 %v2963_v47, 0.0  ;;  %v2973_v38 = vmax.f32 %v2965_v5, 0.0  ;;  %v5156_v33 = vld [vmem:[#allocation2 + $0xae0] ss:$8 sps:$4 sm:$0xff]  }
 0x48f   :  { %v2976_v62 = vpack.c.bf16 %v2970_v49, %v2968_v63  ;;  %v2975_v6 = vpack.c.bf16 %v2969_v12, %v2967_v50  ;;  %v3022_v51 = vrot.slane %v5760_v41, %v5391_v21  ;;  %v3028_v3 = vrot.slane %v3018_v55, %v5385_v15 }
 0x490   :  { %v2978_v11 = vpack.c.bf16 %v2974_v53, %v2972_v10  ;;  %v2977_v14 = vpack.c.bf16 %v2973_v38, %v2971_v20  ;;  %3628 = vmatpush1.bf16.msra.mxu0 %v5141_v30 }
 0x491   :  { %3225 = vmatprep.mubr.bf16.mxu1 %v2976_v62  ;;  %3629 = vmatprep.subr.bf16.mxu0 %v5146_v31  ;;  %v3032_v61 = vrot.slane %v3022_v51, %v5385_v15 }
 0x492   :  { %3226 = vmatmul.mubr.bf16.vlgmr.msra.gmra.mrb[32].mxu1 %v2975_v6 }
 0x493   :  { %3235 = vmatprep.mubr.bf16.mxu1 %v2978_v11 }
 0x494   :  { %3630 = vmatpush1.bf16.msra.mxu0 %v5144_v36 }
 0x495   :  { %3631 = vmatprep.subr.bf16.mxu0 %v5149_v32 }
 0x498   :  { %3632 = vmatpush1.bf16.msra.mxu0 %v5147_v29 }
 0x499   :  { %3633 = vmatprep.subr.bf16.mxu0 %v5152_v37 }
 0x49a   :  { %3236 = vmatmul.mubr.bf16.gmra.mrb[36].mxu1 %v2977_v14 }
 0x49c   :  { %3634 = vmatpush1.bf16.msra.mxu0 %v5150_v39 }
 0x49d   :  { %3635 = vmatprep.subr.bf16.mxu0 %v5155_v42 }
 0x4a0   :  { %3636 = vmatpush1.bf16.msra.mxu0 %v5153_v43 }
 0x4a1   :  { %3637 = vmatprep.subr.bf16.mxu0 %v5158_v44 }
 0x4a4   :  { %3638 = vmatpush1.bf16.msra.mxu0 %v5156_v33 }
 0x4a5   :  { %3639 = vmatprep.subr.bf16.mxu0 %v5161_v40 }
 0x4a8   :  { %3640 = vmatpush1.bf16.msra.mxu0 %v5159_v48 }
 0x565   :  { %v3227_v45 = vpop.f32.mrb[32].mxu1 }
 0x566   :  { %v3228_v54 = vadd.f32 %v3227_v45, %v3028_v3  ;;  %v3229_v58 = vpop.f32.mrb[33].mxu1 }
 0x567   :  { %v3230_v56 = vadd.f32 %v3229_v58, %v3032_v61  ;;  %v3231_v46 = vpop.f32.mrb[34].mxu1 }
 0x568   :  { %v5768_v47 = vadd.f32 %v3231_v46, %v3028_v3  ;;  %v3233_v5 = vpop.f32.mrb[35].mxu1  ;;  %v5772_v49 = vmax.f32 %v3228_v54, 0.0 }
 0x569   :  { %v5770_v63 = vadd.f32 %v3233_v5, %v3032_v61  ;;  %v5775_v12 = vmax.f32 %v3230_v56, 0.0 }
 0x56a   :  { %v3248_v50 = vmax.f32 %v5768_v47, 0.0  ;;  %v3282_v62 = vmul.f32 %v5772_v49, %v5772_v49 }
 0x56b   :  { %v3249_v10 = vmax.f32 %v5770_v63, 0.0  ;;  %v3283_v59 = vmul.f32 %v5775_v12, %v5775_v12 }
 0x56c   :  { %v3256_v53 = vmul.f32 %v5673_v27, %v3248_v50 }
 0x56d   :  { %v3257_v20 = vmul.f32 %v5673_v27, %v3249_v10  ;;  %v3237_v38 = vpop.f32.mrb[36].mxu1 }
 0x56e   :  { %v3262_v6 = vadd.f32 %v3256_v53, %v5772_v49  ;;  %v3284_v11 = vmul.f32 %v3256_v53, %v3256_v53  ;;  %v3238_v14 = vadd.f32 %v3237_v38, %v3028_v3  ;;  %v3239_v26 = vpop.f32.mrb[37].mxu1 }
 0x56f   :  { %v3271_v60 = vadd.f32 %v3257_v20, %v5775_v12  ;;  %v3285_v0 = vmul.f32 %v3257_v20, %v3257_v20  ;;  %v3240_v2 = vadd.f32 %v3239_v26, %v3032_v61  ;;  %v3241_v4 = vpop.f32.mrb[38].mxu1 }
 0x570   :  { %v3290_v17 = vadd.f32 %v3284_v11, %v3282_v62  ;;  %v5790_v7 = vmax.f32 %v3238_v14, 0.0  ;;  %v5792_v8 = vadd.f32 %v3241_v4, %v3028_v3  ;;  %v3243_v13 = vpop.f32.mrb[39].mxu1 }
 0x571   :  { %v3299_v18 = vadd.f32 %v3285_v0, %v3283_v59  ;;  %v5794_v19 = vmax.f32 %v3240_v2, 0.0  ;;  %v5796_v22 = vadd.f32 %v3243_v13, %v3032_v61 }
 0x572   :  { %v3263_v9 = vadd.f32 %v3262_v6, %v5790_v7  ;;  %v3286_v23 = vmul.f32 %v5790_v7, %v5790_v7  ;;  %v3252_v24 = vmax.f32 %v5792_v8, 0.0 }
 0x573   :  { %v3272_v25 = vadd.f32 %v3271_v60, %v5794_v19  ;;  %v3287_v16 = vmul.f32 %v5794_v19, %v5794_v19  ;;  %v3253_v28 = vmax.f32 %v5796_v22, 0.0 }
 0x574   :  { %v3291_v30 = vadd.f32 %v3290_v17, %v3286_v23  ;;  %v3260_v31 = vmul.f32 %v5700_v52, %v3252_v24 }
 0x575   :  { %v3300_v36 = vadd.f32 %v3299_v18, %v3287_v16  ;;  %v3261_v32 = vmul.f32 %v5700_v52, %v3253_v28 }
 0x576   :  { %v3264_v29 = vadd.f32 %v3263_v9, %v3260_v31  ;;  %v3288_v37 = vmul.f32 %v3260_v31, %v3260_v31 }
 0x577   :  { %v3273_v39 = vadd.f32 %v3272_v25, %v3261_v32  ;;  %v3289_v42 = vmul.f32 %v3261_v32, %v3261_v32  ;;  %v3327_v32 = vrot.slane %v5760_v41, %v5473_v35 }
 0x578   :  { %v3265_v43 = vrot.slane %v3264_v29, 4  ;;  %v3292_v44 = vadd.f32 %v3291_v30, %v3288_v37 }
 0x579   :  { %v3274_v33 = vrot.slane %v3273_v39, 4  ;;  %v3301_v48 = vadd.f32 %v3300_v36, %v3289_v42  ;;  %v3323_v36 = vrot.slane %v5760_v41, %v5470_v34 }
 0x57a   :  { %v3266_v40 = vadd.f32 %v3265_v43, %v3264_v29  ;;  %v3293_v55 = vrot.slane %v3292_v44, 4 }
 0x57b   :  { %v3275_v51 = vadd.f32 %v3274_v33, %v3273_v39  ;;  %v3302_v3 = vrot.slane %v3301_v48, 4 }
 0x57c   :  { %v3267_v61 = vrot.slane %v3266_v40, 2  ;;  %v3294_v45 = vadd.f32 %v3293_v55, %v3292_v44 }
 0x57d   :  { %v3276_v54 = vrot.slane %v3275_v51, 2  ;;  %v3303_v58 = vadd.f32 %v3302_v3, %v3301_v48 }
 0x57e   :  { %v3268_v56 = vadd.f32 %v3267_v61, %v3266_v40  ;;  %v3295_v46 = vrot.slane %v3294_v45, 2 }
 0x57f   :  { %v3277_v5 = vadd.f32 %v3276_v54, %v3275_v51  ;;  %v3304_v53 = vrot.slane %v3303_v58, 2 }
 0x580   :  { %v3269_v20 = vrot.slane %v3268_v56, 1  ;;  %v3296_v38 = vadd.f32 %v3295_v46, %v3294_v45 }
 0x581   :  { %v3278_v62 = vrot.slane %v3277_v5, 1  ;;  %v3305_v6 = vadd.f32 %v3304_v53, %v3303_v58 }
 0x582   :  { %v3270_v11 = vadd.f32 %v3269_v20, %v3268_v56  ;;  %v3297_v14 = vrot.slane %v3296_v38, 1 }
 0x583   :  { %v3279_v26 = vadd.f32 %v3278_v62, %v3277_v5  ;;  %v3306_v59 = vrot.slane %v3305_v6, 1 }
 0x584   :  { %v3280_v60 = vmul.f32 0.05, %v3270_v11  ;;  %v3298_v0 = vadd.f32 %v3297_v14, %v3296_v38 }
 0x585   :  { %v3281_v2 = vmul.f32 0.05, %v3279_v26  ;;  %v3307_v4 = vadd.f32 %v3306_v59, %v3305_v6 }
 0x586   :  { %v3308_v17 = vmul.f32 0.05, %v3298_v0  ;;  %v3310_v8 = vmul.f32 %v3280_v60, %v3280_v60 }
 0x587   :  { %v3309_v13 = vmul.f32 0.05, %v3307_v4  ;;  %v3311_v18 = vmul.f32 %v3281_v2, %v3281_v2  ;;  %v5164_v4 = vld [vmem:[#allocation2 + $0xb04] ss:$8 sps:$4 sm:$0xff]  }
 0x588   :  { %v3312_v9 = vsub.f32 %v3308_v17, %v3310_v8  ;;  %v5162_v17 = vld [vmem:[#allocation2 + $0xb00] ss:$8 sps:$4 sm:$0xff]   ;;  %4025 = vmatprep.subr.bf16.mxu1 %v5164_v4  ;;  %v5167_v8 = vld [vmem:[#allocation2 + $0xb14] ss:$8 sps:$4 sm:$0xff]  }
 0x589   :  { %v3313_v23 = vsub.f32 %v3309_v13, %v3311_v18  ;;  %4026 = vmatpush1.bf16.msra.mxu1 %v5162_v17  ;;  %v5165_v13 = vld [vmem:[#allocation2 + $0xb10] ss:$8 sps:$4 sm:$0xff]   ;;  %v5170_v18 = vld [vmem:[#allocation2 + $0xb24] ss:$8 sps:$4 sm:$0xff]  }
 0x58a   :  { %v3314_v25 = vmax.f32 %v3312_v9, 0.0  ;;  %4027 = vmatprep.subr.bf16.mxu1 %v5167_v8  ;;  %v5168_v9 = vld [vmem:[#allocation2 + $0xb20] ss:$8 sps:$4 sm:$0xff]  }
 0x58b   :  { %v3315_v16 = vmax.f32 %v3313_v23, 0.0  ;;  %v5173_v23 = vld [vmem:[#allocation2 + $0xb34] ss:$8 sps:$4 sm:$0xff]  }
 0x58c   :  { %v3316_v30 = vadd.f32 1e-05, %v3314_v25  ;;  %v5171_v25 = vld [vmem:[#allocation2 + $0xb30] ss:$8 sps:$4 sm:$0xff]  }
 0x58d   :  { %v3317_v31 = vadd.f32 1e-05, %v3315_v16  ;;  %4028 = vmatpush1.bf16.msra.mxu1 %v5165_v13  ;;  %v5176_v16 = vld [vmem:[#allocation2 + $0xb44] ss:$8 sps:$4 sm:$0xff]  }
 0x58e   :  { %5222 = vrsqrt.f32 %v3316_v30  ;;  %4029 = vmatprep.subr.bf16.mxu1 %v5170_v18  ;;  %v5174_v30 = vld [vmem:[#allocation2 + $0xb40] ss:$8 sps:$4 sm:$0xff]  }
 0x58f   :  { %5224 = vrsqrt.f32 %v3317_v31  ;;  %v5179_v31 = vld [vmem:[#allocation2 + $0xb54] ss:$8 sps:$4 sm:$0xff]  }
 0x591   :  { %4030 = vmatpush1.bf16.msra.mxu1 %v5168_v9 }
 0x592   :  { %4031 = vmatprep.subr.bf16.mxu1 %v5173_v23 }
 0x595   :  { %4032 = vmatpush1.bf16.msra.mxu1 %v5171_v25 }
 0x596   :  { %4033 = vmatprep.subr.bf16.mxu1 %v5176_v16 }
 0x598   :  { %v5223_v29 = vpop.eup %5222 }
 0x599   :  { %v5225_v37 = vpop.eup %5224  ;;  %v3330_v39 = vmul.f32 %v5223_v29, %v3323_v36  ;;  %4034 = vmatpush1.bf16.msra.mxu1 %v5174_v30  ;;  %v5177_v36 = vld [vmem:[#allocation2 + $0xb50] ss:$8 sps:$4 sm:$0xff]   ;;  %v5180_v29 = vld [vmem:[#allocation2 + $0xb60] ss:$8 sps:$4 sm:$0xff]  }
 0x59a   :  { %v3331_v42 = vmul.f32 %v5225_v37, %v3327_v32  ;;  %4035 = vmatprep.subr.bf16.mxu1 %v5179_v31  ;;  %v5182_v32 = vld [vmem:[#allocation2 + $0xb64] ss:$8 sps:$4 sm:$0xff]   ;;  %v5185_v37 = vld [vmem:[#allocation2 + $0xb74] ss:$8 sps:$4 sm:$0xff]  }
 0x59b   :  { %v3332_v43 = vmul.f32 %v3330_v39, %v3280_v60  ;;  %v3343_v44 = vrot.slane %v3330_v39, %v5385_v15  ;;  %v5183_v39 = vld [vmem:[#allocation2 + $0xb70] ss:$8 sps:$4 sm:$0xff]  }
 0x59c   :  { %v3333_v33 = vmul.f32 %v3331_v42, %v3281_v2  ;;  %v3347_v48 = vrot.slane %v3331_v42, %v5385_v15  ;;  %v5188_v42 = vld [vmem:[#allocation2 + $0xb84] ss:$8 sps:$4 sm:$0xff]  }
 0x59d   :  { %v3354_v40 = vmul.f32 %v3343_v44, %v3252_v24  ;;  %v3348_v55 = vmul.f32 %v3343_v44, %v5772_v49  ;;  %v3350_v51 = vmul.f32 %v3343_v44, %v3248_v50  ;;  %v3352_v3 = vmul.f32 %v3343_v44, %v5790_v7  ;;  %4036 = vmatpush1.bf16.msra.mxu1 %v5177_v36  ;;  %v5191_v44 = vld [vmem:[#allocation2 + $0xb94] ss:$8 sps:$4 sm:$0xff]  }
 0x59e   :  { %v3336_v61 = vcombine.low %v3332_v43, %v3333_v33  ;;  %v3355_v45 = vmul.f32 %v3347_v48, %v3253_v28  ;;  %v3349_v54 = vmul.f32 %v3347_v48, %v5775_v12  ;;  %v3351_v58 = vmul.f32 %v3347_v48, %v3249_v10  ;;  %4037 = vmatprep.subr.bf16.mxu1 %v5182_v32  ;;  %v5186_v43 = vld [vmem:[#allocation2 + $0xb80] ss:$8 sps:$4 sm:$0xff]   ;;  %v5189_v33 = vld [vmem:[#allocation2 + $0xb90] ss:$8 sps:$4 sm:$0xff]  }
 0x59f   :  { %v3353_v56 = vmul.f32 %v3347_v48, %v5794_v19  ;;  %v5194_v48 = vld [vmem:[#allocation2 + $0xba4] ss:$8 sps:$4 sm:$0xff]  }
 0x5a0   :  { %v3337_v46 = vrot.slane %v3336_v61, 6  ;;  %v5198_v61 = vld [vmem:[#allocation2 + $0xbc0] ss:$8 sps:$4 sm:$0xff]  }
 0x5a1   :  { %4038 = vmatpush1.bf16.msra.mxu1 %v5180_v29 }
 0x5a2   :  { %v3339_v24 = vsub.f32 %v5760_v41, %v3337_v46  ;;  %4039 = vmatprep.subr.bf16.mxu1 %v5185_v37  ;;  %v5207_v46 = vld [vmem:[#allocation2 + $0xbf0] ss:$8 sps:$4 sm:$0xff]  }
 0x5a4   :  { %v3360_v49 = vrot.slane %v3339_v24, %v5494_v57  ;;  %v3364_v47 = vrot.slane %v3339_v24, %v5497_v1  ;;  %v5209_v24 = vld [vmem:[#allocation2 + $0xbf4] ss:$8 sps:$4 sm:$0xff]  }
 0x5a5   :  { %4040 = vmatpush1.bf16.msra.mxu1 %v5183_v39 }
 0x5a6   :  { %v3370_v50 = vrot.slane %v3360_v49, %v5494_v57  ;;  %v3374_v7 = vrot.slane %v3364_v47, %v5494_v57  ;;  %4041 = vmatprep.subr.bf16.mxu1 %v5188_v42  ;;  %v5831_v49 = vld [vmem:[#allocation4 + $0x20] sm:$0x77] }
 0x5a7   :  { %v3434_v47 = vrot.slane %v5831_v49, %v5385_v15 }
 0x5a8   :  { %v3382_v22 = vadd.f32 %v3374_v7, %v3355_v45  ;;  %v3376_v28 = vadd.f32 %v3374_v7, %v3349_v54  ;;  %v3378_v5 = vadd.f32 %v3374_v7, %v3351_v58  ;;  %v3375_v12 = vadd.f32 %v3370_v50, %v3348_v55  ;;  %v5197_v55 = vld [vmem:[#allocation2 + $0xbb4] ss:$8 sps:$4 sm:$0xff]   ;;  %v5201_v54 = vld [vmem:[#allocation2 + $0xbd0] ss:$8 sps:$4 sm:$0xff]   ;;  %v5206_v58 = vld [vmem:[#allocation2 + $0xbe4] ss:$8 sps:$4 sm:$0xff]  }
 0x5a9   :  { %v3377_v53 = vadd.f32 %v3370_v50, %v3350_v51  ;;  %v3380_v63 = vadd.f32 %v3374_v7, %v3353_v56  ;;  %v3379_v10 = vadd.f32 %v3370_v50, %v3352_v3  ;;  %v3381_v20 = vadd.f32 %v3370_v50, %v3354_v40  ;;  %4042 = vmatpush1.bf16.msra.mxu1 %v5186_v43  ;;  %v5192_v40 = vld [vmem:[#allocation2 + $0xba0] ss:$8 sps:$4 sm:$0xff]   ;;  %v5195_v51 = vld [vmem:[#allocation2 + $0xbb0] ss:$8 sps:$4 sm:$0xff]   ;;  %v5200_v3 = vld [vmem:[#allocation2 + $0xbc4] ss:$8 sps:$4 sm:$0xff]  }
 0x5aa   :  { %v3390_v19 = vmax.f32 %v3382_v22, 0.0  ;;  %v3384_v38 = vmax.f32 %v3376_v28, 0.0  ;;  %v3386_v62 = vmax.f32 %v3378_v5, 0.0  ;;  %v3383_v41 = vmax.f32 %v3375_v12, 0.0  ;;  %4043 = vmatprep.subr.bf16.mxu1 %v5191_v44  ;;  %v5203_v45 = vld [vmem:[#allocation2 + $0xbd4] ss:$8 sps:$4 sm:$0xff]  }
 0x5ab   :  { %v3385_v6 = vmax.f32 %v3377_v53, 0.0  ;;  %v3388_v11 = vmax.f32 %v3380_v63, 0.0  ;;  %v3387_v14 = vmax.f32 %v3379_v10, 0.0  ;;  %v3389_v26 = vmax.f32 %v3381_v20, 0.0  ;;  %v5204_v56 = vld [vmem:[#allocation2 + $0xbe0] ss:$8 sps:$4 sm:$0xff]  }
 0x5ac   :  { %v3392_v59 = vpack.c.bf16 %v3386_v62, %v3384_v38  ;;  %v3438_v50 = vrot.slane %v5831_v49, %v5391_v21  ;;  %v3444_v7 = vrot.slane %v3434_v47, %v5385_v15 }
 0x5ad   :  { %v3391_v60 = vpack.c.bf16 %v3385_v6, %v3383_v41  ;;  %v3394_v0 = vpack.c.bf16 %v3390_v19, %v3388_v11  ;;  %v3393_v2 = vpack.c.bf16 %v3389_v26, %v3387_v14  ;;  %4044 = vmatpush1.bf16.msra.mxu1 %v5189_v33 }
 0x5ae   :  { %3641 = vmatprep.mubr.bf16.mxu0 %v3392_v59  ;;  %4045 = vmatprep.subr.bf16.mxu1 %v5194_v48  ;;  %v3448_v22 = vrot.slane %v3438_v50, %v5385_v15 }
 0x5af   :  { %3642 = vmatmul.mubr.bf16.vlgmr.msra.gmra.mrb[40].mxu0 %v3391_v60 }
 0x5b0   :  { %3651 = vmatprep.mubr.bf16.mxu0 %v3394_v0 }
 0x5b1   :  { %4046 = vmatpush1.bf16.msra.mxu1 %v5192_v40 }
 0x5b2   :  { %4047 = vmatprep.subr.bf16.mxu1 %v5197_v55 }
 0x5b5   :  { %4048 = vmatpush1.bf16.msra.mxu1 %v5195_v51 }
 0x5b6   :  { %4049 = vmatprep.subr.bf16.mxu1 %v5200_v3 }
 0x5b7   :  { %3652 = vmatmul.mubr.bf16.gmra.mrb[44].mxu0 %v3393_v2 }
 0x5b9   :  { %4050 = vmatpush1.bf16.msra.mxu1 %v5198_v61 }
 0x5ba   :  { %4051 = vmatprep.subr.bf16.mxu1 %v5203_v45 }
 0x5bd   :  { %4052 = vmatpush1.bf16.msra.mxu1 %v5201_v54 }
 0x5be   :  { %4053 = vmatprep.subr.bf16.mxu1 %v5206_v58 }
 0x5c1   :  { %4054 = vmatpush1.bf16.msra.mxu1 %v5204_v56 }
 0x5c2   :  { %4055 = vmatprep.subr.bf16.mxu1 %v5209_v24 }
 0x5c5   :  { %4056 = vmatpush1.bf16.msra.mxu1 %v5207_v46 }
 0x682   :  { %v3643_v28 = vpop.f32.mrb[40].mxu0 }
 0x683   :  { %v3644_v5 = vadd.f32 %v3643_v28, %v3444_v7  ;;  %v3645_v12 = vpop.f32.mrb[41].mxu0 }
 0x684   :  { %v3646_v53 = vadd.f32 %v3645_v12, %v3448_v22  ;;  %v3647_v63 = vpop.f32.mrb[42].mxu0 }
 0x685   :  { %v5839_v10 = vadd.f32 %v3647_v63, %v3444_v7  ;;  %v3649_v20 = vpop.f32.mrb[43].mxu0  ;;  %v5843_v38 = vmax.f32 %v3644_v5, 0.0 }
 0x686   :  { %v5841_v19 = vadd.f32 %v3649_v20, %v3448_v22  ;;  %v5846_v41 = vmax.f32 %v3646_v53, 0.0 }
 0x687   :  { %v3664_v62 = vmax.f32 %v5839_v10, 0.0  ;;  %v3698_v59 = vmul.f32 %v5843_v38, %v5843_v38 }
 0x688   :  { %v3665_v6 = vmax.f32 %v5841_v19, 0.0  ;;  %v3699_v17 = vmul.f32 %v5846_v41, %v5846_v41 }
 0x689   :  { %v3672_v11 = vmul.f32 %v5673_v27, %v3664_v62 }
 0x68a   :  { %v3673_v14 = vmul.f32 %v5673_v27, %v3665_v6  ;;  %v3653_v26 = vpop.f32.mrb[44].mxu0 }
 0x68b   :  { %v3678_v60 = vadd.f32 %v3672_v11, %v5843_v38  ;;  %v3700_v0 = vmul.f32 %v3672_v11, %v3672_v11  ;;  %v3654_v2 = vadd.f32 %v3653_v26, %v3444_v7  ;;  %v3655_v4 = vpop.f32.mrb[45].mxu0 }
 0x68c   :  { %v3687_v8 = vadd.f32 %v3673_v14, %v5846_v41  ;;  %v3701_v13 = vmul.f32 %v3673_v14, %v3673_v14  ;;  %v3656_v18 = vadd.f32 %v3655_v4, %v3448_v22  ;;  %v3657_v9 = vpop.f32.mrb[46].mxu0 }
 0x68d   :  { %v3706_v23 = vadd.f32 %v3700_v0, %v3698_v59  ;;  %v5861_v25 = vmax.f32 %v3654_v2, 0.0  ;;  %v5863_v16 = vadd.f32 %v3657_v9, %v3444_v7  ;;  %v3659_v30 = vpop.f32.mrb[47].mxu0 }
 0x68e   :  { %v3715_v31 = vadd.f32 %v3701_v13, %v3699_v17  ;;  %v5865_v36 = vmax.f32 %v3656_v18, 0.0  ;;  %v5867_v32 = vadd.f32 %v3659_v30, %v3448_v22 }
 0x68f   :  { %v3679_v29 = vadd.f32 %v3678_v60, %v5861_v25  ;;  %v3702_v37 = vmul.f32 %v5861_v25, %v5861_v25  ;;  %v3668_v39 = vmax.f32 %v5863_v16, 0.0 }
 0x690   :  { %v3688_v42 = vadd.f32 %v3687_v8, %v5865_v36  ;;  %v3703_v43 = vmul.f32 %v5865_v36, %v5865_v36  ;;  %v3669_v44 = vmax.f32 %v5867_v32, 0.0 }
 0x691   :  { %v3707_v33 = vadd.f32 %v3706_v23, %v3702_v37  ;;  %v3676_v48 = vmul.f32 %v5700_v52, %v3668_v39 }
 0x692   :  { %v3716_v40 = vadd.f32 %v3715_v31, %v3703_v43  ;;  %v3677_v55 = vmul.f32 %v5700_v52, %v3669_v44 }
 0x693   :  { %v3680_v51 = vadd.f32 %v3679_v29, %v3676_v48  ;;  %v3704_v3 = vmul.f32 %v3676_v48, %v3676_v48 }
 0x694   :  { %v3689_v61 = vadd.f32 %v3688_v42, %v3677_v55  ;;  %v3705_v45 = vmul.f32 %v3677_v55, %v3677_v55  ;;  %v3743_v55 = vrot.slane %v5831_v49, %v5473_v35 }
 0x695   :  { %v3681_v54 = vrot.slane %v3680_v51, 4  ;;  %v3708_v58 = vadd.f32 %v3707_v33, %v3704_v3 }
 0x696   :  { %v3690_v56 = vrot.slane %v3689_v61, 4  ;;  %v3717_v46 = vadd.f32 %v3716_v40, %v3705_v45  ;;  %v3739_v40 = vrot.slane %v5831_v49, %v5470_v34 }
 0x697   :  { %v3682_v24 = vadd.f32 %v3681_v54, %v3680_v51  ;;  %v3709_v47 = vrot.slane %v3708_v58, 4 }
 0x698   :  { %v3691_v50 = vadd.f32 %v3690_v56, %v3689_v61  ;;  %v3718_v7 = vrot.slane %v3717_v46, 4 }
 0x699   :  { %v3683_v22 = vrot.slane %v3682_v24, 2  ;;  %v3710_v28 = vadd.f32 %v3709_v47, %v3708_v58 }
 0x69a   :  { %v3692_v5 = vrot.slane %v3691_v50, 2  ;;  %v3719_v12 = vadd.f32 %v3718_v7, %v3717_v46 }
 0x69b   :  { %v3684_v53 = vadd.f32 %v3683_v22, %v3682_v24  ;;  %v3711_v63 = vrot.slane %v3710_v28, 2 }
 0x69c   :  { %v3693_v20 = vadd.f32 %v3692_v5, %v3691_v50  ;;  %v3720_v11 = vrot.slane %v3719_v12, 2 }
 0x69d   :  { %v3685_v14 = vrot.slane %v3684_v53, 1  ;;  %v3712_v26 = vadd.f32 %v3711_v63, %v3710_v28 }
 0x69e   :  { %v3694_v59 = vrot.slane %v3693_v20, 1  ;;  %v3721_v60 = vadd.f32 %v3720_v11, %v3719_v12 }
 0x69f   :  { %v3686_v0 = vadd.f32 %v3685_v14, %v3684_v53  ;;  %v3713_v2 = vrot.slane %v3712_v26, 1 }
 0x6a0   :  { %v3695_v4 = vadd.f32 %v3694_v59, %v3693_v20  ;;  %v3722_v17 = vrot.slane %v3721_v60, 1 }
 0x6a1   :  { %v3696_v8 = vmul.f32 0.05, %v3686_v0  ;;  %v3714_v13 = vadd.f32 %v3713_v2, %v3712_v26 }
 0x6a2   :  { %v3697_v18 = vmul.f32 0.05, %v3695_v4  ;;  %v3723_v9 = vadd.f32 %v3722_v17, %v3721_v60 }
 0x6a3   :  { %v3724_v23 = vmul.f32 0.05, %v3714_v13  ;;  %v3726_v16 = vmul.f32 %v3696_v8, %v3696_v8 }
 0x6a4   :  { %v3725_v30 = vmul.f32 0.05, %v3723_v9  ;;  %v3727_v31 = vmul.f32 %v3697_v18, %v3697_v18  ;;  %v5902_v9 = vld [vmem:[#allocation4 + $0x28] sm:$0x77] }
 0x6a5   :  { %v3728_v29 = vsub.f32 %v3724_v23, %v3726_v16  ;;  %v3850_v23 = vrot.slane %v5902_v9, %v5385_v15  ;;  %v3854_v16 = vrot.slane %v5902_v9, %v5391_v21 }
 0x6a6   :  { %v3729_v37 = vsub.f32 %v3725_v30, %v3727_v31 }
 0x6a7   :  { %v3730_v42 = vmax.f32 %v3728_v29, 0.0  ;;  %v3860_v30 = vrot.slane %v3850_v23, %v5385_v15  ;;  %v3864_v31 = vrot.slane %v3854_v16, %v5385_v15 }
 0x6a8   :  { %v3731_v43 = vmax.f32 %v3729_v37, 0.0 }
 0x6a9   :  { %v3732_v33 = vadd.f32 1e-05, %v3730_v42 }
 0x6aa   :  { %v3733_v48 = vadd.f32 1e-05, %v3731_v43 }
 0x6ab   :  { %5226 = vrsqrt.f32 %v3732_v33 }
 0x6ac   :  { %5228 = vrsqrt.f32 %v3733_v48 }
 0x6b5   :  { %v5227_v51 = vpop.eup %5226 }
 0x6b6   :  { %v5229_v3 = vpop.eup %5228  ;;  %v3746_v61 = vmul.f32 %v5227_v51, %v3739_v40 }
 0x6b7   :  { %v3747_v45 = vmul.f32 %v5229_v3, %v3743_v55 }
 0x6b8   :  { %v3748_v54 = vmul.f32 %v3746_v61, %v3696_v8  ;;  %v3759_v58 = vrot.slane %v3746_v61, %v5385_v15 }
 0x6b9   :  { %v3749_v56 = vmul.f32 %v3747_v45, %v3697_v18  ;;  %v3763_v46 = vrot.slane %v3747_v45, %v5385_v15 }
 0x6ba   :  { %v3770_v24 = vmul.f32 %v3759_v58, %v3668_v39  ;;  %v3764_v47 = vmul.f32 %v3759_v58, %v5843_v38  ;;  %v3766_v50 = vmul.f32 %v3759_v58, %v3664_v62  ;;  %v3768_v7 = vmul.f32 %v3759_v58, %v5861_v25 }
 0x6bb   :  { %v3752_v22 = vcombine.low %v3748_v54, %v3749_v56  ;;  %v3771_v28 = vmul.f32 %v3763_v46, %v3669_v44  ;;  %v3765_v5 = vmul.f32 %v3763_v46, %v5846_v41  ;;  %v3767_v12 = vmul.f32 %v3763_v46, %v3665_v6 }
 0x6bc   :  { %v3769_v53 = vmul.f32 %v3763_v46, %v5865_v36 }
 0x6bd   :  { %v3753_v63 = vrot.slane %v3752_v22, 6 }
 0x6bf   :  { %v3755_v39 = vsub.f32 %v5831_v49, %v3753_v63 }
 0x6c1   :  { %v3776_v38 = vrot.slane %v3755_v39, %v5494_v57  ;;  %v3780_v10 = vrot.slane %v3755_v39, %v5497_v1 }
 0x6c3   :  { %v3786_v62 = vrot.slane %v3776_v38, %v5494_v57  ;;  %v3790_v25 = vrot.slane %v3780_v10, %v5494_v57 }
 0x6c5   :  { %v3798_v32 = vadd.f32 %v3790_v25, %v3771_v28  ;;  %v3792_v44 = vadd.f32 %v3790_v25, %v3765_v5  ;;  %v3794_v20 = vadd.f32 %v3790_v25, %v3767_v12  ;;  %v3791_v41 = vadd.f32 %v3786_v62, %v3764_v47 }
 0x6c6   :  { %v3793_v11 = vadd.f32 %v3786_v62, %v3766_v50  ;;  %v3796_v19 = vadd.f32 %v3790_v25, %v3769_v53  ;;  %v3795_v6 = vadd.f32 %v3786_v62, %v3768_v7  ;;  %v3797_v14 = vadd.f32 %v3786_v62, %v3770_v24 }
 0x6c7   :  { %v3806_v36 = vmax.f32 %v3798_v32, 0.0  ;;  %v3800_v26 = vmax.f32 %v3792_v44, 0.0  ;;  %v3802_v59 = vmax.f32 %v3794_v20, 0.0  ;;  %v3799_v49 = vmax.f32 %v3791_v41, 0.0 }
 0x6c8   :  { %v3801_v60 = vmax.f32 %v3793_v11, 0.0  ;;  %v3804_v0 = vmax.f32 %v3796_v19, 0.0  ;;  %v3803_v2 = vmax.f32 %v3795_v6, 0.0  ;;  %v3805_v4 = vmax.f32 %v3797_v14, 0.0 }
 0x6c9   :  { %v3808_v17 = vpack.c.bf16 %v3802_v59, %v3800_v26 }
 0x6ca   :  { %v3807_v8 = vpack.c.bf16 %v3801_v60, %v3799_v49  ;;  %v3810_v13 = vpack.c.bf16 %v3806_v36, %v3804_v0  ;;  %v3809_v18 = vpack.c.bf16 %v3805_v4, %v3803_v2 }
 0x6cb   :  { %4057 = vmatprep.mubr.bf16.mxu1 %v3808_v17 }
 0x6cc   :  { %4058 = vmatmul.mubr.bf16.vlgmr.msra.gmra.mrb[40].mxu1 %v3807_v8 }
 0x6cd   :  { %4067 = vmatprep.mubr.bf16.mxu1 %v3810_v13 }
 0x6d4   :  { %4068 = vmatmul.mubr.bf16.gmra.mrb[44].mxu1 %v3809_v18 }
 0x79f   :  { %v4059_v29 = vpop.f32.mrb[40].mxu1 }
 0x7a0   :  { %v4060_v37 = vadd.f32 %v4059_v29, %v3860_v30  ;;  %v4061_v42 = vpop.f32.mrb[41].mxu1 }
 0x7a1   :  { %v4062_v43 = vadd.f32 %v4061_v42, %v3864_v31  ;;  %v4063_v33 = vpop.f32.mrb[42].mxu1 }
 0x7a2   :  { %v5910_v48 = vadd.f32 %v4063_v33, %v3860_v30  ;;  %v4065_v40 = vpop.f32.mrb[43].mxu1  ;;  %v5914_v51 = vmax.f32 %v4060_v37, 0.0 }
 0x7a3   :  { %v5912_v55 = vadd.f32 %v4065_v40, %v3864_v31  ;;  %v5917_v61 = vmax.f32 %v4062_v43, 0.0 }
 0x7a4   :  { %v4080_v3 = vmax.f32 %v5910_v48, 0.0  ;;  %v4114_v56 = vmul.f32 %v5914_v51, %v5914_v51 }
 0x7a5   :  { %v4081_v21 = vmax.f32 %v5912_v55, 0.0  ;;  %v4115_v7 = vmul.f32 %v5917_v61, %v5917_v61 }
 0x7a6   :  { %v4088_v45 = vmul.f32 %v5673_v27, %v4080_v3 }
 0x7a7   :  { %v4089_v54 = vmul.f32 %v5673_v27, %v4081_v21  ;;  %v4069_v58 = vpop.f32.mrb[44].mxu1 }
 0x7a8   :  { %v4094_v46 = vadd.f32 %v4088_v45, %v5914_v51  ;;  %v4116_v24 = vmul.f32 %v4088_v45, %v4088_v45  ;;  %v4070_v47 = vadd.f32 %v4069_v58, %v3860_v30  ;;  %v4071_v50 = vpop.f32.mrb[45].mxu1 }
 0x7a9   :  { %v4103_v22 = vadd.f32 %v4089_v54, %v5917_v61  ;;  %v4117_v28 = vmul.f32 %v4089_v54, %v4089_v54  ;;  %v4072_v5 = vadd.f32 %v4071_v50, %v3864_v31  ;;  %v4073_v12 = vpop.f32.mrb[46].mxu1 }
 0x7aa   :  { %v4122_v53 = vadd.f32 %v4116_v24, %v4114_v56  ;;  %v5932_v63 = vmax.f32 %v4070_v47, 0.0  ;;  %v5934_v27 = vadd.f32 %v4073_v12, %v3860_v30  ;;  %v4075_v39 = vpop.f32.mrb[47].mxu1 }
 0x7ab   :  { %v4131_v38 = vadd.f32 %v4117_v28, %v4115_v7  ;;  %v5936_v10 = vmax.f32 %v4072_v5, 0.0  ;;  %v5938_v62 = vadd.f32 %v4075_v39, %v3864_v31 }
 0x7ac   :  { %v4095_v25 = vadd.f32 %v4094_v46, %v5932_v63  ;;  %v4118_v32 = vmul.f32 %v5932_v63, %v5932_v63  ;;  %v4084_v44 = vmax.f32 %v5934_v27, 0.0 }
 0x7ad   :  { %v4104_v20 = vadd.f32 %v4103_v22, %v5936_v10  ;;  %v4119_v41 = vmul.f32 %v5936_v10, %v5936_v10  ;;  %v4085_v11 = vmax.f32 %v5938_v62, 0.0 }
 0x7ae   :  { %v4123_v19 = vadd.f32 %v4122_v53, %v4118_v32  ;;  %v4092_v6 = vmul.f32 %v5700_v52, %v4084_v44 }
 0x7af   :  { %v4132_v14 = vadd.f32 %v4131_v38, %v4119_v41  ;;  %v4093_v36 = vmul.f32 %v5700_v52, %v4085_v11 }
 0x7b0   :  { %v4096_v26 = vadd.f32 %v4095_v25, %v4092_v6  ;;  %v4120_v59 = vmul.f32 %v4092_v6, %v4092_v6  ;;  %v4159_v6 = vrot.slane %v5902_v9, %v5473_v35 }
 0x7b1   :  { %v4105_v49 = vadd.f32 %v4104_v20, %v4093_v36  ;;  %v4121_v60 = vmul.f32 %v4093_v36, %v4093_v36 }
 0x7b2   :  { %v4097_v0 = vrot.slane %v4096_v26, 4  ;;  %v4124_v2 = vadd.f32 %v4123_v19, %v4120_v59  ;;  %v4155_v19 = vrot.slane %v5902_v9, %v5470_v34 }
 0x7b3   :  { %v4106_v4 = vrot.slane %v4105_v49, 4  ;;  %v4133_v17 = vadd.f32 %v4132_v14, %v4121_v60 }
 0x7b4   :  { %v4098_v8 = vadd.f32 %v4097_v0, %v4096_v26  ;;  %v4125_v13 = vrot.slane %v4124_v2, 4 }
 0x7b5   :  { %v4107_v18 = vadd.f32 %v4106_v4, %v4105_v49  ;;  %v4134_v23 = vrot.slane %v4133_v17, 4 }
 0x7b6   :  { %v4099_v16 = vrot.slane %v4098_v8, 2  ;;  %v4126_v30 = vadd.f32 %v4125_v13, %v4124_v2 }
 0x7b7   :  { %v4108_v31 = vrot.slane %v4107_v18, 2  ;;  %v4135_v29 = vadd.f32 %v4134_v23, %v4133_v17 }
 0x7b8   :  { %v4100_v37 = vadd.f32 %v4099_v16, %v4098_v8  ;;  %v4127_v42 = vrot.slane %v4126_v30, 2 }
 0x7b9   :  { %v4109_v43 = vadd.f32 %v4108_v31, %v4107_v18  ;;  %v4136_v52 = vrot.slane %v4135_v29, 2 }
 0x7ba   :  { %v4101_v33 = vrot.slane %v4100_v37, 1  ;;  %v4128_v40 = vadd.f32 %v4127_v42, %v4126_v30 }
 0x7bb   :  { %v4110_v45 = vrot.slane %v4109_v43, 1  ;;  %v4137_v54 = vadd.f32 %v4136_v52, %v4135_v29 }
 0x7bc   :  { %v4102_v58 = vadd.f32 %v4101_v33, %v4100_v37  ;;  %v4129_v56 = vrot.slane %v4128_v40, 1 }
 0x7bd   :  { %v4111_v46 = vadd.f32 %v4110_v45, %v4109_v43  ;;  %v4138_v24 = vrot.slane %v4137_v54, 1 }
 0x7be   :  { %v4112_v47 = vmul.f32 0.05, %v4102_v58  ;;  %v4130_v50 = vadd.f32 %v4129_v56, %v4128_v40 }
 0x7bf   :  { %v4113_v7 = vmul.f32 0.05, %v4111_v46  ;;  %v4139_v22 = vadd.f32 %v4138_v24, %v4137_v54 }
 0x7c0   :  { %v4140_v28 = vmul.f32 0.05, %v4130_v50  ;;  %v4142_v5 = vmul.f32 %v4112_v47, %v4112_v47 }
 0x7c1   :  { %v4141_v12 = vmul.f32 0.05, %v4139_v22  ;;  %v4143_v53 = vmul.f32 %v4113_v7, %v4113_v7 }
 0x7c2   :  { %v4144_v39 = vsub.f32 %v4140_v28, %v4142_v5 }
 0x7c3   :  { %v4145_v38 = vsub.f32 %v4141_v12, %v4143_v53 }
 0x7c4   :  { %v4146_v25 = vmax.f32 %v4144_v39, 0.0 }
 0x7c5   :  { %v4147_v32 = vmax.f32 %v4145_v38, 0.0 }
 0x7c6   :  { %v4148_v20 = vadd.f32 1e-05, %v4146_v25 }
 0x7c7   :  { %v4149_v41 = vadd.f32 1e-05, %v4147_v32 }
 0x7c8   :  { %5230 = vrsqrt.f32 %v4148_v20 }
 0x7c9   :  { %5232 = vrsqrt.f32 %v4149_v41 }
 0x7d2   :  { %v5231_v14 = vpop.eup %5230 }
 0x7d3   :  { %v5233_v36 = vpop.eup %5232  ;;  %v4162_v26 = vmul.f32 %v5231_v14, %v4155_v19 }
 0x7d4   :  { %v4163_v59 = vmul.f32 %v5233_v36, %v4159_v6 }
 0x7d5   :  { %v4164_v49 = vmul.f32 %v4162_v26, %v4112_v47  ;;  %v4175_v60 = vrot.slane %v4162_v26, %v5385_v15 }
 0x7d6   :  { %v4165_v0 = vmul.f32 %v4163_v59, %v4113_v7  ;;  %v4179_v2 = vrot.slane %v4163_v59, %v5385_v15 }
 0x7d7   :  { %v4180_v4 = vmul.f32 %v4175_v60, %v5914_v51  ;;  %v4182_v17 = vmul.f32 %v4175_v60, %v4080_v3  ;;  %v4184_v34 = vmul.f32 %v4175_v60, %v5932_v63  ;;  %v4186_v35 = vmul.f32 %v4175_v60, %v4084_v44 }
 0x7d8   :  { %v4168_v8 = vcombine.low %v4164_v49, %v4165_v0  ;;  %v4181_v13 = vmul.f32 %v4179_v2, %v5917_v61  ;;  %v4183_v18 = vmul.f32 %v4179_v2, %v4081_v21  ;;  %v4185_v23 = vmul.f32 %v4179_v2, %v5936_v10 }
 0x7d9   :  { %v4187_v15 = vmul.f32 %v4179_v2, %v4085_v11 }
 0x7da   :  { %v4169_v51 = vrot.slane %v4168_v8, 6 }
 0x7dc   :  { %v4171_v48 = vsub.f32 %v5902_v9, %v4169_v51 }
 0x7de   :  { %v4192_v3 = vrot.slane %v4171_v48, %v5494_v57  ;;  %v4196_v63 = vrot.slane %v4171_v48, %v5497_v1 }
 0x7e0   :  { %v4202_v27 = vrot.slane %v4192_v3, %v5494_v57  ;;  %v4206_v44 = vrot.slane %v4196_v63, %v5494_v57 }
 0x7e2   :  { %v4207_v61 = vadd.f32 %v4202_v27, %v4180_v4  ;;  %v4208_v16 = vadd.f32 %v4206_v44, %v4181_v13  ;;  %v4209_v55 = vadd.f32 %v4202_v27, %v4182_v17  ;;  %v4210_v21 = vadd.f32 %v4206_v44, %v4183_v18 }
 0x7e3   :  { %v4211_v30 = vadd.f32 %v4202_v27, %v4184_v34  ;;  %v4212_v10 = vadd.f32 %v4206_v44, %v4185_v23  ;;  %v4213_v31 = vadd.f32 %v4202_v27, %v4186_v35  ;;  %v4214_v62 = vadd.f32 %v4206_v44, %v4187_v15 }
 0x7e4   :  { %4215 = vst [vmem:[%s6004_s3] sm:$0xff] %v4207_v61  ;;  %4216 = vst [vmem:[%s6004_s3 + $0x8] sm:$0xff] %v4208_v16 }
 0x7e5   :  { %4217 = vst [vmem:[%s6004_s3 + $0x10] sm:$0xff] %v4209_v55  ;;  %4218 = vst [vmem:[%s6004_s3 + $0x18] sm:$0xff] %v4210_v21 }
 0x7e6   :  { %4219 = vst [vmem:[%s6004_s3 + $0x20] sm:$0xff] %v4211_v30  ;;  %4220 = vst [vmem:[%s6004_s3 + $0x28] sm:$0xff] %v4212_v10 }
 0x7e7   :  { %4221 = vst [vmem:[%s6004_s3 + $0x30] sm:$0xff] %v4213_v31  ;;  %4222 = vst [vmem:[%s6004_s3 + $0x38] sm:$0xff] %v4214_v62 }
 0x7e8   :  { %4227 = vsyncpa [#allocation3], 1 }
 0x7e9   :  { %4228 = vsyncpa [#allocation5], 1 }

</bundles_post_ra>
